<compile_context>
chip_gen: v7x
topology: tpu7x:2x2x1
jax: 0.10.0
libtpu: 0.0.40
codegen_flags: <defaults>
</compile_context>

<pallas_src>
import jax
import jax.numpy as jnp
from jax import lax
from jax.experimental import pallas as pl
from jax.experimental.pallas import tpu as pltpu

# `config['picture_size']` from the original model is not provided in-script;
# use 32x32 so fc1's in-features = 32*32/16 = 64 (matches the module reshape).
PICTURE_SIZE = (32, 32)


# ----------------------------------------------------------------------------
# Fully fused kernel: conv1+pool -> conv2+pool -> conv3 -> fc1/fc2/fc3 -> sigmoid
# ----------------------------------------------------------------------------
def _disc_kernel(x1_ref, w1c_ref, b1c_ref, w2c_ref, b2c_ref, w3c_ref, b3c_ref,
                 wf1_ref, bf1_ref, wf2_ref, bf2_ref, wf3_ref, bf3_ref,
                 o_ref, h1sp_ref, h2p_ref):
    # Shapes (all static, derived from the refs):
    #   x1_ref : (NB, 4, 4P, 27)  conv1 im2col; dim1 = conv1-pool phase (ay,ax),
    #            dim2 rows ordered (qy, qx, i, j) with pooled pos (2i+qy, 2j+qx)
    #   h1sp   : (NB, 4, H4+2, W4+2, 32) f32 scratch; parity-split, zero-padded
    #            conv1 pooled output: [n, qy*2+qx, 1+i', 1+j', c] = h1[2i'+qy, 2j'+qx, c]
    #   h2p    : (NB, H4+2, W4+2, 32) f32 scratch; zero-padded conv2 pooled output
    NB = x1_ref.shape[0]
    H4 = h2p_ref.shape[1] - 2
    W4 = h2p_ref.shape[2] - 2
    P = H4 * W4                      # pooled positions after second pool (fc1 K)
    C = b1c_ref.shape[1]             # 32 channels

    # Zero the padded scratch buffers (their borders implement the conv padding).
    # Done every step so the kernel is correct under megacore grid splitting.
    h1sp_ref[...] = jnp.zeros_like(h1sp_ref)
    h2p_ref[...] = jnp.zeros_like(h2p_ref)

    # ---- Stage 1: conv1 (single K=27 im2col matmul) + 2x2 maxpool + bias + ReLU
    M1 = NB * 4 * 4 * P
    x1 = x1_ref[...].reshape(M1, x1_ref.shape[-1])                       # bf16
    y1 = jnp.dot(x1, w1c_ref[...], preferred_element_type=jnp.float32)   # (M1, 32)
    y1 = y1.reshape(NB, 4, 4 * P, C)
    h1 = jnp.maximum(jnp.maximum(y1[:, 0], y1[:, 1]),
                     jnp.maximum(y1[:, 2], y1[:, 3]))                    # pool (leading dim)
    h1 = jnp.maximum(h1 + b1c_ref[...], 0.0)                             # (NB, 4P, 32) f32
    # Scatter into the parity-split, zero-padded scratch.
    for q in range(4):
        h1sp_ref[:, q, 1:1 + H4, 1:1 + W4, :] = (
            h1[:, q * P:(q + 1) * P, :].reshape(NB, H4, W4, C))

    # ---- Stage 2: conv2 (9 taps, M = NB*4*P stacked) + 2x2 maxpool + bias + ReLU
    M2 = NB * 4 * P
    acc2 = jnp.zeros((M2, C), jnp.float32)
    for dy in range(3):
        for dx in range(3):
            parts = []
            for py in range(2):          # conv2-pool phase rows
                for px in range(2):      # conv2-pool phase cols
                    t = py + dy - 1
                    u = px + dx - 1
                    si, qy = t // 2, t % 2
                    sj, qx = u // 2, u % 2
                    q = qy * 2 + qx
                    slab = h1sp_ref[:, q, 1 + si:1 + si + H4, 1 + sj:1 + sj + W4, :]
                    parts.append(slab.reshape(NB, 1, P, C))
            lhs = jnp.concatenate(parts, axis=1).reshape(M2, C)
            acc2 = acc2 + jnp.dot(lhs.astype(jnp.bfloat16), w2c_ref[dy * 3 + dx],
                                  preferred_element_type=jnp.float32)
    y2 = acc2.reshape(NB, 4, P, C)
    h2 = jnp.maximum(jnp.maximum(y2[:, 0], y2[:, 1]),
                     jnp.maximum(y2[:, 2], y2[:, 3]))                    # pool (leading dim)
    h2 = jnp.maximum(h2 + b2c_ref[...], 0.0)                             # (NB, P, 32) f32
    h2p_ref[:, 1:1 + H4, 1:1 + W4, :] = h2.reshape(NB, H4, W4, C)

    # ---- Stage 3: conv3 (32 -> 1) + bias + ReLU, on the VPU (f32) ------------
    acc3 = jnp.zeros((NB * P, C), jnp.float32)
    for dy in range(3):
        for dx in range(3):
            slab = h2p_ref[:, dy:dy + H4, dx:dx + W4, :].reshape(NB * P, C)
            acc3 = acc3 + slab * w3c_ref[dy * 3 + dx]                    # (1,32) bcast
    h3 = jnp.maximum(jnp.sum(acc3, axis=-1, keepdims=True) + b3c_ref[...], 0.0)
    # h3: (NB*P, 1) f32 -- the 64 flattened conv3 features per image, in sublanes.

    # ---- fc1: per-image broadcast-multiply + sublane reduce (VPU, f32) ------
    # Avoids any lane<->sublane relayout of the tiny conv3 output and yields a
    # lane-dense (NB, 1024) activation for the MXU fc2/fc3 dots.
    n_ids = lax.broadcasted_iota(jnp.int32, (NB, 1), 0)
    h4 = jnp.zeros((NB, wf1_ref.shape[1]), jnp.float32)
    for n in range(NB):
        col = h3[n * P:(n + 1) * P, :]                                   # (P, 1)
        row = jnp.sum(col * wf1_ref[...], axis=0, keepdims=True)         # (1, 1024)
        h4 = h4 + jnp.where(n_ids == n, row, 0.0)
    h4 = jnp.maximum(h4 + bf1_ref[...], 0.0)                             # (NB, 1024)

    # ---- fc2 / fc3 (+ sigmoid): lane-dense row-form MXU matmuls -------------
    h5 = jnp.dot(h4.astype(jnp.bfloat16), wf2_ref[...],
                 preferred_element_type=jnp.float32) + bf2_ref[...]
    h5 = jnp.maximum(h5, 0.0)                                            # (NB, 256)
    h6 = jnp.dot(h5.astype(jnp.bfloat16), wf3_ref[...],
                 preferred_element_type=jnp.float32) + bf3_ref[...]      # (NB, 1)
    o_ref[0] = 1.0 / (1.0 + jnp.exp(-h6))


# ----------------------------------------------------------------------------
# Wrapper: conv1 im2col prologue (tiny XLA glue on the raw input) + pallas_call
# ----------------------------------------------------------------------------
def _pick_block(b):
    # Largest images-per-step in {8,4,2,1} dividing B while keeping >= 2 grid
    # steps (so both v7x TensorCores get work); fall back to any divisor.
    for nb in (8, 4, 2, 1):
        if b % nb == 0 and b // nb >= 2:
            return nb
    for nb in (8, 4, 2, 1):
        if b % nb == 0:
            return nb
    return 1


def discriminator_forward(x_nchw, kp):
    B, cin, H, W = x_nchw.shape
    assert cin == 3 and H % 4 == 0 and W % 4 == 0, "need NCHW RGB, H/W divisible by 4"
    H4, W4 = H // 4, W // 4
    P = H4 * W4
    assert kp['fc1'][0].shape[0] == P, "fc1 in-features must equal H*W/16"
    NB = _pick_block(B)
    G = B // NB

    # conv1 im2col prologue:
    #   x1col[b, a, r, k] with a = ay*2+ax (conv1-pool phase),
    #   r = ((qy*2+qx)*H4 + i)*W4 + j  (pooled position (2i+qy, 2j+qx)),
    #   k = (dy*3+dx)*3 + c            (3x3 tap, input channel).
    x = jnp.transpose(x_nchw, (0, 2, 3, 1)).astype(jnp.float32)          # NHWC
    xpad = jnp.pad(x, ((0, 0), (1, 1), (1, 1), (0, 0)))
    cols = jnp.concatenate(
        [xpad[:, dy:dy + H, dx:dx + W, :] for dy in range(3) for dx in range(3)],
        axis=-1)                                                         # (B, H, W, 27)
    cols = cols.reshape(B, H4, 2, 2, W4, 2, 2, 27)                       # (b,i,qy,ay,j,qx,ax,k)
    cols = cols.transpose(0, 3, 6, 2, 5, 1, 4, 7)                        # (b,ay,ax,qy,qx,i,j,k)
    x1col = cols.reshape(B, 4, 4 * P, 27).astype(jnp.bfloat16)

    w1c, b1c = kp['conv1']
    w2c, b2c = kp['conv2']
    w3c, b3c = kp['conv3']
    wf1, bf1 = kp['fc1']
    wf2, bf2 = kp['fc2']
    wf3, bf3 = kp['fc3']
    consts = [w1c, b1c, w2c, b2c, w3c, b3c, wf1, bf1, wf2, bf2, wf3, bf3]

    def const_spec(a):
        zeros = (0,) * a.ndim
        return pl.BlockSpec(a.shape, lambda b, _z=zeros: _z)

    out = pl.pallas_call(
        _disc_kernel,
        out_shape=jax.ShapeDtypeStruct((G, NB, 1), jnp.float32),
        grid_spec=pltpu.PrefetchScalarGridSpec(
            num_scalar_prefetch=0,
            grid=(G,),
            in_specs=[pl.BlockSpec((NB, 4, 4 * P, 27), lambda b: (b, 0, 0, 0))]
                     + [const_spec(a) for a in consts],
            out_specs=pl.BlockSpec((1, NB, 1), lambda b: (b, 0, 0)),
            scratch_shapes=[
                pltpu.VMEM((NB, 4, H4 + 2, W4 + 2, 32), jnp.float32),   # parity-split h1
                pltpu.VMEM((NB, H4 + 2, W4 + 2, 32), jnp.float32),      # padded h2
            ],
        ),
        compiler_params=pltpu.CompilerParams(
            dimension_semantics=("parallel",),
            vmem_limit_bytes=32 * 1024 * 1024,
        ),
    )(x1col, *consts)
    return out.reshape(B, 1)


# ----------------------------------------------------------------------------
# Parameters (PyTorch-style layouts + kernel-ready versions)
# ----------------------------------------------------------------------------
def init_params(key):
    def uconv(k, cout, cin):
        bound = 1.0 / (cin * 9) ** 0.5
        kw, kb = jax.random.split(k)
        w = jax.random.uniform(kw, (cout, cin, 3, 3), jnp.float32, -bound, bound)
        b = jax.random.uniform(kb, (cout,), jnp.float32, -bound, bound)
        return w, b

    def ulin(k, cout, cin):
        bound = 1.0 / cin ** 0.5
        kw, kb = jax.random.split(k)
        w = jax.random.uniform(kw, (cout, cin), jnp.float32, -bound, bound)
        b = jax.random.uniform(kb, (cout,), jnp.float32, -bound, bound)
        return w, b

    ks = jax.random.split(key, 6)
    feat = (PICTURE_SIZE[0] * PICTURE_SIZE[1]) // 16
    return {
        'conv1': uconv(ks[0], 32, 3),
        'conv2': uconv(ks[1], 32, 32),
        'conv3': uconv(ks[2], 1, 32),
        'fc1': ulin(ks[3], 1024, feat),
        'fc2': ulin(ks[4], 256, 1024),
        'fc3': ulin(ks[5], 1, 256),
    }


def prep_params(p):
    kp = {}
    # conv1: (32,3,3,3) OIHW -> (27, 32) bf16, rows ordered (dy, dx, cin).
    w, b = p['conv1']
    kp['conv1'] = (jnp.transpose(w, (2, 3, 1, 0)).reshape(27, 32).astype(jnp.bfloat16),
                   b.reshape(1, -1).astype(jnp.float32))
    # conv2: (32,32,3,3) -> (9, 32, 32) bf16 (tap, cin, cout).
    w, b = p['conv2']
    kp['conv2'] = (jnp.transpose(w, (2, 3, 1, 0)).reshape(9, 32, 32).astype(jnp.bfloat16),
                   b.reshape(1, -1).astype(jnp.float32))
    # conv3: (1,32,3,3) -> (9, 1, 32) f32 (tap, 1, cin) -- used on the VPU.
    w, b = p['conv3']
    kp['conv3'] = (jnp.transpose(w, (2, 3, 0, 1)).reshape(9, 1, 32).astype(jnp.float32),
                   b.reshape(1, 1).astype(jnp.float32))
    # fc1: (1024, 64) -> (64, 1024) f32 (used on the VPU).
    w, b = p['fc1']
    kp['fc1'] = (jnp.transpose(w).astype(jnp.float32), b.reshape(1, -1).astype(jnp.float32))
    # fc2: (256, 1024) -> (1024, 256) bf16.
    w, b = p['fc2']
    kp['fc2'] = (jnp.transpose(w).astype(jnp.bfloat16), b.reshape(1, -1).astype(jnp.float32))
    # fc3: (1, 256) -> (256, 1) bf16.
    w, b = p['fc3']
    kp['fc3'] = (jnp.transpose(w).astype(jnp.bfloat16), b.reshape(1, -1).astype(jnp.float32))
    return kp


# ----------------------------------------------------------------------------
# Pure-JAX f32 reference (mirrors the PyTorch ops)
# ----------------------------------------------------------------------------
def _ref_forward(x, p):
    def conv_relu(x, w, b):
        y = lax.conv_general_dilated(
            x, w, window_strides=(1, 1), padding=((1, 1), (1, 1)),
            dimension_numbers=('NCHW', 'OIHW', 'NCHW'))
        return jnp.maximum(y + b.reshape(1, -1, 1, 1), 0.0)

    def pool(x):
        return jnp.maximum(
            jnp.maximum(x[:, :, 0::2, 0::2], x[:, :, 0::2, 1::2]),
            jnp.maximum(x[:, :, 1::2, 0::2], x[:, :, 1::2, 1::2]))

    h = pool(conv_relu(x, *p['conv1']))
    h = pool(conv_relu(h, *p['conv2']))
    h = conv_relu(h, *p['conv3'])
    h = h.reshape(h.shape[0], -1)
    w, b = p['fc1']; h = jnp.maximum(h @ w.T + b, 0.0)
    w, b = p['fc2']; h = jnp.maximum(h @ w.T + b, 0.0)
    w, b = p['fc3']; h = h @ w.T + b
    return jax.nn.sigmoid(h)


if __name__ == "__main__":
    key = jax.random.PRNGKey(0)
    B = 2
    H, W = PICTURE_SIZE

    x = jax.random.normal(jax.random.fold_in(key, 99), (B, 3, H, W), jnp.float32)
    params = init_params(key)
    kparams = prep_params(params)

    fwd = jax.jit(discriminator_forward)
    out = jax.block_until_ready(fwd(x, kparams))

    ref = _ref_forward(x, params)
    assert out.shape == (B, 1), f"bad output shape {out.shape}"
    # bf16 MXU operands vs f32 reference -> loose-but-meaningful tolerance.
    assert jnp.allclose(out, ref, atol=2e-2, rtol=2e-2), f"mismatch: {out} vs {ref}"

    print("KERNEL_OK")
</pallas_src>

<mosaic_0001>
module attributes {stable_mosaic.version = 11 : i64} {
  func.func @_disc_kernel(%arg0: i32, %arg1: memref<1x4x256x27xbf16, #tpu.memory_space<vmem>>, %arg2: memref<27x32xbf16, #tpu.memory_space<vmem>>, %arg3: memref<1x32xf32, #tpu.memory_space<vmem>>, %arg4: memref<9x32x32xbf16, #tpu.memory_space<vmem>>, %arg5: memref<1x32xf32, #tpu.memory_space<vmem>>, %arg6: memref<9x1x32xf32, #tpu.memory_space<vmem>>, %arg7: memref<1x1xf32, #tpu.memory_space<vmem>>, %arg8: memref<64x1024xf32, #tpu.memory_space<vmem>>, %arg9: memref<1x1024xf32, #tpu.memory_space<vmem>>, %arg10: memref<1024x256xbf16, #tpu.memory_space<vmem>>, %arg11: memref<1x256xf32, #tpu.memory_space<vmem>>, %arg12: memref<256x1xbf16, #tpu.memory_space<vmem>>, %arg13: memref<1x1xf32, #tpu.memory_space<vmem>>, %arg14: memref<1x1x1xf32, #tpu.memory_space<vmem>>, %arg15: memref<1x4x10x10x32xf32, #tpu.memory_space<vmem>>, %arg16: memref<1x10x10x32xf32, #tpu.memory_space<vmem>>) attributes {dimension_semantics = [#tpu.dimension_semantics<parallel>], iteration_bounds = array<i64: 2>, scalar_prefetch = 0 : i64, scratch_operands = 2 : i64, tpu.core_type = #tpu.core_type<tc>, window_params = [{transform_indices = @transform_0, window_bounds = array<i64: 1, 4, 256, 27>}, {pipeline_mode = #tpu.pipeline_mode<synchronous>, transform_indices = @transform_1, window_bounds = array<i64: 27, 32>}, {pipeline_mode = #tpu.pipeline_mode<synchronous>, transform_indices = @transform_2, window_bounds = array<i64: 1, 32>}, {pipeline_mode = #tpu.pipeline_mode<synchronous>, transform_indices = @transform_3, window_bounds = array<i64: 9, 32, 32>}, {pipeline_mode = #tpu.pipeline_mode<synchronous>, transform_indices = @transform_4, window_bounds = array<i64: 1, 32>}, {pipeline_mode = #tpu.pipeline_mode<synchronous>, transform_indices = @transform_5, window_bounds = array<i64: 9, 1, 32>}, {pipeline_mode = #tpu.pipeline_mode<synchronous>, transform_indices = @transform_6, window_bounds = array<i64: 1, 1>}, {pipeline_mode = #tpu.pipeline_mode<synchronous>, transform_indices = @transform_7, window_bounds = array<i64: 64, 1024>}, {pipeline_mode = #tpu.pipeline_mode<synchronous>, transform_indices = @transform_8, window_bounds = array<i64: 1, 1024>}, {pipeline_mode = #tpu.pipeline_mode<synchronous>, transform_indices = @transform_9, window_bounds = array<i64: 1024, 256>}, {pipeline_mode = #tpu.pipeline_mode<synchronous>, transform_indices = @transform_10, window_bounds = array<i64: 1, 256>}, {pipeline_mode = #tpu.pipeline_mode<synchronous>, transform_indices = @transform_11, window_bounds = array<i64: 256, 1>}, {pipeline_mode = #tpu.pipeline_mode<synchronous>, transform_indices = @transform_12, window_bounds = array<i64: 1, 1>}, {transform_indices = @transform_13, window_bounds = array<i64: 1, 1, 1>}]} {
    %cst = arith.constant 0.000000e+00 : f32
    %0 = vector.broadcast %cst : f32 to vector<1x4x10x10x32xf32>
    %c0 = arith.constant 0 : index
    %c0_0 = arith.constant 0 : index
    %c0_1 = arith.constant 0 : index
    %c0_2 = arith.constant 0 : index
    %c0_3 = arith.constant 0 : index
    %1 = vector.load %arg15[%c0, %c0_0, %c0_1, %c0_2, %c0_3] : memref<1x4x10x10x32xf32, #tpu.memory_space<vmem>>, vector<1x4x10x10x32xf32>
    tpu.vector_store %arg15[%c0, %c0_0, %c0_1, %c0_2, %c0_3], %0 {strides = array<i32>} : memref<1x4x10x10x32xf32, #tpu.memory_space<vmem>>, vector<1x4x10x10x32xf32>,
    %cst_4 = arith.constant 0.000000e+00 : f32
    %2 = vector.broadcast %cst_4 : f32 to vector<1x10x10x32xf32>
    %c0_5 = arith.constant 0 : index
    %c0_6 = arith.constant 0 : index
    %c0_7 = arith.constant 0 : index
    %c0_8 = arith.constant 0 : index
    %3 = vector.load %arg16[%c0_5, %c0_6, %c0_7, %c0_8] : memref<1x10x10x32xf32, #tpu.memory_space<vmem>>, vector<1x10x10x32xf32>
    tpu.vector_store %arg16[%c0_5, %c0_6, %c0_7, %c0_8], %2 {strides = array<i32>} : memref<1x10x10x32xf32, #tpu.memory_space<vmem>>, vector<1x10x10x32xf32>,
    %c0_9 = arith.constant 0 : index
    %c0_10 = arith.constant 0 : index
    %c0_11 = arith.constant 0 : index
    %c0_12 = arith.constant 0 : index
    %4 = vector.load %arg1[%c0_9, %c0_10, %c0_11, %c0_12] : memref<1x4x256x27xbf16, #tpu.memory_space<vmem>>, vector<1x4x256x27xbf16>
    %5 = vector.shape_cast %4 : vector<1x4x256x27xbf16> to vector<1024x27xbf16>
    %c0_13 = arith.constant 0 : index
    %c0_14 = arith.constant 0 : index
    %6 = vector.load %arg2[%c0_13, %c0_14] : memref<27x32xbf16, #tpu.memory_space<vmem>>, vector<27x32xbf16>
    %cst_15 = arith.constant dense<0.000000e+00> : vector<1024x32xf32>
    %7 = tpu.matmul %5, %6, %cst_15 {dimension_numbers = #tpu.dot_dimension_numbers<[1], [0], [0], [1], [0, 0, 1, 1], [], []>} : vector<1024x27xbf16>, vector<27x32xbf16>, vector<1024x32xf32> -> vector<1024x32xf32>
    %8 = vector.shape_cast %7 : vector<1024x32xf32> to vector<1x4x256x32xf32>
    %9 = vector.extract_strided_slice %8 {offsets = [0, 0, 0, 0], sizes = [1, 1, 256, 32], strides = [1, 1, 1, 1]} : vector<1x4x256x32xf32> to vector<1x1x256x32xf32>
    %10 = vector.shape_cast %9 : vector<1x1x256x32xf32> to vector<1x256x32xf32>
    %11 = vector.extract_strided_slice %8 {offsets = [0, 1, 0, 0], sizes = [1, 1, 256, 32], strides = [1, 1, 1, 1]} : vector<1x4x256x32xf32> to vector<1x1x256x32xf32>
    %12 = vector.shape_cast %11 : vector<1x1x256x32xf32> to vector<1x256x32xf32>
    %13 = arith.maximumf %10, %12 : vector<1x256x32xf32>
    %14 = vector.extract_strided_slice %8 {offsets = [0, 2, 0, 0], sizes = [1, 1, 256, 32], strides = [1, 1, 1, 1]} : vector<1x4x256x32xf32> to vector<1x1x256x32xf32>
    %15 = vector.shape_cast %14 : vector<1x1x256x32xf32> to vector<1x256x32xf32>
    %16 = vector.extract_strided_slice %8 {offsets = [0, 3, 0, 0], sizes = [1, 1, 256, 32], strides = [1, 1, 1, 1]} : vector<1x4x256x32xf32> to vector<1x1x256x32xf32>
    %17 = vector.shape_cast %16 : vector<1x1x256x32xf32> to vector<1x256x32xf32>
    %18 = arith.maximumf %15, %17 : vector<1x256x32xf32>
    %19 = arith.maximumf %13, %18 : vector<1x256x32xf32>
    %c0_16 = arith.constant 0 : index
    %c0_17 = arith.constant 0 : index
    %20 = vector.load %arg3[%c0_16, %c0_17] : memref<1x32xf32, #tpu.memory_space<vmem>>, vector<1x32xf32>
    %21 = vector.shape_cast %20 : vector<1x32xf32> to vector<1x1x32xf32>
    %22 = vector.broadcast %21 : vector<1x1x32xf32> to vector<1x256x32xf32>
    %23 = arith.addf %19, %22 : vector<1x256x32xf32>
    %cst_18 = arith.constant 0.000000e+00 : f32
    %24 = vector.broadcast %cst_18 : f32 to vector<1x256x32xf32>
    %25 = arith.maximumf %23, %24 : vector<1x256x32xf32>
    %26 = vector.extract_strided_slice %25 {offsets = [0, 0, 0], sizes = [1, 64, 32], strides = [1, 1, 1]} : vector<1x256x32xf32> to vector<1x64x32xf32>
    %27 = vector.shape_cast %26 : vector<1x64x32xf32> to vector<1x8x8x32xf32>
    %c0_19 = arith.constant 0 : index
    %c0_20 = arith.constant 0 : index
    %c1 = arith.constant 1 : index
    %c1_21 = arith.constant 1 : index
    %c0_22 = arith.constant 0 : index
    %28 = vector.load %arg15[%c0_19, %c0_20, %c1, %c1_21, %c0_22] : memref<1x4x10x10x32xf32, #tpu.memory_space<vmem>>, vector<1x1x8x8x32xf32>
    %29 = vector.shape_cast %28 : vector<1x1x8x8x32xf32> to vector<1x8x8x32xf32>
    %30 = vector.shape_cast %27 : vector<1x8x8x32xf32> to vector<1x1x8x8x32xf32>
    tpu.vector_store %arg15[%c0_19, %c0_20, %c1, %c1_21, %c0_22], %30 {strides = array<i32>} : memref<1x4x10x10x32xf32, #tpu.memory_space<vmem>>, vector<1x1x8x8x32xf32>,
    %31 = vector.extract_strided_slice %25 {offsets = [0, 64, 0], sizes = [1, 64, 32], strides = [1, 1, 1]} : vector<1x256x32xf32> to vector<1x64x32xf32>
    %32 = vector.shape_cast %31 : vector<1x64x32xf32> to vector<1x8x8x32xf32>
    %c0_23 = arith.constant 0 : index
    %c1_24 = arith.constant 1 : index
    %c1_25 = arith.constant 1 : index
    %c1_26 = arith.constant 1 : index
    %c0_27 = arith.constant 0 : index
    %33 = vector.load %arg15[%c0_23, %c1_24, %c1_25, %c1_26, %c0_27] : memref<1x4x10x10x32xf32, #tpu.memory_space<vmem>>, vector<1x1x8x8x32xf32>
    %34 = vector.shape_cast %33 : vector<1x1x8x8x32xf32> to vector<1x8x8x32xf32>
    %35 = vector.shape_cast %32 : vector<1x8x8x32xf32> to vector<1x1x8x8x32xf32>
    tpu.vector_store %arg15[%c0_23, %c1_24, %c1_25, %c1_26, %c0_27], %35 {strides = array<i32>} : memref<1x4x10x10x32xf32, #tpu.memory_space<vmem>>, vector<1x1x8x8x32xf32>,
    %36 = vector.extract_strided_slice %25 {offsets = [0, 128, 0], sizes = [1, 64, 32], strides = [1, 1, 1]} : vector<1x256x32xf32> to vector<1x64x32xf32>
    %37 = vector.shape_cast %36 : vector<1x64x32xf32> to vector<1x8x8x32xf32>
    %c0_28 = arith.constant 0 : index
    %c2 = arith.constant 2 : index
    %c1_29 = arith.constant 1 : index
    %c1_30 = arith.constant 1 : index
    %c0_31 = arith.constant 0 : index
    %38 = vector.load %arg15[%c0_28, %c2, %c1_29, %c1_30, %c0_31] : memref<1x4x10x10x32xf32, #tpu.memory_space<vmem>>, vector<1x1x8x8x32xf32>
    %39 = vector.shape_cast %38 : vector<1x1x8x8x32xf32> to vector<1x8x8x32xf32>
    %40 = vector.shape_cast %37 : vector<1x8x8x32xf32> to vector<1x1x8x8x32xf32>
    tpu.vector_store %arg15[%c0_28, %c2, %c1_29, %c1_30, %c0_31], %40 {strides = array<i32>} : memref<1x4x10x10x32xf32, #tpu.memory_space<vmem>>, vector<1x1x8x8x32xf32>,
    %41 = vector.extract_strided_slice %25 {offsets = [0, 192, 0], sizes = [1, 64, 32], strides = [1, 1, 1]} : vector<1x256x32xf32> to vector<1x64x32xf32>
    %42 = vector.shape_cast %41 : vector<1x64x32xf32> to vector<1x8x8x32xf32>
    %c0_32 = arith.constant 0 : index
    %c3 = arith.constant 3 : index
    %c1_33 = arith.constant 1 : index
    %c1_34 = arith.constant 1 : index
    %c0_35 = arith.constant 0 : index
    %43 = vector.load %arg15[%c0_32, %c3, %c1_33, %c1_34, %c0_35] : memref<1x4x10x10x32xf32, #tpu.memory_space<vmem>>, vector<1x1x8x8x32xf32>
    %44 = vector.shape_cast %43 : vector<1x1x8x8x32xf32> to vector<1x8x8x32xf32>
    %45 = vector.shape_cast %42 : vector<1x8x8x32xf32> to vector<1x1x8x8x32xf32>
    tpu.vector_store %arg15[%c0_32, %c3, %c1_33, %c1_34, %c0_35], %45 {strides = array<i32>} : memref<1x4x10x10x32xf32, #tpu.memory_space<vmem>>, vector<1x1x8x8x32xf32>,
    %cst_36 = arith.constant 0.000000e+00 : f32
    %46 = vector.broadcast %cst_36 : f32 to vector<256x32xf32>
    %c0_37 = arith.constant 0 : index
    %c3_38 = arith.constant 3 : index
    %c0_39 = arith.constant 0 : index
    %c0_40 = arith.constant 0 : index
    %c0_41 = arith.constant 0 : index
    %47 = vector.load %arg15[%c0_37, %c3_38, %c0_39, %c0_40, %c0_41] : memref<1x4x10x10x32xf32, #tpu.memory_space<vmem>>, vector<1x1x8x8x32xf32>
    %48 = vector.shape_cast %47 : vector<1x1x8x8x32xf32> to vector<1x8x8x32xf32>
    %49 = vector.shape_cast %48 : vector<1x8x8x32xf32> to vector<1x1x64x32xf32>
    %c0_42 = arith.constant 0 : index
    %c2_43 = arith.constant 2 : index
    %c0_44 = arith.constant 0 : index
    %c1_45 = arith.constant 1 : index
    %c0_46 = arith.constant 0 : index
    %50 = vector.load %arg15[%c0_42, %c2_43, %c0_44, %c1_45, %c0_46] : memref<1x4x10x10x32xf32, #tpu.memory_space<vmem>>, vector<1x1x8x8x32xf32>
    %51 = vector.shape_cast %50 : vector<1x1x8x8x32xf32> to vector<1x8x8x32xf32>
    %52 = vector.shape_cast %51 : vector<1x8x8x32xf32> to vector<1x1x64x32xf32>
    %c0_47 = arith.constant 0 : index
    %c1_48 = arith.constant 1 : index
    %c1_49 = arith.constant 1 : index
    %c0_50 = arith.constant 0 : index
    %c0_51 = arith.constant 0 : index
    %53 = vector.load %arg15[%c0_47, %c1_48, %c1_49, %c0_50, %c0_51] : memref<1x4x10x10x32xf32, #tpu.memory_space<vmem>>, vector<1x1x8x8x32xf32>
    %54 = vector.shape_cast %53 : vector<1x1x8x8x32xf32> to vector<1x8x8x32xf32>
    %55 = vector.shape_cast %54 : vector<1x8x8x32xf32> to vector<1x1x64x32xf32>
    %c0_52 = arith.constant 0 : index
    %c0_53 = arith.constant 0 : index
    %c1_54 = arith.constant 1 : index
    %c1_55 = arith.constant 1 : index
    %c0_56 = arith.constant 0 : index
    %56 = vector.load %arg15[%c0_52, %c0_53, %c1_54, %c1_55, %c0_56] : memref<1x4x10x10x32xf32, #tpu.memory_space<vmem>>, vector<1x1x8x8x32xf32>
    %57 = vector.shape_cast %56 : vector<1x1x8x8x32xf32> to vector<1x8x8x32xf32>
    %58 = vector.shape_cast %57 : vector<1x8x8x32xf32> to vector<1x1x64x32xf32>
    %59 = tpu.concatenate %49, %52, %55, %58 in 1 : vector<1x1x64x32xf32>, vector<1x1x64x32xf32>, vector<1x1x64x32xf32>, vector<1x1x64x32xf32> -> vector<1x4x64x32xf32>
    %60 = vector.shape_cast %59 : vector<1x4x64x32xf32> to vector<256x32xf32>
    %61 = arith.truncf %60 : vector<256x32xf32> to vector<256x32xbf16>
    %c0_57 = arith.constant 0 : index
    %c0_58 = arith.constant 0 : index
    %c0_59 = arith.constant 0 : index
    %62 = vector.load %arg4[%c0_57, %c0_58, %c0_59] : memref<9x32x32xbf16, #tpu.memory_space<vmem>>, vector<1x32x32xbf16>
    %63 = vector.shape_cast %62 : vector<1x32x32xbf16> to vector<32x32xbf16>
    %cst_60 = arith.constant dense<0.000000e+00> : vector<256x32xf32>
    %64 = tpu.matmul %61, %63, %cst_60 {dimension_numbers = #tpu.dot_dimension_numbers<[1], [0], [0], [1], [0, 0, 1, 1], [], []>} : vector<256x32xbf16>, vector<32x32xbf16>, vector<256x32xf32> -> vector<256x32xf32>
    %65 = arith.addf %46, %64 : vector<256x32xf32>
    %c0_61 = arith.constant 0 : index
    %c2_62 = arith.constant 2 : index
    %c0_63 = arith.constant 0 : index
    %c1_64 = arith.constant 1 : index
    %c0_65 = arith.constant 0 : index
    %66 = vector.load %arg15[%c0_61, %c2_62, %c0_63, %c1_64, %c0_65] : memref<1x4x10x10x32xf32, #tpu.memory_space<vmem>>, vector<1x1x8x8x32xf32>
    %67 = vector.shape_cast %66 : vector<1x1x8x8x32xf32> to vector<1x8x8x32xf32>
    %68 = vector.shape_cast %67 : vector<1x8x8x32xf32> to vector<1x1x64x32xf32>
    %c0_66 = arith.constant 0 : index
    %c3_67 = arith.constant 3 : index
    %c0_68 = arith.constant 0 : index
    %c1_69 = arith.constant 1 : index
    %c0_70 = arith.constant 0 : index
    %69 = vector.load %arg15[%c0_66, %c3_67, %c0_68, %c1_69, %c0_70] : memref<1x4x10x10x32xf32, #tpu.memory_space<vmem>>, vector<1x1x8x8x32xf32>
    %70 = vector.shape_cast %69 : vector<1x1x8x8x32xf32> to vector<1x8x8x32xf32>
    %71 = vector.shape_cast %70 : vector<1x8x8x32xf32> to vector<1x1x64x32xf32>
    %c0_71 = arith.constant 0 : index
    %c0_72 = arith.constant 0 : index
    %c1_73 = arith.constant 1 : index
    %c1_74 = arith.constant 1 : index
    %c0_75 = arith.constant 0 : index
    %72 = vector.load %arg15[%c0_71, %c0_72, %c1_73, %c1_74, %c0_75] : memref<1x4x10x10x32xf32, #tpu.memory_space<vmem>>, vector<1x1x8x8x32xf32>
    %73 = vector.shape_cast %72 : vector<1x1x8x8x32xf32> to vector<1x8x8x32xf32>
    %74 = vector.shape_cast %73 : vector<1x8x8x32xf32> to vector<1x1x64x32xf32>
    %c0_76 = arith.constant 0 : index
    %c1_77 = arith.constant 1 : index
    %c1_78 = arith.constant 1 : index
    %c1_79 = arith.constant 1 : index
    %c0_80 = arith.constant 0 : index
    %75 = vector.load %arg15[%c0_76, %c1_77, %c1_78, %c1_79, %c0_80] : memref<1x4x10x10x32xf32, #tpu.memory_space<vmem>>, vector<1x1x8x8x32xf32>
    %76 = vector.shape_cast %75 : vector<1x1x8x8x32xf32> to vector<1x8x8x32xf32>
    %77 = vector.shape_cast %76 : vector<1x8x8x32xf32> to vector<1x1x64x32xf32>
    %78 = tpu.concatenate %68, %71, %74, %77 in 1 : vector<1x1x64x32xf32>, vector<1x1x64x32xf32>, vector<1x1x64x32xf32>, vector<1x1x64x32xf32> -> vector<1x4x64x32xf32>
    %79 = vector.shape_cast %78 : vector<1x4x64x32xf32> to vector<256x32xf32>
    %80 = arith.truncf %79 : vector<256x32xf32> to vector<256x32xbf16>
    %c1_81 = arith.constant 1 : index
    %c0_82 = arith.constant 0 : index
    %c0_83 = arith.constant 0 : index
    %81 = vector.load %arg4[%c1_81, %c0_82, %c0_83] : memref<9x32x32xbf16, #tpu.memory_space<vmem>>, vector<1x32x32xbf16>
    %82 = vector.shape_cast %81 : vector<1x32x32xbf16> to vector<32x32xbf16>
    %cst_84 = arith.constant dense<0.000000e+00> : vector<256x32xf32>
    %83 = tpu.matmul %80, %82, %cst_84 {dimension_numbers = #tpu.dot_dimension_numbers<[1], [0], [0], [1], [0, 0, 1, 1], [], []>} : vector<256x32xbf16>, vector<32x32xbf16>, vector<256x32xf32> -> vector<256x32xf32>
    %84 = arith.addf %65, %83 : vector<256x32xf32>
    %c0_85 = arith.constant 0 : index
    %c3_86 = arith.constant 3 : index
    %c0_87 = arith.constant 0 : index
    %c1_88 = arith.constant 1 : index
    %c0_89 = arith.constant 0 : index
    %85 = vector.load %arg15[%c0_85, %c3_86, %c0_87, %c1_88, %c0_89] : memref<1x4x10x10x32xf32, #tpu.memory_space<vmem>>, vector<1x1x8x8x32xf32>
    %86 = vector.shape_cast %85 : vector<1x1x8x8x32xf32> to vector<1x8x8x32xf32>
    %87 = vector.shape_cast %86 : vector<1x8x8x32xf32> to vector<1x1x64x32xf32>
    %c0_90 = arith.constant 0 : index
    %c2_91 = arith.constant 2 : index
    %c0_92 = arith.constant 0 : index
    %c2_93 = arith.constant 2 : index
    %c0_94 = arith.constant 0 : index
    %88 = vector.load %arg15[%c0_90, %c2_91, %c0_92, %c2_93, %c0_94] : memref<1x4x10x10x32xf32, #tpu.memory_space<vmem>>, vector<1x1x8x8x32xf32>
    %89 = vector.shape_cast %88 : vector<1x1x8x8x32xf32> to vector<1x8x8x32xf32>
    %90 = vector.shape_cast %89 : vector<1x8x8x32xf32> to vector<1x1x64x32xf32>
    %c0_95 = arith.constant 0 : index
    %c1_96 = arith.constant 1 : index
    %c1_97 = arith.constant 1 : index
    %c1_98 = arith.constant 1 : index
    %c0_99 = arith.constant 0 : index
    %91 = vector.load %arg15[%c0_95, %c1_96, %c1_97, %c1_98, %c0_99] : memref<1x4x10x10x32xf32, #tpu.memory_space<vmem>>, vector<1x1x8x8x32xf32>
    %92 = vector.shape_cast %91 : vector<1x1x8x8x32xf32> to vector<1x8x8x32xf32>
    %93 = vector.shape_cast %92 : vector<1x8x8x32xf32> to vector<1x1x64x32xf32>
    %c0_100 = arith.constant 0 : index
    %c0_101 = arith.constant 0 : index
    %c1_102 = arith.constant 1 : index
    %c2_103 = arith.constant 2 : index
    %c0_104 = arith.constant 0 : index
    %94 = vector.load %arg15[%c0_100, %c0_101, %c1_102, %c2_103, %c0_104] : memref<1x4x10x10x32xf32, #tpu.memory_space<vmem>>, vector<1x1x8x8x32xf32>
    %95 = vector.shape_cast %94 : vector<1x1x8x8x32xf32> to vector<1x8x8x32xf32>
    %96 = vector.shape_cast %95 : vector<1x8x8x32xf32> to vector<1x1x64x32xf32>
    %97 = tpu.concatenate %87, %90, %93, %96 in 1 : vector<1x1x64x32xf32>, vector<1x1x64x32xf32>, vector<1x1x64x32xf32>, vector<1x1x64x32xf32> -> vector<1x4x64x32xf32>
    %98 = vector.shape_cast %97 : vector<1x4x64x32xf32> to vector<256x32xf32>
    %99 = arith.truncf %98 : vector<256x32xf32> to vector<256x32xbf16>
    %c2_105 = arith.constant 2 : index
    %c0_106 = arith.constant 0 : index
    %c0_107 = arith.constant 0 : index
    %100 = vector.load %arg4[%c2_105, %c0_106, %c0_107] : memref<9x32x32xbf16, #tpu.memory_space<vmem>>, vector<1x32x32xbf16>
    %101 = vector.shape_cast %100 : vector<1x32x32xbf16> to vector<32x32xbf16>
    %cst_108 = arith.constant dense<0.000000e+00> : vector<256x32xf32>
    %102 = tpu.matmul %99, %101, %cst_108 {dimension_numbers = #tpu.dot_dimension_numbers<[1], [0], [0], [1], [0, 0, 1, 1], [], []>} : vector<256x32xbf16>, vector<32x32xbf16>, vector<256x32xf32> -> vector<256x32xf32>
    %103 = arith.addf %84, %102 : vector<256x32xf32>
    %c0_109 = arith.constant 0 : index
    %c1_110 = arith.constant 1 : index
    %c1_111 = arith.constant 1 : index
    %c0_112 = arith.constant 0 : index
    %c0_113 = arith.constant 0 : index
    %104 = vector.load %arg15[%c0_109, %c1_110, %c1_111, %c0_112, %c0_113] : memref<1x4x10x10x32xf32, #tpu.memory_space<vmem>>, vector<1x1x8x8x32xf32>
    %105 = vector.shape_cast %104 : vector<1x1x8x8x32xf32> to vector<1x8x8x32xf32>
    %106 = vector.shape_cast %105 : vector<1x8x8x32xf32> to vector<1x1x64x32xf32>
    %c0_114 = arith.constant 0 : index
    %c0_115 = arith.constant 0 : index
    %c1_116 = arith.constant 1 : index
    %c1_117 = arith.constant 1 : index
    %c0_118 = arith.constant 0 : index
    %107 = vector.load %arg15[%c0_114, %c0_115, %c1_116, %c1_117, %c0_118] : memref<1x4x10x10x32xf32, #tpu.memory_space<vmem>>, vector<1x1x8x8x32xf32>
    %108 = vector.shape_cast %107 : vector<1x1x8x8x32xf32> to vector<1x8x8x32xf32>
    %109 = vector.shape_cast %108 : vector<1x8x8x32xf32> to vector<1x1x64x32xf32>
    %c0_119 = arith.constant 0 : index
    %c3_120 = arith.constant 3 : index
    %c1_121 = arith.constant 1 : index
    %c0_122 = arith.constant 0 : index
    %c0_123 = arith.constant 0 : index
    %110 = vector.load %arg15[%c0_119, %c3_120, %c1_121, %c0_122, %c0_123] : memref<1x4x10x10x32xf32, #tpu.memory_space<vmem>>, vector<1x1x8x8x32xf32>
    %111 = vector.shape_cast %110 : vector<1x1x8x8x32xf32> to vector<1x8x8x32xf32>
    %112 = vector.shape_cast %111 : vector<1x8x8x32xf32> to vector<1x1x64x32xf32>
    %c0_124 = arith.constant 0 : index
    %c2_125 = arith.constant 2 : index
    %c1_126 = arith.constant 1 : index
    %c1_127 = arith.constant 1 : index
    %c0_128 = arith.constant 0 : index
    %113 = vector.load %arg15[%c0_124, %c2_125, %c1_126, %c1_127, %c0_128] : memref<1x4x10x10x32xf32, #tpu.memory_space<vmem>>, vector<1x1x8x8x32xf32>
    %114 = vector.shape_cast %113 : vector<1x1x8x8x32xf32> to vector<1x8x8x32xf32>
    %115 = vector.shape_cast %114 : vector<1x8x8x32xf32> to vector<1x1x64x32xf32>
    %116 = tpu.concatenate %106, %109, %112, %115 in 1 : vector<1x1x64x32xf32>, vector<1x1x64x32xf32>, vector<1x1x64x32xf32>, vector<1x1x64x32xf32> -> vector<1x4x64x32xf32>
    %117 = vector.shape_cast %116 : vector<1x4x64x32xf32> to vector<256x32xf32>
    %118 = arith.truncf %117 : vector<256x32xf32> to vector<256x32xbf16>
    %c3_129 = arith.constant 3 : index
    %c0_130 = arith.constant 0 : index
    %c0_131 = arith.constant 0 : index
    %119 = vector.load %arg4[%c3_129, %c0_130, %c0_131] : memref<9x32x32xbf16, #tpu.memory_space<vmem>>, vector<1x32x32xbf16>
    %120 = vector.shape_cast %119 : vector<1x32x32xbf16> to vector<32x32xbf16>
    %cst_132 = arith.constant dense<0.000000e+00> : vector<256x32xf32>
    %121 = tpu.matmul %118, %120, %cst_132 {dimension_numbers = #tpu.dot_dimension_numbers<[1], [0], [0], [1], [0, 0, 1, 1], [], []>} : vector<256x32xbf16>, vector<32x32xbf16>, vector<256x32xf32> -> vector<256x32xf32>
    %122 = arith.addf %103, %121 : vector<256x32xf32>
    %c0_133 = arith.constant 0 : index
    %c0_134 = arith.constant 0 : index
    %c1_135 = arith.constant 1 : index
    %c1_136 = arith.constant 1 : index
    %c0_137 = arith.constant 0 : index
    %123 = vector.load %arg15[%c0_133, %c0_134, %c1_135, %c1_136, %c0_137] : memref<1x4x10x10x32xf32, #tpu.memory_space<vmem>>, vector<1x1x8x8x32xf32>
    %124 = vector.shape_cast %123 : vector<1x1x8x8x32xf32> to vector<1x8x8x32xf32>
    %125 = vector.shape_cast %124 : vector<1x8x8x32xf32> to vector<1x1x64x32xf32>
    %c0_138 = arith.constant 0 : index
    %c1_139 = arith.constant 1 : index
    %c1_140 = arith.constant 1 : index
    %c1_141 = arith.constant 1 : index
    %c0_142 = arith.constant 0 : index
    %126 = vector.load %arg15[%c0_138, %c1_139, %c1_140, %c1_141, %c0_142] : memref<1x4x10x10x32xf32, #tpu.memory_space<vmem>>, vector<1x1x8x8x32xf32>
    %127 = vector.shape_cast %126 : vector<1x1x8x8x32xf32> to vector<1x8x8x32xf32>
    %128 = vector.shape_cast %127 : vector<1x8x8x32xf32> to vector<1x1x64x32xf32>
    %c0_143 = arith.constant 0 : index
    %c2_144 = arith.constant 2 : index
    %c1_145 = arith.constant 1 : index
    %c1_146 = arith.constant 1 : index
    %c0_147 = arith.constant 0 : index
    %129 = vector.load %arg15[%c0_143, %c2_144, %c1_145, %c1_146, %c0_147] : memref<1x4x10x10x32xf32, #tpu.memory_space<vmem>>, vector<1x1x8x8x32xf32>
    %130 = vector.shape_cast %129 : vector<1x1x8x8x32xf32> to vector<1x8x8x32xf32>
    %131 = vector.shape_cast %130 : vector<1x8x8x32xf32> to vector<1x1x64x32xf32>
    %c0_148 = arith.constant 0 : index
    %c3_149 = arith.constant 3 : index
    %c1_150 = arith.constant 1 : index
    %c1_151 = arith.constant 1 : index
    %c0_152 = arith.constant 0 : index
    %132 = vector.load %arg15[%c0_148, %c3_149, %c1_150, %c1_151, %c0_152] : memref<1x4x10x10x32xf32, #tpu.memory_space<vmem>>, vector<1x1x8x8x32xf32>
    %133 = vector.shape_cast %132 : vector<1x1x8x8x32xf32> to vector<1x8x8x32xf32>
    %134 = vector.shape_cast %133 : vector<1x8x8x32xf32> to vector<1x1x64x32xf32>
    %135 = tpu.concatenate %125, %128, %131, %134 in 1 : vector<1x1x64x32xf32>, vector<1x1x64x32xf32>, vector<1x1x64x32xf32>, vector<1x1x64x32xf32> -> vector<1x4x64x32xf32>
    %136 = vector.shape_cast %135 : vector<1x4x64x32xf32> to vector<256x32xf32>
    %137 = arith.truncf %136 : vector<256x32xf32> to vector<256x32xbf16>
    %c4 = arith.constant 4 : index
    %c0_153 = arith.constant 0 : index
    %c0_154 = arith.constant 0 : index
    %138 = vector.load %arg4[%c4, %c0_153, %c0_154] : memref<9x32x32xbf16, #tpu.memory_space<vmem>>, vector<1x32x32xbf16>
    %139 = vector.shape_cast %138 : vector<1x32x32xbf16> to vector<32x32xbf16>
    %cst_155 = arith.constant dense<0.000000e+00> : vector<256x32xf32>
    %140 = tpu.matmul %137, %139, %cst_155 {dimension_numbers = #tpu.dot_dimension_numbers<[1], [0], [0], [1], [0, 0, 1, 1], [], []>} : vector<256x32xbf16>, vector<32x32xbf16>, vector<256x32xf32> -> vector<256x32xf32>
    %141 = arith.addf %122, %140 : vector<256x32xf32>
    %c0_156 = arith.constant 0 : index
    %c1_157 = arith.constant 1 : index
    %c1_158 = arith.constant 1 : index
    %c1_159 = arith.constant 1 : index
    %c0_160 = arith.constant 0 : index
    %142 = vector.load %arg15[%c0_156, %c1_157, %c1_158, %c1_159, %c0_160] : memref<1x4x10x10x32xf32, #tpu.memory_space<vmem>>, vector<1x1x8x8x32xf32>
    %143 = vector.shape_cast %142 : vector<1x1x8x8x32xf32> to vector<1x8x8x32xf32>
    %144 = vector.shape_cast %143 : vector<1x8x8x32xf32> to vector<1x1x64x32xf32>
    %c0_161 = arith.constant 0 : index
    %c0_162 = arith.constant 0 : index
    %c1_163 = arith.constant 1 : index
    %c2_164 = arith.constant 2 : index
    %c0_165 = arith.constant 0 : index
    %145 = vector.load %arg15[%c0_161, %c0_162, %c1_163, %c2_164, %c0_165] : memref<1x4x10x10x32xf32, #tpu.memory_space<vmem>>, vector<1x1x8x8x32xf32>
    %146 = vector.shape_cast %145 : vector<1x1x8x8x32xf32> to vector<1x8x8x32xf32>
    %147 = vector.shape_cast %146 : vector<1x8x8x32xf32> to vector<1x1x64x32xf32>
    %c0_166 = arith.constant 0 : index
    %c3_167 = arith.constant 3 : index
    %c1_168 = arith.constant 1 : index
    %c1_169 = arith.constant 1 : index
    %c0_170 = arith.constant 0 : index
    %148 = vector.load %arg15[%c0_166, %c3_167, %c1_168, %c1_169, %c0_170] : memref<1x4x10x10x32xf32, #tpu.memory_space<vmem>>, vector<1x1x8x8x32xf32>
    %149 = vector.shape_cast %148 : vector<1x1x8x8x32xf32> to vector<1x8x8x32xf32>
    %150 = vector.shape_cast %149 : vector<1x8x8x32xf32> to vector<1x1x64x32xf32>
    %c0_171 = arith.constant 0 : index
    %c2_172 = arith.constant 2 : index
    %c1_173 = arith.constant 1 : index
    %c2_174 = arith.constant 2 : index
    %c0_175 = arith.constant 0 : index
    %151 = vector.load %arg15[%c0_171, %c2_172, %c1_173, %c2_174, %c0_175] : memref<1x4x10x10x32xf32, #tpu.memory_space<vmem>>, vector<1x1x8x8x32xf32>
    %152 = vector.shape_cast %151 : vector<1x1x8x8x32xf32> to vector<1x8x8x32xf32>
    %153 = vector.shape_cast %152 : vector<1x8x8x32xf32> to vector<1x1x64x32xf32>
    %154 = tpu.concatenate %144, %147, %150, %153 in 1 : vector<1x1x64x32xf32>, vector<1x1x64x32xf32>, vector<1x1x64x32xf32>, vector<1x1x64x32xf32> -> vector<1x4x64x32xf32>
    %155 = vector.shape_cast %154 : vector<1x4x64x32xf32> to vector<256x32xf32>
    %156 = arith.truncf %155 : vector<256x32xf32> to vector<256x32xbf16>
    %c5 = arith.constant 5 : index
    %c0_176 = arith.constant 0 : index
    %c0_177 = arith.constant 0 : index
    %157 = vector.load %arg4[%c5, %c0_176, %c0_177] : memref<9x32x32xbf16, #tpu.memory_space<vmem>>, vector<1x32x32xbf16>
    %158 = vector.shape_cast %157 : vector<1x32x32xbf16> to vector<32x32xbf16>
    %cst_178 = arith.constant dense<0.000000e+00> : vector<256x32xf32>
    %159 = tpu.matmul %156, %158, %cst_178 {dimension_numbers = #tpu.dot_dimension_numbers<[1], [0], [0], [1], [0, 0, 1, 1], [], []>} : vector<256x32xbf16>, vector<32x32xbf16>, vector<256x32xf32> -> vector<256x32xf32>
    %160 = arith.addf %141, %159 : vector<256x32xf32>
    %c0_179 = arith.constant 0 : index
    %c3_180 = arith.constant 3 : index
    %c1_181 = arith.constant 1 : index
    %c0_182 = arith.constant 0 : index
    %c0_183 = arith.constant 0 : index
    %161 = vector.load %arg15[%c0_179, %c3_180, %c1_181, %c0_182, %c0_183] : memref<1x4x10x10x32xf32, #tpu.memory_space<vmem>>, vector<1x1x8x8x32xf32>
    %162 = vector.shape_cast %161 : vector<1x1x8x8x32xf32> to vector<1x8x8x32xf32>
    %163 = vector.shape_cast %162 : vector<1x8x8x32xf32> to vector<1x1x64x32xf32>
    %c0_184 = arith.constant 0 : index
    %c2_185 = arith.constant 2 : index
    %c1_186 = arith.constant 1 : index
    %c1_187 = arith.constant 1 : index
    %c0_188 = arith.constant 0 : index
    %164 = vector.load %arg15[%c0_184, %c2_185, %c1_186, %c1_187, %c0_188] : memref<1x4x10x10x32xf32, #tpu.memory_space<vmem>>, vector<1x1x8x8x32xf32>
    %165 = vector.shape_cast %164 : vector<1x1x8x8x32xf32> to vector<1x8x8x32xf32>
    %166 = vector.shape_cast %165 : vector<1x8x8x32xf32> to vector<1x1x64x32xf32>
    %c0_189 = arith.constant 0 : index
    %c1_190 = arith.constant 1 : index
    %c2_191 = arith.constant 2 : index
    %c0_192 = arith.constant 0 : index
    %c0_193 = arith.constant 0 : index
    %167 = vector.load %arg15[%c0_189, %c1_190, %c2_191, %c0_192, %c0_193] : memref<1x4x10x10x32xf32, #tpu.memory_space<vmem>>, vector<1x1x8x8x32xf32>
    %168 = vector.shape_cast %167 : vector<1x1x8x8x32xf32> to vector<1x8x8x32xf32>
    %169 = vector.shape_cast %168 : vector<1x8x8x32xf32> to vector<1x1x64x32xf32>
    %c0_194 = arith.constant 0 : index
    %c0_195 = arith.constant 0 : index
    %c2_196 = arith.constant 2 : index
    %c1_197 = arith.constant 1 : index
    %c0_198 = arith.constant 0 : index
    %170 = vector.load %arg15[%c0_194, %c0_195, %c2_196, %c1_197, %c0_198] : memref<1x4x10x10x32xf32, #tpu.memory_space<vmem>>, vector<1x1x8x8x32xf32>
    %171 = vector.shape_cast %170 : vector<1x1x8x8x32xf32> to vector<1x8x8x32xf32>
    %172 = vector.shape_cast %171 : vector<1x8x8x32xf32> to vector<1x1x64x32xf32>
    %173 = tpu.concatenate %163, %166, %169, %172 in 1 : vector<1x1x64x32xf32>, vector<1x1x64x32xf32>, vector<1x1x64x32xf32>, vector<1x1x64x32xf32> -> vector<1x4x64x32xf32>
    %174 = vector.shape_cast %173 : vector<1x4x64x32xf32> to vector<256x32xf32>
    %175 = arith.truncf %174 : vector<256x32xf32> to vector<256x32xbf16>
    %c6 = arith.constant 6 : index
    %c0_199 = arith.constant 0 : index
    %c0_200 = arith.constant 0 : index
    %176 = vector.load %arg4[%c6, %c0_199, %c0_200] : memref<9x32x32xbf16, #tpu.memory_space<vmem>>, vector<1x32x32xbf16>
    %177 = vector.shape_cast %176 : vector<1x32x32xbf16> to vector<32x32xbf16>
    %cst_201 = arith.constant dense<0.000000e+00> : vector<256x32xf32>
    %178 = tpu.matmul %175, %177, %cst_201 {dimension_numbers = #tpu.dot_dimension_numbers<[1], [0], [0], [1], [0, 0, 1, 1], [], []>} : vector<256x32xbf16>, vector<32x32xbf16>, vector<256x32xf32> -> vector<256x32xf32>
    %179 = arith.addf %160, %178 : vector<256x32xf32>
    %c0_202 = arith.constant 0 : index
    %c2_203 = arith.constant 2 : index
    %c1_204 = arith.constant 1 : index
    %c1_205 = arith.constant 1 : index
    %c0_206 = arith.constant 0 : index
    %180 = vector.load %arg15[%c0_202, %c2_203, %c1_204, %c1_205, %c0_206] : memref<1x4x10x10x32xf32, #tpu.memory_space<vmem>>, vector<1x1x8x8x32xf32>
    %181 = vector.shape_cast %180 : vector<1x1x8x8x32xf32> to vector<1x8x8x32xf32>
    %182 = vector.shape_cast %181 : vector<1x8x8x32xf32> to vector<1x1x64x32xf32>
    %c0_207 = arith.constant 0 : index
    %c3_208 = arith.constant 3 : index
    %c1_209 = arith.constant 1 : index
    %c1_210 = arith.constant 1 : index
    %c0_211 = arith.constant 0 : index
    %183 = vector.load %arg15[%c0_207, %c3_208, %c1_209, %c1_210, %c0_211] : memref<1x4x10x10x32xf32, #tpu.memory_space<vmem>>, vector<1x1x8x8x32xf32>
    %184 = vector.shape_cast %183 : vector<1x1x8x8x32xf32> to vector<1x8x8x32xf32>
    %185 = vector.shape_cast %184 : vector<1x8x8x32xf32> to vector<1x1x64x32xf32>
    %c0_212 = arith.constant 0 : index
    %c0_213 = arith.constant 0 : index
    %c2_214 = arith.constant 2 : index
    %c1_215 = arith.constant 1 : index
    %c0_216 = arith.constant 0 : index
    %186 = vector.load %arg15[%c0_212, %c0_213, %c2_214, %c1_215, %c0_216] : memref<1x4x10x10x32xf32, #tpu.memory_space<vmem>>, vector<1x1x8x8x32xf32>
    %187 = vector.shape_cast %186 : vector<1x1x8x8x32xf32> to vector<1x8x8x32xf32>
    %188 = vector.shape_cast %187 : vector<1x8x8x32xf32> to vector<1x1x64x32xf32>
    %c0_217 = arith.constant 0 : index
    %c1_218 = arith.constant 1 : index
    %c2_219 = arith.constant 2 : index
    %c1_220 = arith.constant 1 : index
    %c0_221 = arith.constant 0 : index
    %189 = vector.load %arg15[%c0_217, %c1_218, %c2_219, %c1_220, %c0_221] : memref<1x4x10x10x32xf32, #tpu.memory_space<vmem>>, vector<1x1x8x8x32xf32>
    %190 = vector.shape_cast %189 : vector<1x1x8x8x32xf32> to vector<1x8x8x32xf32>
    %191 = vector.shape_cast %190 : vector<1x8x8x32xf32> to vector<1x1x64x32xf32>
    %192 = tpu.concatenate %182, %185, %188, %191 in 1 : vector<1x1x64x32xf32>, vector<1x1x64x32xf32>, vector<1x1x64x32xf32>, vector<1x1x64x32xf32> -> vector<1x4x64x32xf32>
    %193 = vector.shape_cast %192 : vector<1x4x64x32xf32> to vector<256x32xf32>
    %194 = arith.truncf %193 : vector<256x32xf32> to vector<256x32xbf16>
    %c7 = arith.constant 7 : index
    %c0_222 = arith.constant 0 : index
    %c0_223 = arith.constant 0 : index
    %195 = vector.load %arg4[%c7, %c0_222, %c0_223] : memref<9x32x32xbf16, #tpu.memory_space<vmem>>, vector<1x32x32xbf16>
    %196 = vector.shape_cast %195 : vector<1x32x32xbf16> to vector<32x32xbf16>
    %cst_224 = arith.constant dense<0.000000e+00> : vector<256x32xf32>
    %197 = tpu.matmul %194, %196, %cst_224 {dimension_numbers = #tpu.dot_dimension_numbers<[1], [0], [0], [1], [0, 0, 1, 1], [], []>} : vector<256x32xbf16>, vector<32x32xbf16>, vector<256x32xf32> -> vector<256x32xf32>
    %198 = arith.addf %179, %197 : vector<256x32xf32>
    %c0_225 = arith.constant 0 : index
    %c3_226 = arith.constant 3 : index
    %c1_227 = arith.constant 1 : index
    %c1_228 = arith.constant 1 : index
    %c0_229 = arith.constant 0 : index
    %199 = vector.load %arg15[%c0_225, %c3_226, %c1_227, %c1_228, %c0_229] : memref<1x4x10x10x32xf32, #tpu.memory_space<vmem>>, vector<1x1x8x8x32xf32>
    %200 = vector.shape_cast %199 : vector<1x1x8x8x32xf32> to vector<1x8x8x32xf32>
    %201 = vector.shape_cast %200 : vector<1x8x8x32xf32> to vector<1x1x64x32xf32>
    %c0_230 = arith.constant 0 : index
    %c2_231 = arith.constant 2 : index
    %c1_232 = arith.constant 1 : index
    %c2_233 = arith.constant 2 : index
    %c0_234 = arith.constant 0 : index
    %202 = vector.load %arg15[%c0_230, %c2_231, %c1_232, %c2_233, %c0_234] : memref<1x4x10x10x32xf32, #tpu.memory_space<vmem>>, vector<1x1x8x8x32xf32>
    %203 = vector.shape_cast %202 : vector<1x1x8x8x32xf32> to vector<1x8x8x32xf32>
    %204 = vector.shape_cast %203 : vector<1x8x8x32xf32> to vector<1x1x64x32xf32>
    %c0_235 = arith.constant 0 : index
    %c1_236 = arith.constant 1 : index
    %c2_237 = arith.constant 2 : index
    %c1_238 = arith.constant 1 : index
    %c0_239 = arith.constant 0 : index
    %205 = vector.load %arg15[%c0_235, %c1_236, %c2_237, %c1_238, %c0_239] : memref<1x4x10x10x32xf32, #tpu.memory_space<vmem>>, vector<1x1x8x8x32xf32>
    %206 = vector.shape_cast %205 : vector<1x1x8x8x32xf32> to vector<1x8x8x32xf32>
    %207 = vector.shape_cast %206 : vector<1x8x8x32xf32> to vector<1x1x64x32xf32>
    %c0_240 = arith.constant 0 : index
    %c0_241 = arith.constant 0 : index
    %c2_242 = arith.constant 2 : index
    %c2_243 = arith.constant 2 : index
    %c0_244 = arith.constant 0 : index
    %208 = vector.load %arg15[%c0_240, %c0_241, %c2_242, %c2_243, %c0_244] : memref<1x4x10x10x32xf32, #tpu.memory_space<vmem>>, vector<1x1x8x8x32xf32>
    %209 = vector.shape_cast %208 : vector<1x1x8x8x32xf32> to vector<1x8x8x32xf32>
    %210 = vector.shape_cast %209 : vector<1x8x8x32xf32> to vector<1x1x64x32xf32>
    %211 = tpu.concatenate %201, %204, %207, %210 in 1 : vector<1x1x64x32xf32>, vector<1x1x64x32xf32>, vector<1x1x64x32xf32>, vector<1x1x64x32xf32> -> vector<1x4x64x32xf32>
    %212 = vector.shape_cast %211 : vector<1x4x64x32xf32> to vector<256x32xf32>
    %213 = arith.truncf %212 : vector<256x32xf32> to vector<256x32xbf16>
    %c8 = arith.constant 8 : index
    %c0_245 = arith.constant 0 : index
    %c0_246 = arith.constant 0 : index
    %214 = vector.load %arg4[%c8, %c0_245, %c0_246] : memref<9x32x32xbf16, #tpu.memory_space<vmem>>, vector<1x32x32xbf16>
    %215 = vector.shape_cast %214 : vector<1x32x32xbf16> to vector<32x32xbf16>
    %cst_247 = arith.constant dense<0.000000e+00> : vector<256x32xf32>
    %216 = tpu.matmul %213, %215, %cst_247 {dimension_numbers = #tpu.dot_dimension_numbers<[1], [0], [0], [1], [0, 0, 1, 1], [], []>} : vector<256x32xbf16>, vector<32x32xbf16>, vector<256x32xf32> -> vector<256x32xf32>
    %217 = arith.addf %198, %216 : vector<256x32xf32>
    %218 = vector.shape_cast %217 : vector<256x32xf32> to vector<1x4x64x32xf32>
    %219 = vector.extract_strided_slice %218 {offsets = [0, 0, 0, 0], sizes = [1, 1, 64, 32], strides = [1, 1, 1, 1]} : vector<1x4x64x32xf32> to vector<1x1x64x32xf32>
    %220 = vector.shape_cast %219 : vector<1x1x64x32xf32> to vector<1x64x32xf32>
    %221 = vector.extract_strided_slice %218 {offsets = [0, 1, 0, 0], sizes = [1, 1, 64, 32], strides = [1, 1, 1, 1]} : vector<1x4x64x32xf32> to vector<1x1x64x32xf32>
    %222 = vector.shape_cast %221 : vector<1x1x64x32xf32> to vector<1x64x32xf32>
    %223 = arith.maximumf %220, %222 : vector<1x64x32xf32>
    %224 = vector.extract_strided_slice %218 {offsets = [0, 2, 0, 0], sizes = [1, 1, 64, 32], strides = [1, 1, 1, 1]} : vector<1x4x64x32xf32> to vector<1x1x64x32xf32>
    %225 = vector.shape_cast %224 : vector<1x1x64x32xf32> to vector<1x64x32xf32>
    %226 = vector.extract_strided_slice %218 {offsets = [0, 3, 0, 0], sizes = [1, 1, 64, 32], strides = [1, 1, 1, 1]} : vector<1x4x64x32xf32> to vector<1x1x64x32xf32>
    %227 = vector.shape_cast %226 : vector<1x1x64x32xf32> to vector<1x64x32xf32>
    %228 = arith.maximumf %225, %227 : vector<1x64x32xf32>
    %229 = arith.maximumf %223, %228 : vector<1x64x32xf32>
    %c0_248 = arith.constant 0 : index
    %c0_249 = arith.constant 0 : index
    %230 = vector.load %arg5[%c0_248, %c0_249] : memref<1x32xf32, #tpu.memory_space<vmem>>, vector<1x32xf32>
    %231 = vector.shape_cast %230 : vector<1x32xf32> to vector<1x1x32xf32>
    %232 = vector.broadcast %231 : vector<1x1x32xf32> to vector<1x64x32xf32>
    %233 = arith.addf %229, %232 : vector<1x64x32xf32>
    %cst_250 = arith.constant 0.000000e+00 : f32
    %234 = vector.broadcast %cst_250 : f32 to vector<1x64x32xf32>
    %235 = arith.maximumf %233, %234 : vector<1x64x32xf32>
    %236 = vector.shape_cast %235 : vector<1x64x32xf32> to vector<1x8x8x32xf32>
    %c0_251 = arith.constant 0 : index
    %c1_252 = arith.constant 1 : index
    %c1_253 = arith.constant 1 : index
    %c0_254 = arith.constant 0 : index
    %237 = vector.load %arg16[%c0_251, %c1_252, %c1_253, %c0_254] : memref<1x10x10x32xf32, #tpu.memory_space<vmem>>, vector<1x8x8x32xf32>
    tpu.vector_store %arg16[%c0_251, %c1_252, %c1_253, %c0_254], %236 {strides = array<i32>} : memref<1x10x10x32xf32, #tpu.memory_space<vmem>>, vector<1x8x8x32xf32>,
    %cst_255 = arith.constant 0.000000e+00 : f32
    %238 = vector.broadcast %cst_255 : f32 to vector<64x32xf32>
    %c0_256 = arith.constant 0 : index
    %c0_257 = arith.constant 0 : index
    %c0_258 = arith.constant 0 : index
    %c0_259 = arith.constant 0 : index
    %239 = vector.load %arg16[%c0_256, %c0_257, %c0_258, %c0_259] : memref<1x10x10x32xf32, #tpu.memory_space<vmem>>, vector<1x8x8x32xf32>
    %240 = vector.shape_cast %239 : vector<1x8x8x32xf32> to vector<64x32xf32>
    %c0_260 = arith.constant 0 : index
    %c0_261 = arith.constant 0 : index
    %c0_262 = arith.constant 0 : index
    %241 = vector.load %arg6[%c0_260, %c0_261, %c0_262] : memref<9x1x32xf32, #tpu.memory_space<vmem>>, vector<1x1x32xf32>
    %242 = vector.shape_cast %241 : vector<1x1x32xf32> to vector<1x32xf32>
    %243 = vector.broadcast %242 : vector<1x32xf32> to vector<64x32xf32>
    %244 = arith.mulf %240, %243 : vector<64x32xf32>
    %245 = arith.addf %238, %244 : vector<64x32xf32>
    %c0_263 = arith.constant 0 : index
    %c0_264 = arith.constant 0 : index
    %c1_265 = arith.constant 1 : index
    %c0_266 = arith.constant 0 : index
    %246 = vector.load %arg16[%c0_263, %c0_264, %c1_265, %c0_266] : memref<1x10x10x32xf32, #tpu.memory_space<vmem>>, vector<1x8x8x32xf32>
    %247 = vector.shape_cast %246 : vector<1x8x8x32xf32> to vector<64x32xf32>
    %c1_267 = arith.constant 1 : index
    %c0_268 = arith.constant 0 : index
    %c0_269 = arith.constant 0 : index
    %248 = vector.load %arg6[%c1_267, %c0_268, %c0_269] : memref<9x1x32xf32, #tpu.memory_space<vmem>>, vector<1x1x32xf32>
    %249 = vector.shape_cast %248 : vector<1x1x32xf32> to vector<1x32xf32>
    %250 = vector.broadcast %249 : vector<1x32xf32> to vector<64x32xf32>
    %251 = arith.mulf %247, %250 : vector<64x32xf32>
    %252 = arith.addf %245, %251 : vector<64x32xf32>
    %c0_270 = arith.constant 0 : index
    %c0_271 = arith.constant 0 : index
    %c2_272 = arith.constant 2 : index
    %c0_273 = arith.constant 0 : index
    %253 = vector.load %arg16[%c0_270, %c0_271, %c2_272, %c0_273] : memref<1x10x10x32xf32, #tpu.memory_space<vmem>>, vector<1x8x8x32xf32>
    %254 = vector.shape_cast %253 : vector<1x8x8x32xf32> to vector<64x32xf32>
    %c2_274 = arith.constant 2 : index
    %c0_275 = arith.constant 0 : index
    %c0_276 = arith.constant 0 : index
    %255 = vector.load %arg6[%c2_274, %c0_275, %c0_276] : memref<9x1x32xf32, #tpu.memory_space<vmem>>, vector<1x1x32xf32>
    %256 = vector.shape_cast %255 : vector<1x1x32xf32> to vector<1x32xf32>
    %257 = vector.broadcast %256 : vector<1x32xf32> to vector<64x32xf32>
    %258 = arith.mulf %254, %257 : vector<64x32xf32>
    %259 = arith.addf %252, %258 : vector<64x32xf32>
    %c0_277 = arith.constant 0 : index
    %c1_278 = arith.constant 1 : index
    %c0_279 = arith.constant 0 : index
    %c0_280 = arith.constant 0 : index
    %260 = vector.load %arg16[%c0_277, %c1_278, %c0_279, %c0_280] : memref<1x10x10x32xf32, #tpu.memory_space<vmem>>, vector<1x8x8x32xf32>
    %261 = vector.shape_cast %260 : vector<1x8x8x32xf32> to vector<64x32xf32>
    %c3_281 = arith.constant 3 : index
    %c0_282 = arith.constant 0 : index
    %c0_283 = arith.constant 0 : index
    %262 = vector.load %arg6[%c3_281, %c0_282, %c0_283] : memref<9x1x32xf32, #tpu.memory_space<vmem>>, vector<1x1x32xf32>
    %263 = vector.shape_cast %262 : vector<1x1x32xf32> to vector<1x32xf32>
    %264 = vector.broadcast %263 : vector<1x32xf32> to vector<64x32xf32>
    %265 = arith.mulf %261, %264 : vector<64x32xf32>
    %266 = arith.addf %259, %265 : vector<64x32xf32>
    %c0_284 = arith.constant 0 : index
    %c1_285 = arith.constant 1 : index
    %c1_286 = arith.constant 1 : index
    %c0_287 = arith.constant 0 : index
    %267 = vector.load %arg16[%c0_284, %c1_285, %c1_286, %c0_287] : memref<1x10x10x32xf32, #tpu.memory_space<vmem>>, vector<1x8x8x32xf32>
    %268 = vector.shape_cast %267 : vector<1x8x8x32xf32> to vector<64x32xf32>
    %c4_288 = arith.constant 4 : index
    %c0_289 = arith.constant 0 : index
    %c0_290 = arith.constant 0 : index
    %269 = vector.load %arg6[%c4_288, %c0_289, %c0_290] : memref<9x1x32xf32, #tpu.memory_space<vmem>>, vector<1x1x32xf32>
    %270 = vector.shape_cast %269 : vector<1x1x32xf32> to vector<1x32xf32>
    %271 = vector.broadcast %270 : vector<1x32xf32> to vector<64x32xf32>
    %272 = arith.mulf %268, %271 : vector<64x32xf32>
    %273 = arith.addf %266, %272 : vector<64x32xf32>
    %c0_291 = arith.constant 0 : index
    %c1_292 = arith.constant 1 : index
    %c2_293 = arith.constant 2 : index
    %c0_294 = arith.constant 0 : index
    %274 = vector.load %arg16[%c0_291, %c1_292, %c2_293, %c0_294] : memref<1x10x10x32xf32, #tpu.memory_space<vmem>>, vector<1x8x8x32xf32>
    %275 = vector.shape_cast %274 : vector<1x8x8x32xf32> to vector<64x32xf32>
    %c5_295 = arith.constant 5 : index
    %c0_296 = arith.constant 0 : index
    %c0_297 = arith.constant 0 : index
    %276 = vector.load %arg6[%c5_295, %c0_296, %c0_297] : memref<9x1x32xf32, #tpu.memory_space<vmem>>, vector<1x1x32xf32>
    %277 = vector.shape_cast %276 : vector<1x1x32xf32> to vector<1x32xf32>
    %278 = vector.broadcast %277 : vector<1x32xf32> to vector<64x32xf32>
    %279 = arith.mulf %275, %278 : vector<64x32xf32>
    %280 = arith.addf %273, %279 : vector<64x32xf32>
    %c0_298 = arith.constant 0 : index
    %c2_299 = arith.constant 2 : index
    %c0_300 = arith.constant 0 : index
    %c0_301 = arith.constant 0 : index
    %281 = vector.load %arg16[%c0_298, %c2_299, %c0_300, %c0_301] : memref<1x10x10x32xf32, #tpu.memory_space<vmem>>, vector<1x8x8x32xf32>
    %282 = vector.shape_cast %281 : vector<1x8x8x32xf32> to vector<64x32xf32>
    %c6_302 = arith.constant 6 : index
    %c0_303 = arith.constant 0 : index
    %c0_304 = arith.constant 0 : index
    %283 = vector.load %arg6[%c6_302, %c0_303, %c0_304] : memref<9x1x32xf32, #tpu.memory_space<vmem>>, vector<1x1x32xf32>
    %284 = vector.shape_cast %283 : vector<1x1x32xf32> to vector<1x32xf32>
    %285 = vector.broadcast %284 : vector<1x32xf32> to vector<64x32xf32>
    %286 = arith.mulf %282, %285 : vector<64x32xf32>
    %287 = arith.addf %280, %286 : vector<64x32xf32>
    %c0_305 = arith.constant 0 : index
    %c2_306 = arith.constant 2 : index
    %c1_307 = arith.constant 1 : index
    %c0_308 = arith.constant 0 : index
    %288 = vector.load %arg16[%c0_305, %c2_306, %c1_307, %c0_308] : memref<1x10x10x32xf32, #tpu.memory_space<vmem>>, vector<1x8x8x32xf32>
    %289 = vector.shape_cast %288 : vector<1x8x8x32xf32> to vector<64x32xf32>
    %c7_309 = arith.constant 7 : index
    %c0_310 = arith.constant 0 : index
    %c0_311 = arith.constant 0 : index
    %290 = vector.load %arg6[%c7_309, %c0_310, %c0_311] : memref<9x1x32xf32, #tpu.memory_space<vmem>>, vector<1x1x32xf32>
    %291 = vector.shape_cast %290 : vector<1x1x32xf32> to vector<1x32xf32>
    %292 = vector.broadcast %291 : vector<1x32xf32> to vector<64x32xf32>
    %293 = arith.mulf %289, %292 : vector<64x32xf32>
    %294 = arith.addf %287, %293 : vector<64x32xf32>
    %c0_312 = arith.constant 0 : index
    %c2_313 = arith.constant 2 : index
    %c2_314 = arith.constant 2 : index
    %c0_315 = arith.constant 0 : index
    %295 = vector.load %arg16[%c0_312, %c2_313, %c2_314, %c0_315] : memref<1x10x10x32xf32, #tpu.memory_space<vmem>>, vector<1x8x8x32xf32>
    %296 = vector.shape_cast %295 : vector<1x8x8x32xf32> to vector<64x32xf32>
    %c8_316 = arith.constant 8 : index
    %c0_317 = arith.constant 0 : index
    %c0_318 = arith.constant 0 : index
    %297 = vector.load %arg6[%c8_316, %c0_317, %c0_318] : memref<9x1x32xf32, #tpu.memory_space<vmem>>, vector<1x1x32xf32>
    %298 = vector.shape_cast %297 : vector<1x1x32xf32> to vector<1x32xf32>
    %299 = vector.broadcast %298 : vector<1x32xf32> to vector<64x32xf32>
    %300 = arith.mulf %296, %299 : vector<64x32xf32>
    %301 = arith.addf %294, %300 : vector<64x32xf32>
    %cst_319 = arith.constant dense<0.000000e+00> : vector<64xf32>
    %302 = vector.multi_reduction <add>, %301, %cst_319 [1] : vector<64x32xf32> to vector<64xf32>
    %303 = vector.shape_cast %302 : vector<64xf32> to vector<64x1xf32>
    %c0_320 = arith.constant 0 : index
    %c0_321 = arith.constant 0 : index
    %304 = vector.load %arg7[%c0_320, %c0_321] : memref<1x1xf32, #tpu.memory_space<vmem>>, vector<1x1xf32>
    %305 = vector.broadcast %304 : vector<1x1xf32> to vector<64x1xf32>
    %306 = arith.addf %303, %305 : vector<64x1xf32>
    %cst_322 = arith.constant 0.000000e+00 : f32
    %307 = vector.broadcast %cst_322 : f32 to vector<64x1xf32>
    %308 = arith.maximumf %306, %307 : vector<64x1xf32>
    %309 = tpu.iota {dimensions = array<i32: 0>} : vector<1x1xi32>
    %cst_323 = arith.constant 0.000000e+00 : f32
    %310 = vector.broadcast %cst_323 : f32 to vector<1x1024xf32>
    %c0_324 = arith.constant 0 : index
    %c0_325 = arith.constant 0 : index
    %311 = vector.load %arg8[%c0_324, %c0_325] : memref<64x1024xf32, #tpu.memory_space<vmem>>, vector<64x1024xf32>
    %312 = vector.broadcast %308 : vector<64x1xf32> to vector<64x1024xf32>
    %313 = arith.mulf %312, %311 : vector<64x1024xf32>
    %cst_326 = arith.constant dense<0.000000e+00> : vector<1024xf32>
    %314 = vector.multi_reduction <add>, %313, %cst_326 [0] : vector<64x1024xf32> to vector<1024xf32>
    %315 = vector.shape_cast %314 : vector<1024xf32> to vector<1x1024xf32>
    %c0_i32 = arith.constant 0 : i32
    %316 = vector.broadcast %c0_i32 : i32 to vector<1x1xi32>
    %317 = arith.cmpi eq, %309, %316 : vector<1x1xi32>
    %cst_327 = arith.constant 0.000000e+00 : f32
    %318 = vector.shape_cast %317 : vector<1x1xi1> to vector<1x1xi1>
    %319 = vector.broadcast %318 : vector<1x1xi1> to vector<1x1024xi1>
    %320 = vector.broadcast %cst_327 : f32 to vector<1x1024xf32>
    %321 = arith.select %319, %315, %320 : vector<1x1024xi1>, vector<1x1024xf32>
    %322 = arith.addf %310, %321 : vector<1x1024xf32>
    %c0_328 = arith.constant 0 : index
    %c0_329 = arith.constant 0 : index
    %323 = vector.load %arg9[%c0_328, %c0_329] : memref<1x1024xf32, #tpu.memory_space<vmem>>, vector<1x1024xf32>
    %324 = arith.addf %322, %323 : vector<1x1024xf32>
    %cst_330 = arith.constant 0.000000e+00 : f32
    %325 = vector.broadcast %cst_330 : f32 to vector<1x1024xf32>
    %326 = arith.maximumf %324, %325 : vector<1x1024xf32>
    %327 = arith.truncf %326 : vector<1x1024xf32> to vector<1x1024xbf16>
    %c0_331 = arith.constant 0 : index
    %c0_332 = arith.constant 0 : index
    %328 = vector.load %arg10[%c0_331, %c0_332] : memref<1024x256xbf16, #tpu.memory_space<vmem>>, vector<1024x256xbf16>
    %cst_333 = arith.constant dense<0.000000e+00> : vector<1x256xf32>
    %329 = tpu.matmul %327, %328, %cst_333 {dimension_numbers = #tpu.dot_dimension_numbers<[1], [0], [0], [1], [0, 0, 1, 1], [], []>} : vector<1x1024xbf16>, vector<1024x256xbf16>, vector<1x256xf32> -> vector<1x256xf32>
    %c0_334 = arith.constant 0 : index
    %c0_335 = arith.constant 0 : index
    %330 = vector.load %arg11[%c0_334, %c0_335] : memref<1x256xf32, #tpu.memory_space<vmem>>, vector<1x256xf32>
    %331 = arith.addf %329, %330 : vector<1x256xf32>
    %cst_336 = arith.constant 0.000000e+00 : f32
    %332 = vector.broadcast %cst_336 : f32 to vector<1x256xf32>
    %333 = arith.maximumf %331, %332 : vector<1x256xf32>
    %334 = arith.truncf %333 : vector<1x256xf32> to vector<1x256xbf16>
    %c0_337 = arith.constant 0 : index
    %c0_338 = arith.constant 0 : index
    %335 = vector.load %arg12[%c0_337, %c0_338] : memref<256x1xbf16, #tpu.memory_space<vmem>>, vector<256x1xbf16>
    %cst_339 = arith.constant dense<0.000000e+00> : vector<1x1xf32>
    %336 = tpu.matmul %334, %335, %cst_339 {dimension_numbers = #tpu.dot_dimension_numbers<[1], [0], [0], [1], [0, 0, 1, 1], [], []>} : vector<1x256xbf16>, vector<256x1xbf16>, vector<1x1xf32> -> vector<1x1xf32>
    %c0_340 = arith.constant 0 : index
    %c0_341 = arith.constant 0 : index
    %337 = vector.load %arg13[%c0_340, %c0_341] : memref<1x1xf32, #tpu.memory_space<vmem>>, vector<1x1xf32>
    %338 = arith.addf %336, %337 : vector<1x1xf32>
    %cst_342 = arith.constant 0.000000e+00 : f32
    %339 = vector.broadcast %cst_342 : f32 to vector<1x1xf32>
    %340 = arith.subf %339, %338 : vector<1x1xf32>
    %341 = math.exp %340 : vector<1x1xf32>
    %cst_343 = arith.constant 1.000000e+00 : f32
    %342 = vector.broadcast %cst_343 : f32 to vector<1x1xf32>
    %343 = arith.addf %342, %341 : vector<1x1xf32>
    %cst_344 = arith.constant 1.000000e+00 : f32
    %344 = vector.broadcast %cst_344 : f32 to vector<1x1xf32>
    %345 = arith.divf %344, %343 : vector<1x1xf32>
    %c0_345 = arith.constant 0 : index
    %c0_346 = arith.constant 0 : index
    %c0_347 = arith.constant 0 : index
    %346 = vector.load %arg14[%c0_345, %c0_346, %c0_347] : memref<1x1x1xf32, #tpu.memory_space<vmem>>, vector<1x1x1xf32>
    %347 = vector.shape_cast %346 : vector<1x1x1xf32> to vector<1x1xf32>
    %348 = vector.shape_cast %345 : vector<1x1xf32> to vector<1x1x1xf32>
    tpu.vector_store %arg14[%c0_345, %c0_346, %c0_347], %348 {strides = array<i32>} : memref<1x1x1xf32, #tpu.memory_space<vmem>>, vector<1x1x1xf32>,
    return
  }
  func.func @transform_0(%arg0: i32) -> (i32, i32, i32, i32) {
    %c0_i32 = arith.constant 0 : i32
    %c0_i32_0 = arith.constant 0 : i32
    %c0_i32_1 = arith.constant 0 : i32
    %c0_i32_2 = arith.constant 0 : i32
    return %arg0, %c0_i32, %c0_i32_0, %c0_i32_1 : i32, i32, i32, i32
  }
  func.func @transform_1(%arg0: i32) -> (i32, i32) {
    %c0_i32 = arith.constant 0 : i32
    %c0_i32_0 = arith.constant 0 : i32
    %c0_i32_1 = arith.constant 0 : i32
    return %c0_i32, %c0_i32_0 : i32, i32
  }
  func.func @transform_2(%arg0: i32) -> (i32, i32) {
    %c0_i32 = arith.constant 0 : i32
    %c0_i32_0 = arith.constant 0 : i32
    %c0_i32_1 = arith.constant 0 : i32
    return %c0_i32, %c0_i32_0 : i32, i32
  }
  func.func @transform_3(%arg0: i32) -> (i32, i32, i32) {
    %c0_i32 = arith.constant 0 : i32
    %c0_i32_0 = arith.constant 0 : i32
    %c0_i32_1 = arith.constant 0 : i32
    %c0_i32_2 = arith.constant 0 : i32
    return %c0_i32, %c0_i32_0, %c0_i32_1 : i32, i32, i32
  }
  func.func @transform_4(%arg0: i32) -> (i32, i32) {
    %c0_i32 = arith.constant 0 : i32
    %c0_i32_0 = arith.constant 0 : i32
    %c0_i32_1 = arith.constant 0 : i32
    return %c0_i32, %c0_i32_0 : i32, i32
  }
  func.func @transform_5(%arg0: i32) -> (i32, i32, i32) {
    %c0_i32 = arith.constant 0 : i32
    %c0_i32_0 = arith.constant 0 : i32
    %c0_i32_1 = arith.constant 0 : i32
    %c0_i32_2 = arith.constant 0 : i32
    return %c0_i32, %c0_i32_0, %c0_i32_1 : i32, i32, i32
  }
  func.func @transform_6(%arg0: i32) -> (i32, i32) {
    %c0_i32 = arith.constant 0 : i32
    %c0_i32_0 = arith.constant 0 : i32
    %c0_i32_1 = arith.constant 0 : i32
    return %c0_i32, %c0_i32_0 : i32, i32
  }
  func.func @transform_7(%arg0: i32) -> (i32, i32) {
    %c0_i32 = arith.constant 0 : i32
    %c0_i32_0 = arith.constant 0 : i32
    %c0_i32_1 = arith.constant 0 : i32
    return %c0_i32, %c0_i32_0 : i32, i32
  }
  func.func @transform_8(%arg0: i32) -> (i32, i32) {
    %c0_i32 = arith.constant 0 : i32
    %c0_i32_0 = arith.constant 0 : i32
    %c0_i32_1 = arith.constant 0 : i32
    return %c0_i32, %c0_i32_0 : i32, i32
  }
  func.func @transform_9(%arg0: i32) -> (i32, i32) {
    %c0_i32 = arith.constant 0 : i32
    %c0_i32_0 = arith.constant 0 : i32
    %c0_i32_1 = arith.constant 0 : i32
    return %c0_i32, %c0_i32_0 : i32, i32
  }
  func.func @transform_10(%arg0: i32) -> (i32, i32) {
    %c0_i32 = arith.constant 0 : i32
    %c0_i32_0 = arith.constant 0 : i32
    %c0_i32_1 = arith.constant 0 : i32
    return %c0_i32, %c0_i32_0 : i32, i32
  }
  func.func @transform_11(%arg0: i32) -> (i32, i32) {
    %c0_i32 = arith.constant 0 : i32
    %c0_i32_0 = arith.constant 0 : i32
    %c0_i32_1 = arith.constant 0 : i32
    return %c0_i32, %c0_i32_0 : i32, i32
  }
  func.func @transform_12(%arg0: i32) -> (i32, i32) {
    %c0_i32 = arith.constant 0 : i32
    %c0_i32_0 = arith.constant 0 : i32
    %c0_i32_1 = arith.constant 0 : i32
    return %c0_i32, %c0_i32_0 : i32, i32
  }
  func.func @transform_13(%arg0: i32) -> (i32, i32, i32) {
    %c0_i32 = arith.constant 0 : i32
    %c0_i32_0 = arith.constant 0 : i32
    %c0_i32_1 = arith.constant 0 : i32
    return %arg0, %c0_i32, %c0_i32_0 : i32, i32, i32
  }
}

</mosaic_0001>

<bundles_post_ra>
// kernel: discriminator_forward.1
= control target key start
LH: loop header
LB: loop body
LE: loop exit
PB: predicated region body
PF: predicated region fallthrough
CT: control target
= control target key end

     0   :  { %s7958_s29 = smov 0   ;;  %s10333_s0 = inlined_call_operand.vmem [shape: bf16[2,4,256,27], index: 0, kind: input, shape index: {}]   ;;  %s10334_s1 = inlined_call_operand.vmem [shape: bf16[27,32], index: 1, kind: input, shape index: {}]   ;;  %s10335_s2 = inlined_call_operand.vmem [shape: f32[1,32], index: 2, kind: input, shape index: {}]   ;;  %s10336_s3 = inlined_call_operand.vmem [shape: bf16[9,32,32], index: 3, kind: input, shape index: {}]   ;;  %s10337_s4 = inlined_call_operand.vmem [shape: f32[1,32], index: 4, kind: input, shape index: {}]   ;;  %s10338_s5 = inlined_call_operand.vmem [shape: f32[9,1,32], index: 5, kind: input, shape index: {}]   ;;  %s10339_s6 = inlined_call_operand.<no memory space> [shape: f32[1,1], index: 6, kind: input, shape index: {}]   ;;  %s10340_s7 = inlined_call_operand.vmem [shape: f32[64,1024], index: 7, kind: input, shape index: {}]   ;;  %s10341_s8 = inlined_call_operand.vmem [shape: f32[1,1024], index: 8, kind: input, shape index: {}]   ;;  %s10342_s9 = inlined_call_operand.vmem [shape: bf16[1024,256], index: 9, kind: input, shape index: {}]   ;;  %s10343_s10 = inlined_call_operand.vmem [shape: f32[1,256], index: 10, kind: input, shape index: {}]   ;;  %s10344_s11 = inlined_call_operand.vmem [shape: bf16[256,1], index: 11, kind: input, shape index: {}]   ;;  %s10345_s13 = inlined_call_operand.vmem [shape: f32[2,1,1], index: 13, kind: output, shape index: {}]   ;;  %s10346_s12 = inlined_call_operand.<no memory space> [shape: f32[1,1], index: 12, kind: input, shape index: {}]  }
   0x1   :  { %v18_v0 = vstv %s10339_s6  ;;  %v20_v1 = vstv %s10346_s12 }
   0x2   :  { %19 = vst [vmem:[#allocation4] sm:$0x1] %v18_v0  ;;  %21 = vst [vmem:[#allocation5] sm:$0x1] %v20_v1 }
   0x3 LB: > { %s6090_s30 = sadd.s32 4294967295, %s7877_s29   ;;  %p6094_p0 = scmp.ge.s32.totalorder %s7877_s29, 1  ;;  %s7877_s29 = sphi %s7958_s29, %s27_s29  }
   0x4   : > { %p391_p1 = scmp.lt.s32.totalorder %s7877_s29, 3 }
   0x6   : > { %p392_p2 = pnand %p6094_p0, %p391_p1 }
   0x8   : > { %395 = sbr.rel (%p392_p2) target bundleno = 2175 (0x87f), region = 72 }
   0xf   : > { %v7575_v2 = vld [vmem:[%s10334_s1] sm:$0xff]   ;;  %vm1200_vm0 = vcmask 1044480   ;;  %v7576_v3 = vld [vmem:[%s10334_s1 + $0x8] sm:$0x3f]   ;;  %vm1201_vm1 = vcmask 1045504   ;;  %p433_p3 = scmp.lt.s32.totalorder %s6090_s30, 1 }
  0x10   : > { %6838 = vmatprep.subr.bf16.mxu0 %v7575_v2  ;;  %vm1007_vm2 = vcmask 220160   ;;  %v7879_v4 = vmov 65535   ;;  %vm442_vm3 = vcmask 261120   ;;  %vm444_vm4 = vcmask 254976  }
  0x11   : > { %6839 = vmatpush3.bf16.msra.mxu0 %v7575_v2  ;;  %v1202_v5 = vsel %vm1200_vm0, 4294967295, %v7879_v4  ;;  %s10554_s30 = smov (!%p433_p3, %s6090_s30), 1  ;;  %vm6041_vm6 = vcmask 0  }
  0x12   : > { %v1203_v6 = vsel %vm1201_vm1, %v1202_v5, 0  ;;  %s6587_s16 = sshll.u32 %s10554_s30, 9  ;;  %s440_s24 = scalar_lea.vmem %s10345_s13, %s10554_s30 }
  0x13   : > { %v1205_v7 = vand.u32 %v7576_v3, %v1203_v6  ;;  %s7978_s19 = scalar_lea.vmem %s10333_s0, %s6587_s16 }
  0x14   : > { %v7577_v8 = vld [vmem:[%s7978_s19] sm:$0xff]   ;;  %v7578_v9 = vld [vmem:[%s7978_s19 + $0x8] sm:$0xff]   ;;  %v7579_v10 = vld [vmem:[%s7978_s19 + $0x10] sm:$0xff]  }
  0x15   : > { %6840 = vmatprep.subr.bf16.mxu0 %v1205_v7  ;;  %6842 = vmatprep.mubr.msk.bf16.mxu0 %vm1007_vm2, %v7577_v8  ;;  %v7580_v11 = vld [vmem:[%s7978_s19 + $0x18] sm:$0xff]   ;;  %v7581_v12 = vld [vmem:[%s7978_s19 + $0x20] sm:$0xff]   ;;  %v7582_v13 = vld [vmem:[%s7978_s19 + $0x28] sm:$0xff]  }
  0x16   : > { %6841 = vmatpush3.bf16.msra.mxu0 %v1205_v7  ;;  %v7583_v14 = vld [vmem:[%s7978_s19 + $0x30] sm:$0xff]   ;;  %v7584_v15 = vld [vmem:[%s7978_s19 + $0x38] sm:$0xff]   ;;  %v7585_v16 = vld [vmem:[%s7978_s19 + $0x40] sm:$0xff]  }
  0x17   : > { %v7586_v17 = vld [vmem:[%s7978_s19 + $0x48] sm:$0xff]   ;;  %v7587_v18 = vld [vmem:[%s7978_s19 + $0x50] sm:$0xff]   ;;  %v7588_v19 = vld [vmem:[%s7978_s19 + $0x58] sm:$0xff]  }
  0x18   : > { %v7589_v20 = vld [vmem:[%s7978_s19 + $0x60] sm:$0xff]   ;;  %v7590_v21 = vld [vmem:[%s7978_s19 + $0x68] sm:$0xff]   ;;  %v7591_v22 = vld [vmem:[%s7978_s19 + $0x70] sm:$0xff]  }
  0x19   : > { %6843 = vmatmul.mubr.msk.bf16.vlgmr.msra.gmra.mrb[0].mxu0 %vm1007_vm2, %v7578_v9  ;;  %v7592_v23 = vld [vmem:[%s7978_s19 + $0x78] sm:$0xff]   ;;  %v7593_v24 = vld [vmem:[%s7978_s19 + $0x80] sm:$0xff]   ;;  %v7594_v25 = vld [vmem:[%s7978_s19 + $0x88] sm:$0xff]  }
  0x1a   : > { %6846 = vmatprep.mubr.msk.bf16.mxu0 %vm1007_vm2, %v7579_v10  ;;  %v7595_v26 = vld [vmem:[%s7978_s19 + $0x90] sm:$0xff]   ;;  %v7596_v27 = vld [vmem:[%s7978_s19 + $0x98] sm:$0xff]   ;;  %v7597_v28 = vld [vmem:[%s7978_s19 + $0xa0] sm:$0xff]  }
  0x1b   : > { %v7598_v29 = vld [vmem:[%s7978_s19 + $0xa8] sm:$0xff]   ;;  %v7599_v30 = vld [vmem:[%s7978_s19 + $0xb0] sm:$0xff]   ;;  %v7600_v31 = vld [vmem:[%s7978_s19 + $0xb8] sm:$0xff]  }
  0x1c   : > { %v7601_v32 = vld [vmem:[%s7978_s19 + $0xc0] sm:$0xff]   ;;  %v7602_v33 = vld [vmem:[%s7978_s19 + $0xc8] sm:$0xff]   ;;  %v7603_v34 = vld [vmem:[%s7978_s19 + $0xd0] sm:$0xff]  }
  0x1d   : > { %v7604_v35 = vld [vmem:[%s7978_s19 + $0xd8] sm:$0xff]   ;;  %v7605_v36 = vld [vmem:[%s7978_s19 + $0xe0] sm:$0xff]   ;;  %v7606_v37 = vld [vmem:[%s7978_s19 + $0xe8] sm:$0xff]  }
  0x1e   : > { %v7607_v38 = vld [vmem:[%s7978_s19 + $0xf0] sm:$0xff]   ;;  %v7608_v39 = vld [vmem:[%s7978_s19 + $0xf8] sm:$0xff]   ;;  %v7609_v40 = vld [vmem:[%s7978_s19 + $0x100] sm:$0xff]  }
  0x1f   : > { %v7610_v41 = vld [vmem:[%s7978_s19 + $0x108] sm:$0xff]   ;;  %v7611_v42 = vld [vmem:[%s7978_s19 + $0x110] sm:$0xff]   ;;  %v7612_v43 = vld [vmem:[%s7978_s19 + $0x118] sm:$0xff]  }
  0x20   : > { %v7613_v44 = vld [vmem:[%s7978_s19 + $0x120] sm:$0xff]   ;;  %v7614_v45 = vld [vmem:[%s7978_s19 + $0x128] sm:$0xff]   ;;  %v7615_v46 = vld [vmem:[%s7978_s19 + $0x130] sm:$0xff]  }
  0x21   : > { %6847 = vmatmul.mubr.msk.bf16.gmra.mrb[4].mxu0 %vm1007_vm2, %v7580_v11  ;;  %v7616_v47 = vld [vmem:[%s7978_s19 + $0x138] sm:$0xff]   ;;  %v7617_v48 = vld [vmem:[%s7978_s19 + $0x140] sm:$0xff]   ;;  %v7618_v49 = vld [vmem:[%s7978_s19 + $0x148] sm:$0xff]  }
  0x22   : > { %6850 = vmatprep.mubr.msk.bf16.mxu0 %vm1007_vm2, %v7581_v12  ;;  %v7619_v50 = vld [vmem:[%s7978_s19 + $0x150] sm:$0xff]   ;;  %v7620_v51 = vld [vmem:[%s7978_s19 + $0x158] sm:$0xff]   ;;  %v7621_v52 = vld [vmem:[%s7978_s19 + $0x160] sm:$0xff]  }
  0x23   : > { %v7622_v53 = vld [vmem:[%s7978_s19 + $0x168] sm:$0xff]   ;;  %v7623_v54 = vld [vmem:[%s7978_s19 + $0x170] sm:$0xff]   ;;  %v7624_v55 = vld [vmem:[%s7978_s19 + $0x178] sm:$0xff]  }
  0x24   : > { %v7625_v56 = vld [vmem:[%s7978_s19 + $0x180] sm:$0xff]   ;;  %v7626_v57 = vld [vmem:[%s7978_s19 + $0x188] sm:$0xff]   ;;  %v7627_v58 = vld [vmem:[%s7978_s19 + $0x190] sm:$0xff]  }
  0x25   : > { %v7628_v59 = vld [vmem:[%s7978_s19 + $0x198] sm:$0xff]   ;;  %v7629_v60 = vld [vmem:[%s7978_s19 + $0x1a0] sm:$0xff]   ;;  %v7630_v61 = vld [vmem:[%s7978_s19 + $0x1a8] sm:$0xff]  }
  0x26   : > { %v7631_v62 = vld [vmem:[%s7978_s19 + $0x1b0] sm:$0xff]   ;;  %v7632_v1 = vld [vmem:[%s7978_s19 + $0x1b8] sm:$0xff]   ;;  %v7633_v3 = vld [vmem:[%s7978_s19 + $0x1c0] sm:$0xff]  }
  0x27   : > { %v7634_v7 = vld [vmem:[%s7978_s19 + $0x1c8] sm:$0xff]   ;;  %v7635_v9 = vld [vmem:[%s7978_s19 + $0x1d0] sm:$0xff]  }
  0x29   : > { %6851 = vmatmul.mubr.msk.bf16.gmra.mrb[8].mxu0 %vm1007_vm2, %v7582_v13  ;;  %v7636_v13 = vld [vmem:[%s7978_s19 + $0x1d8] sm:$0xff]  }
  0x2a   : > { %6854 = vmatprep.mubr.msk.bf16.mxu0 %vm1007_vm2, %v7583_v14 }
  0x31   : > { %6855 = vmatmul.mubr.msk.bf16.gmra.mrb[12].mxu0 %vm1007_vm2, %v7584_v15  ;;  %v7637_v15 = vld [vmem:[%s7978_s19 + $0x1e0] sm:$0xff]  }
  0x32   : > { %6858 = vmatprep.mubr.msk.bf16.mxu0 %vm1007_vm2, %v7585_v16 }
  0x39   : > { %6859 = vmatmul.mubr.msk.bf16.gmra.mrb[16].mxu0 %vm1007_vm2, %v7586_v17 }
  0x3a   : > { %6862 = vmatprep.mubr.msk.bf16.mxu0 %vm1007_vm2, %v7587_v18 }
  0x41   : > { %6863 = vmatmul.mubr.msk.bf16.gmra.mrb[20].mxu0 %vm1007_vm2, %v7588_v19  ;;  %v7638_v19 = vld [vmem:[%s7978_s19 + $0x1e8] sm:$0xff]  }
  0x42   : > { %6866 = vmatprep.mubr.msk.bf16.mxu0 %vm1007_vm2, %v7589_v20 }
  0x49   : > { %6867 = vmatmul.mubr.msk.bf16.gmra.mrb[24].mxu0 %vm1007_vm2, %v7590_v21  ;;  %v7639_v21 = vld [vmem:[%s7978_s19 + $0x1f0] sm:$0xff]  }
  0x4a   : > { %6870 = vmatprep.mubr.msk.bf16.mxu0 %vm1007_vm2, %v7591_v22 }
  0x51   : > { %6871 = vmatmul.mubr.msk.bf16.gmra.mrb[28].mxu0 %vm1007_vm2, %v7592_v23 }
  0x52   : > { %6874 = vmatprep.mubr.msk.bf16.mxu0 %vm1007_vm2, %v7593_v24 }
  0x59   : > { %6875 = vmatmul.mubr.msk.bf16.gmra.mrb[32].mxu0 %vm1007_vm2, %v7594_v25  ;;  %v7640_v25 = vld [vmem:[%s7978_s19 + $0x1f8] sm:$0xff]  }
  0x5a   : > { %6878 = vmatprep.mubr.msk.bf16.mxu0 %vm1007_vm2, %v7595_v26 }
  0x61   : > { %6879 = vmatmul.mubr.msk.bf16.gmra.mrb[36].mxu0 %vm1007_vm2, %v7596_v27 }
  0x62   : > { %6882 = vmatprep.mubr.msk.bf16.mxu0 %vm1007_vm2, %v7597_v28 }
  0x69   : > { %6883 = vmatmul.mubr.msk.bf16.gmra.mrb[40].mxu0 %vm1007_vm2, %v7598_v29 }
  0x6a   : > { %6886 = vmatprep.mubr.msk.bf16.mxu0 %vm1007_vm2, %v7599_v30 }
  0x71   : > { %6887 = vmatmul.mubr.msk.bf16.gmra.mrb[44].mxu0 %vm1007_vm2, %v7600_v31 }
  0x72   : > { %6890 = vmatprep.mubr.msk.bf16.mxu0 %vm1007_vm2, %v7601_v32 }
  0x79   : > { %6891 = vmatmul.mubr.msk.bf16.gmra.mrb[48].mxu0 %vm1007_vm2, %v7602_v33 }
  0x7a   : > { %6894 = vmatprep.mubr.msk.bf16.mxu0 %vm1007_vm2, %v7603_v34 }
  0x81   : > { %6895 = vmatmul.mubr.msk.bf16.gmra.mrb[52].mxu0 %vm1007_vm2, %v7604_v35 }
  0x82   : > { %6898 = vmatprep.mubr.msk.bf16.mxu0 %vm1007_vm2, %v7605_v36 }
  0x89   : > { %6899 = vmatmul.mubr.msk.bf16.gmra.mrb[56].mxu0 %vm1007_vm2, %v7606_v37 }
  0x8a   : > { %6902 = vmatprep.mubr.msk.bf16.mxu0 %vm1007_vm2, %v7607_v38 }
  0x91   : > { %6903 = vmatmul.mubr.msk.bf16.gmra.mrb[60].mxu0 %vm1007_vm2, %v7608_v39 }
  0x92   : > { %6906 = vmatprep.mubr.msk.bf16.mxu0 %vm1007_vm2, %v7609_v40  ;;  %v7880_v40 = vmov 0.0  }
  0x93   : > { %450 = vst.msk [vmem:[#allocation2 + $0x30] sm:$0xff] %vm442_vm3, %v7880_v40  ;;  %446 = vst.msk [vmem:[#allocation2 + $0x10] sm:$0xff] %vm442_vm3, %v7880_v40 }
  0x94   : > { %451 = vst.msk [vmem:[#allocation2 + $0x38] sm:$0x3] %vm444_vm4, %v7880_v40  ;;  %447 = vst.msk [vmem:[#allocation2 + $0x18] sm:$0x3] %vm444_vm4, %v7880_v40 }
  0x95   : > { %448 = vst.msk [vmem:[#allocation2 + $0x20] sm:$0xff] %vm442_vm3, %v7880_v40  ;;  %452 = vst.msk [vmem:[#allocation2 + $0x40] sm:$0xff] %vm442_vm3, %v7880_v40 }
  0x96   : > { %449 = vst.msk [vmem:[#allocation2 + $0x28] sm:$0x3] %vm444_vm4, %v7880_v40  ;;  %453 = vst.msk [vmem:[#allocation2 + $0x48] sm:$0x3] %vm444_vm4, %v7880_v40 }
  0x97   : > { %454 = vst.msk [vmem:[#allocation2 + $0x50] sm:$0xff] %vm442_vm3, %v7880_v40  ;;  %456 = vst.msk [vmem:[#allocation2 + $0x60] sm:$0xff] %vm442_vm3, %v7880_v40 }
  0x98   : > { %455 = vst.msk [vmem:[#allocation2 + $0x58] sm:$0x3] %vm444_vm4, %v7880_v40  ;;  %457 = vst.msk [vmem:[#allocation2 + $0x68] sm:$0x3] %vm444_vm4, %v7880_v40 }
  0x99   : > { %6907 = vmatmul.mubr.msk.bf16.gmra.mrb[64].mxu0 %vm1007_vm2, %v7610_v41  ;;  %458 = vst.msk [vmem:[#allocation2 + $0x70] sm:$0xff] %vm442_vm3, %v7880_v40  ;;  %460 = vst.msk [vmem:[#allocation2 + $0x80] sm:$0xff] %vm442_vm3, %v7880_v40 }
  0x9a   : > { %6910 = vmatprep.mubr.msk.bf16.mxu0 %vm1007_vm2, %v7611_v42  ;;  %459 = vst.msk [vmem:[#allocation2 + $0x78] sm:$0x3] %vm444_vm4, %v7880_v40  ;;  %461 = vst.msk [vmem:[#allocation2 + $0x88] sm:$0x3] %vm444_vm4, %v7880_v40 }
  0x9b   : > { %462 = vst.msk [vmem:[#allocation2 + $0x90] sm:$0xff] %vm442_vm3, %v7880_v40  ;;  %466 = vst.msk [vmem:[#allocation2 + $0xb0] sm:$0xff] %vm442_vm3, %v7880_v40 }
  0x9c   : > { %463 = vst.msk [vmem:[#allocation2 + $0x98] sm:$0x3] %vm444_vm4, %v7880_v40  ;;  %467 = vst.msk [vmem:[#allocation2 + $0xb8] sm:$0x3] %vm444_vm4, %v7880_v40 }
  0x9d   : > { %468 = vst.msk [vmem:[#allocation2 + $0xc0] sm:$0xff] %vm442_vm3, %v7880_v40  ;;  %470 = vst.msk [vmem:[#allocation2 + $0xd0] sm:$0xff] %vm442_vm3, %v7880_v40 }
  0x9e   : > { %469 = vst.msk [vmem:[#allocation2 + $0xc8] sm:$0x3] %vm444_vm4, %v7880_v40  ;;  %471 = vst.msk [vmem:[#allocation2 + $0xd8] sm:$0x3] %vm444_vm4, %v7880_v40 }
  0x9f   : > { %472 = vst.msk [vmem:[#allocation2 + $0xe0] sm:$0xff] %vm442_vm3, %v7880_v40  ;;  %474 = vst.msk [vmem:[#allocation2 + $0xf0] sm:$0xff] %vm442_vm3, %v7880_v40 }
  0xa0   : > { %473 = vst.msk [vmem:[#allocation2 + $0xe8] sm:$0x3] %vm444_vm4, %v7880_v40  ;;  %475 = vst.msk [vmem:[#allocation2 + $0xf8] sm:$0x3] %vm444_vm4, %v7880_v40 }
  0xa1   : > { %6911 = vmatmul.mubr.msk.bf16.gmra.mrb[68].mxu0 %vm1007_vm2, %v7612_v43  ;;  %476 = vst.msk [vmem:[#allocation2 + $0x100] sm:$0xff] %vm442_vm3, %v7880_v40  ;;  %478 = vst.msk [vmem:[#allocation2 + $0x110] sm:$0xff] %vm442_vm3, %v7880_v40 }
  0xa2   : > { %6914 = vmatprep.mubr.msk.bf16.mxu0 %vm1007_vm2, %v7613_v44  ;;  %477 = vst.msk [vmem:[#allocation2 + $0x108] sm:$0x3] %vm444_vm4, %v7880_v40  ;;  %479 = vst.msk [vmem:[#allocation2 + $0x118] sm:$0x3] %vm444_vm4, %v7880_v40 }
  0xa3   : > { %480 = vst.msk [vmem:[#allocation2 + $0x120] sm:$0xff] %vm442_vm3, %v7880_v40  ;;  %482 = vst.msk [vmem:[#allocation2 + $0x130] sm:$0xff] %vm442_vm3, %v7880_v40 }
  0xa4   : > { %481 = vst.msk [vmem:[#allocation2 + $0x128] sm:$0x3] %vm444_vm4, %v7880_v40  ;;  %483 = vst.msk [vmem:[#allocation2 + $0x138] sm:$0x3] %vm444_vm4, %v7880_v40 }
  0xa5   : > { %484 = vst.msk [vmem:[#allocation2 + $0x140] sm:$0xff] %vm442_vm3, %v7880_v40  ;;  %486 = vst.msk [vmem:[#allocation2 + $0x150] sm:$0xff] %vm442_vm3, %v7880_v40 }
  0xa6   : > { %485 = vst.msk [vmem:[#allocation2 + $0x148] sm:$0x3] %vm444_vm4, %v7880_v40  ;;  %487 = vst.msk [vmem:[#allocation2 + $0x158] sm:$0x3] %vm444_vm4, %v7880_v40 }
  0xa7   : > { %488 = vst.msk [vmem:[#allocation2 + $0x160] sm:$0xff] %vm442_vm3, %v7880_v40  ;;  %490 = vst.msk [vmem:[#allocation2 + $0x170] sm:$0xff] %vm442_vm3, %v7880_v40 }
  0xa8   : > { %489 = vst.msk [vmem:[#allocation2 + $0x168] sm:$0x3] %vm444_vm4, %v7880_v40  ;;  %491 = vst.msk [vmem:[#allocation2 + $0x178] sm:$0x3] %vm444_vm4, %v7880_v40 }
  0xa9   : > { %6915 = vmatmul.mubr.msk.bf16.gmra.mrb[72].mxu0 %vm1007_vm2, %v7614_v45  ;;  %492 = vst.msk [vmem:[#allocation2 + $0x180] sm:$0xff] %vm442_vm3, %v7880_v40  ;;  %494 = vst.msk [vmem:[#allocation2 + $0x190] sm:$0xff] %vm442_vm3, %v7880_v40 }
  0xaa   : > { %6918 = vmatprep.mubr.msk.bf16.mxu0 %vm1007_vm2, %v7615_v46  ;;  %493 = vst.msk [vmem:[#allocation2 + $0x188] sm:$0x3] %vm444_vm4, %v7880_v40  ;;  %495 = vst.msk [vmem:[#allocation2 + $0x198] sm:$0x3] %vm444_vm4, %v7880_v40 }
  0xab   : > { %496 = vst.msk [vmem:[#allocation2 + $0x1a0] sm:$0xff] %vm442_vm3, %v7880_v40  ;;  %498 = vst.msk [vmem:[#allocation2 + $0x1b0] sm:$0xff] %vm442_vm3, %v7880_v40 }
  0xac   : > { %497 = vst.msk [vmem:[#allocation2 + $0x1a8] sm:$0x3] %vm444_vm4, %v7880_v40  ;;  %499 = vst.msk [vmem:[#allocation2 + $0x1b8] sm:$0x3] %vm444_vm4, %v7880_v40 }
  0xad   : > { %500 = vst.msk [vmem:[#allocation2 + $0x1c0] sm:$0xff] %vm442_vm3, %v7880_v40  ;;  %504 = vst.msk [vmem:[#allocation2 + $0x1e0] sm:$0xff] %vm442_vm3, %v7880_v40 }
  0xae   : > { %501 = vst.msk [vmem:[#allocation2 + $0x1c8] sm:$0x3] %vm444_vm4, %v7880_v40  ;;  %505 = vst.msk [vmem:[#allocation2 + $0x1e8] sm:$0x3] %vm444_vm4, %v7880_v40 }
  0xaf   : > { %506 = vst.msk [vmem:[#allocation2 + $0x1f0] sm:$0xff] %vm442_vm3, %v7880_v40  ;;  %508 = vst.msk [vmem:[#allocation2 + $0x200] sm:$0xff] %vm442_vm3, %v7880_v40 }
  0xb0   : > { %507 = vst.msk [vmem:[#allocation2 + $0x1f8] sm:$0x3] %vm444_vm4, %v7880_v40  ;;  %509 = vst.msk [vmem:[#allocation2 + $0x208] sm:$0x3] %vm444_vm4, %v7880_v40 }
  0xb1   : > { %6919 = vmatmul.mubr.msk.bf16.gmra.mrb[76].mxu0 %vm1007_vm2, %v7616_v47  ;;  %510 = vst.msk [vmem:[#allocation2 + $0x210] sm:$0xff] %vm442_vm3, %v7880_v40  ;;  %512 = vst.msk [vmem:[#allocation2 + $0x220] sm:$0xff] %vm442_vm3, %v7880_v40 }
  0xb2   : > { %6922 = vmatprep.mubr.msk.bf16.mxu0 %vm1007_vm2, %v7617_v48  ;;  %511 = vst.msk [vmem:[#allocation2 + $0x218] sm:$0x3] %vm444_vm4, %v7880_v40  ;;  %513 = vst.msk [vmem:[#allocation2 + $0x228] sm:$0x3] %vm444_vm4, %v7880_v40  ;;  %v7641_v48 = vld [vmem:[%s10336_s3 + $0x10] sm:$0xff]  }
  0xb3   : > { %514 = vst.msk [vmem:[#allocation2 + $0x230] sm:$0xff] %vm442_vm3, %v7880_v40  ;;  %516 = vst.msk [vmem:[#allocation2 + $0x240] sm:$0xff] %vm442_vm3, %v7880_v40  ;;  %6970 = vmatprep.subr.bf16.mxu0 %v7641_v48 }
  0xb4   : > { %515 = vst.msk [vmem:[#allocation2 + $0x238] sm:$0x3] %vm444_vm4, %v7880_v40  ;;  %517 = vst.msk [vmem:[#allocation2 + $0x248] sm:$0x3] %vm444_vm4, %v7880_v40  ;;  %6971 = vmatpush3.bf16.msra.mxu0 %v7641_v48 }
  0xb5   : > { %518 = vst.msk [vmem:[#allocation2 + $0x250] sm:$0xff] %vm442_vm3, %v7880_v40  ;;  %520 = vst.msk [vmem:[#allocation2 + $0x260] sm:$0xff] %vm442_vm3, %v7880_v40 }
  0xb6   : > { %519 = vst.msk [vmem:[#allocation2 + $0x258] sm:$0x3] %vm444_vm4, %v7880_v40  ;;  %521 = vst.msk [vmem:[#allocation2 + $0x268] sm:$0x3] %vm444_vm4, %v7880_v40 }
  0xb7   : > { %524 = vst.msk [vmem:[#allocation3] sm:$0xff] %vm442_vm3, %v7880_v40  ;;  %526 = vst.msk [vmem:[#allocation3 + $0x10] sm:$0xff] %vm442_vm3, %v7880_v40 }
  0xb8   : > { %525 = vst.msk [vmem:[#allocation3 + $0x8] sm:$0x3] %vm444_vm4, %v7880_v40  ;;  %527 = vst.msk [vmem:[#allocation3 + $0x18] sm:$0x3] %vm444_vm4, %v7880_v40 }
  0xb9   : > { %6923 = vmatmul.mubr.msk.bf16.gmra.mrb[80].mxu0 %vm1007_vm2, %v7618_v49  ;;  %528 = vst.msk [vmem:[#allocation3 + $0x20] sm:$0xff] %vm442_vm3, %v7880_v40  ;;  %530 = vst.msk [vmem:[#allocation3 + $0x30] sm:$0xff] %vm442_vm3, %v7880_v40 }
  0xba   : > { %6926 = vmatprep.mubr.msk.bf16.mxu0 %vm1007_vm2, %v7619_v50  ;;  %529 = vst.msk [vmem:[#allocation3 + $0x28] sm:$0x3] %vm444_vm4, %v7880_v40  ;;  %531 = vst.msk [vmem:[#allocation3 + $0x38] sm:$0x3] %vm444_vm4, %v7880_v40 }
  0xbb   : > { %532 = vst.msk [vmem:[#allocation3 + $0x40] sm:$0xff] %vm442_vm3, %v7880_v40  ;;  %534 = vst.msk [vmem:[#allocation3 + $0x50] sm:$0xff] %vm442_vm3, %v7880_v40 }
  0xbc   : > { %533 = vst.msk [vmem:[#allocation3 + $0x48] sm:$0x3] %vm444_vm4, %v7880_v40  ;;  %535 = vst.msk [vmem:[#allocation3 + $0x58] sm:$0x3] %vm444_vm4, %v7880_v40 }
  0xbd   : > { %536 = vst.msk [vmem:[#allocation3 + $0x60] sm:$0xff] %vm442_vm3, %v7880_v40  ;;  %538 = vst.msk [vmem:[#allocation3 + $0x70] sm:$0xff] %vm442_vm3, %v7880_v40 }
  0xbe   : > { %537 = vst.msk [vmem:[#allocation3 + $0x68] sm:$0x3] %vm444_vm4, %v7880_v40  ;;  %539 = vst.msk [vmem:[#allocation3 + $0x78] sm:$0x3] %vm444_vm4, %v7880_v40 }
  0xbf   : > { %540 = vst.msk [vmem:[#allocation3 + $0x80] sm:$0xff] %vm442_vm3, %v7880_v40  ;;  %542 = vst.msk [vmem:[#allocation3 + $0x90] sm:$0xff] %vm442_vm3, %v7880_v40 }
  0xc0   : > { %541 = vst.msk [vmem:[#allocation3 + $0x88] sm:$0x3] %vm444_vm4, %v7880_v40  ;;  %543 = vst.msk [vmem:[#allocation3 + $0x98] sm:$0x3] %vm444_vm4, %v7880_v40  ;;  %v7644_v40 = vld [vmem:[%s10336_s3 + $0x8] sm:$0xff]  }
  0xc1   : > { %6927 = vmatmul.mubr.msk.bf16.gmra.mrb[84].mxu0 %vm1007_vm2, %v7620_v51 }
  0xc2   : > { %6930 = vmatprep.mubr.msk.bf16.mxu0 %vm1007_vm2, %v7621_v52 }
  0xc9   : > { %6931 = vmatmul.mubr.msk.bf16.gmra.mrb[88].mxu0 %vm1007_vm2, %v7622_v53 }
  0xca   : > { %6934 = vmatprep.mubr.msk.bf16.mxu0 %vm1007_vm2, %v7623_v54 }
  0xd1   : > { %6935 = vmatmul.mubr.msk.bf16.gmra.mrb[92].mxu0 %vm1007_vm2, %v7624_v55 }
  0xd2   : > { %6938 = vmatprep.mubr.msk.bf16.mxu0 %vm1007_vm2, %v7625_v56 }
  0xd9   : > { %6939 = vmatmul.mubr.msk.bf16.gmra.mrb[96].mxu0 %vm1007_vm2, %v7626_v57 }
  0xda   : > { %6942 = vmatprep.mubr.msk.bf16.mxu0 %vm1007_vm2, %v7627_v58 }
  0xe1   : > { %6943 = vmatmul.mubr.msk.bf16.gmra.mrb[100].mxu0 %vm1007_vm2, %v7628_v59 }
  0xe2   : > { %6946 = vmatprep.mubr.msk.bf16.mxu0 %vm1007_vm2, %v7629_v60 }
  0xe9   : > { %6947 = vmatmul.mubr.msk.bf16.gmra.mrb[104].mxu0 %vm1007_vm2, %v7630_v61 }
  0xea   : > { %6950 = vmatprep.mubr.msk.bf16.mxu0 %vm1007_vm2, %v7631_v62 }
  0xec   : > { %v8090_v63 = vpop.f32.mrb[0].mxu0 }
  0xed   : > { %v8092_v0 = vpop.f32.mrb[1].mxu0 }
  0xee   : > { %v8095_v2 = vpop.f32.mrb[2].mxu0 }
  0xef   : > { %v8098_v4 = vpop.f32.mrb[3].mxu0 }
  0xf1   : > { %6951 = vmatmul.mubr.msk.bf16.gmra.mrb[108].mxu0 %vm1007_vm2, %v7632_v1 }
  0xf2   : > { %6954 = vmatprep.mubr.msk.bf16.mxu0 %vm1007_vm2, %v7633_v3 }
  0xf4   : > { %v8102_v5 = vpop.f32.mrb[4].mxu0 }
  0xf5   : > { %v8104_v6 = vpop.f32.mrb[5].mxu0 }
  0xf6   : > { %v8107_v8 = vpop.f32.mrb[6].mxu0 }
  0xf7   : > { %v8110_v10 = vpop.f32.mrb[7].mxu0 }
  0xf9   : > { %6955 = vmatmul.mubr.msk.bf16.gmra.mrb[112].mxu0 %vm1007_vm2, %v7634_v7 }
  0xfa   : > { %6958 = vmatprep.mubr.msk.bf16.mxu0 %vm1007_vm2, %v7635_v9 }
  0xfc   : > { %v8114_v11 = vpop.f32.mrb[8].mxu0 }
  0xfd   : > { %v8116_v12 = vpop.f32.mrb[9].mxu0 }
  0xfe   : > { %v8119_v14 = vpop.f32.mrb[10].mxu0 }
  0xff   : > { %v8122_v16 = vpop.f32.mrb[11].mxu0 }
 0x101   : > { %6959 = vmatmul.mubr.msk.bf16.gmra.mrb[116].mxu0 %vm1007_vm2, %v7636_v13 }
 0x102   : > { %6962 = vmatprep.mubr.msk.bf16.mxu0 %vm1007_vm2, %v7637_v15  ;;  %v7642_v15 = vld [vmem:[%s10336_s3 + $0x18] sm:$0xff]  }
 0x103   : > { %6972 = vmatprep.subr.bf16.mxu0 %v7642_v15 }
 0x104   : > { %v8126_v17 = vpop.f32.mrb[12].mxu0  ;;  %6973 = vmatpush3.bf16.msra.mxu0 %v7642_v15  ;;  %v8499_v15 = vld [vmem:[%s10336_s3 + $0x20] sm:$0xff]  }
 0x105   : > { %v8128_v18 = vpop.f32.mrb[13].mxu0  ;;  %10417 = vst [vmem:[#allocation38_spill] sm:$0xff] %v8499_v15 }
 0x106   : > { %v8131_v20 = vpop.f32.mrb[14].mxu0 }
 0x107   : > { %v8134_v22 = vpop.f32.mrb[15].mxu0 }
 0x109   : > { %6963 = vmatmul.mubr.msk.bf16.gmra.mrb[120].mxu0 %vm1007_vm2, %v7638_v19 }
 0x10a   : > { %6966 = vmatprep.mubr.msk.bf16.mxu0 %vm1007_vm2, %v7639_v21 }
 0x10c   : > { %v8138_v23 = vpop.f32.mrb[16].mxu0 }
 0x10d   : > { %10385 = vst [vmem:[#allocation6_spill] sm:$0xff] %v8138_v23  ;;  %v8140_v24 = vpop.f32.mrb[17].mxu0 }
 0x10e   : > { %10386 = vst [vmem:[#allocation7_spill] sm:$0xff] %v8140_v24  ;;  %v8143_v26 = vpop.f32.mrb[18].mxu0 }
 0x10f   : > { %10387 = vst [vmem:[#allocation8_spill] sm:$0xff] %v8143_v26  ;;  %v8145_v27 = vpop.f32.mrb[19].mxu0 }
 0x110   : > { %10388 = vst [vmem:[#allocation9_spill] sm:$0xff] %v8145_v27 }
 0x111   : > { %6967 = vmatmul.mubr.msk.bf16.gmra.mrb[124].mxu0 %vm1007_vm2, %v7640_v25 }
 0x114   : > { %v8148_v28 = vpop.f32.mrb[20].mxu0 }
 0x115   : > { %10389 = vst [vmem:[#allocation10_spill] sm:$0xff] %v8148_v28  ;;  %v8150_v29 = vpop.f32.mrb[21].mxu0 }
 0x116   : > { %10390 = vst [vmem:[#allocation11_spill] sm:$0xff] %v8150_v29  ;;  %v8152_v30 = vpop.f32.mrb[22].mxu0 }
 0x117   : > { %10391 = vst [vmem:[#allocation12_spill] sm:$0xff] %v8152_v30  ;;  %v8154_v31 = vpop.f32.mrb[23].mxu0 }
 0x118   : > { %10392 = vst [vmem:[#allocation13_spill] sm:$0xff] %v8154_v31 }
 0x11c   : > { %v8156_v32 = vpop.f32.mrb[24].mxu0 }
 0x11d   : > { %10393 = vst [vmem:[#allocation14_spill] sm:$0xff] %v8156_v32  ;;  %v8158_v33 = vpop.f32.mrb[25].mxu0 }
 0x11e   : > { %10394 = vst [vmem:[#allocation15_spill] sm:$0xff] %v8158_v33  ;;  %v8160_v34 = vpop.f32.mrb[26].mxu0 }
 0x11f   : > { %10395 = vst [vmem:[#allocation16_spill] sm:$0xff] %v8160_v34  ;;  %v8162_v35 = vpop.f32.mrb[27].mxu0 }
 0x120   : > { %10396 = vst [vmem:[#allocation17_spill] sm:$0xff] %v8162_v35 }
 0x124   : > { %v8164_v36 = vpop.f32.mrb[28].mxu0 }
 0x125   : > { %10397 = vst [vmem:[#allocation18_spill] sm:$0xff] %v8164_v36  ;;  %v8166_v37 = vpop.f32.mrb[29].mxu0 }
 0x126   : > { %10398 = vst [vmem:[#allocation19_spill] sm:$0xff] %v8166_v37  ;;  %v8168_v38 = vpop.f32.mrb[30].mxu0 }
 0x127   : > { %10399 = vst [vmem:[#allocation20_spill] sm:$0xff] %v8168_v38  ;;  %v8170_v39 = vpop.f32.mrb[31].mxu0 }
 0x128   : > { %10400 = vst [vmem:[#allocation21_spill] sm:$0xff] %v8170_v39 }
 0x12c   : > { %v8356_v41 = vpop.f32.mrb[32].mxu0 }
 0x12d   : > { %v8360_v43 = vpop.f32.mrb[33].mxu0 }
 0x12e   : > { %v8364_v45 = vpop.f32.mrb[34].mxu0 }
 0x12f   : > { %v8368_v47 = vpop.f32.mrb[35].mxu0 }
 0x134   : > { %v8372_v49 = vpop.f32.mrb[36].mxu0 }
 0x135   : > { %v8376_v51 = vpop.f32.mrb[37].mxu0 }
 0x136   : > { %v8380_v53 = vpop.f32.mrb[38].mxu0 }
 0x137   : > { %v8384_v55 = vpop.f32.mrb[39].mxu0 }
 0x13c   : > { %v8388_v57 = vpop.f32.mrb[40].mxu0 }
 0x13d   : > { %v8392_v59 = vpop.f32.mrb[41].mxu0 }
 0x13e   : > { %v8396_v61 = vpop.f32.mrb[42].mxu0 }
 0x13f   : > { %v8400_v1 = vpop.f32.mrb[43].mxu0 }
 0x144   : > { %v8404_v7 = vpop.f32.mrb[44].mxu0 }
 0x145   : > { %v8408_v13 = vpop.f32.mrb[45].mxu0 }
 0x146   : > { %v8412_v19 = vpop.f32.mrb[46].mxu0 }
 0x147   : > { %v8416_v25 = vpop.f32.mrb[47].mxu0 }
 0x14c   : > { %v8420_v3 = vpop.f32.mrb[48].mxu0 }
 0x14d   : > { %10401 = vst [vmem:[#allocation22_spill] sm:$0xff] %v8420_v3  ;;  %v8424_v62 = vpop.f32.mrb[49].mxu0 }
 0x14e   : > { %10402 = vst [vmem:[#allocation23_spill] sm:$0xff] %v8424_v62  ;;  %v8428_v60 = vpop.f32.mrb[50].mxu0 }
 0x14f   : > { %10403 = vst [vmem:[#allocation24_spill] sm:$0xff] %v8428_v60  ;;  %v8432_v58 = vpop.f32.mrb[51].mxu0 }
 0x150   : > { %10404 = vst [vmem:[#allocation25_spill] sm:$0xff] %v8432_v58 }
 0x154   : > { %v8436_v56 = vpop.f32.mrb[52].mxu0 }
 0x155   : > { %10405 = vst [vmem:[#allocation26_spill] sm:$0xff] %v8436_v56  ;;  %v8440_v54 = vpop.f32.mrb[53].mxu0 }
 0x156   : > { %10406 = vst [vmem:[#allocation27_spill] sm:$0xff] %v8440_v54  ;;  %v8444_v52 = vpop.f32.mrb[54].mxu0 }
 0x157   : > { %10407 = vst [vmem:[#allocation28_spill] sm:$0xff] %v8444_v52  ;;  %v8448_v50 = vpop.f32.mrb[55].mxu0 }
 0x158   : > { %10408 = vst [vmem:[#allocation29_spill] sm:$0xff] %v8448_v50  ;;  %v7643_v50 = vld [vmem:[%s10336_s3] sm:$0xff]  }
 0x159   : > { %7006 = vmatprep.subr.bf16.mxu1 %v7643_v50 }
 0x15a   : > { %7007 = vmatpush3.bf16.msra.mxu1 %v7643_v50 }
 0x15b   : > { %7008 = vmatprep.subr.bf16.mxu1 %v7644_v40 }
 0x15c   : > { %v8455_v9 = vpop.f32.mrb[56].mxu0 }
 0x15d   : > { %10409 = vst [vmem:[#allocation30_spill] sm:$0xff] %v8455_v9  ;;  %v8462_v46 = vpop.f32.mrb[57].mxu0 }
 0x15e   : > { %10410 = vst [vmem:[#allocation31_spill] sm:$0xff] %v8462_v46  ;;  %v8466_v44 = vpop.f32.mrb[58].mxu0  ;;  %7009 = vmatpush3.bf16.msra.mxu1 %v7644_v40 }
 0x15f   : > { %10411 = vst [vmem:[#allocation32_spill] sm:$0xff] %v8466_v44  ;;  %v8470_v42 = vpop.f32.mrb[59].mxu0  ;;  %7042 = vmatprep.subr.bf16.mxu1 %v8499_v15 }
 0x160   : > { %10412 = vst [vmem:[#allocation33_spill] sm:$0xff] %v8470_v42 }
 0x164   : > { %v8474_v31 = vpop.f32.mrb[60].mxu0 }
 0x165   : > { %10413 = vst [vmem:[#allocation34_spill] sm:$0xff] %v8474_v31  ;;  %v8478_v9 = vpop.f32.mrb[61].mxu0 }
 0x166   : > { %10414 = vst [vmem:[#allocation35_spill] sm:$0xff] %v8478_v9  ;;  %v8482_v46 = vpop.f32.mrb[62].mxu0 }
 0x167   : > { %10415 = vst [vmem:[#allocation36_spill] sm:$0xff] %v8482_v46  ;;  %v8486_v44 = vpop.f32.mrb[63].mxu0 }
 0x168   : > { %10416 = vst [vmem:[#allocation37_spill] sm:$0xff] %v8486_v44 }
 0x16c   : > { %v6908_v21 = vpop.f32.mrb[64].mxu0 }
 0x16d   : > { %v1497_v9 = vpop.f32.mrb[65].mxu0 }
 0x16e   : > { %v6909_v37 = vpop.f32.mrb[66].mxu0 }
 0x16f   : > { %v1500_v48 = vpop.f32.mrb[67].mxu0 }
 0x174   : > { %v6912_v44 = vpop.f32.mrb[68].mxu0 }
 0x175   : > { %v1513_v39 = vpop.f32.mrb[69].mxu0 }
 0x176   : > { %v8502_v50 = vpop.f32.mrb[70].mxu0 }
 0x177   : > { %v8504_v46 = vpop.f32.mrb[71].mxu0 }
 0x17c   : > { %v8506_v38 = vpop.f32.mrb[72].mxu0 }
 0x17d   : > { %v8508_v31 = vpop.f32.mrb[73].mxu0 }
 0x17e   : > { %v8510_v36 = vpop.f32.mrb[74].mxu0 }
 0x17f   : > { %v8512_v40 = vpop.f32.mrb[75].mxu0 }
 0x184   : > { %v8514_v42 = vpop.f32.mrb[76].mxu0 }
 0x185   : > { %v8516_v35 = vpop.f32.mrb[77].mxu0 }
 0x186   : > { %v8518_v34 = vpop.f32.mrb[78].mxu0 }
 0x187   : > { %v8520_v15 = vpop.f32.mrb[79].mxu0 }
 0x18c   : > { %v8522_v33 = vpop.f32.mrb[80].mxu0 }
 0x18d   : > { %v8524_v32 = vpop.f32.mrb[81].mxu0 }
 0x18e   : > { %v8526_v52 = vpop.f32.mrb[82].mxu0 }
 0x18f   : > { %10418 = vst [vmem:[#allocation39_spill] sm:$0xff] %v8526_v52  ;;  %v8528_v30 = vpop.f32.mrb[83].mxu0 }
 0x190   : > { %10419 = vst [vmem:[#allocation40_spill] sm:$0xff] %v8528_v30 }
 0x194   : > { %v8530_v54 = vpop.f32.mrb[84].mxu0 }
 0x195   : > { %10420 = vst [vmem:[#allocation41_spill] sm:$0xff] %v8530_v54  ;;  %v8532_v29 = vpop.f32.mrb[85].mxu0 }
 0x196   : > { %10421 = vst [vmem:[#allocation42_spill] sm:$0xff] %v8532_v29  ;;  %v8534_v56 = vpop.f32.mrb[86].mxu0 }
 0x197   : > { %10422 = vst [vmem:[#allocation43_spill] sm:$0xff] %v8534_v56  ;;  %v8536_v28 = vpop.f32.mrb[87].mxu0 }
 0x198   : > { %10423 = vst [vmem:[#allocation44_spill] sm:$0xff] %v8536_v28 }
 0x19c   : > { %v8538_v58 = vpop.f32.mrb[88].mxu0 }
 0x19d   : > { %10424 = vst [vmem:[#allocation45_spill] sm:$0xff] %v8538_v58  ;;  %v8540_v27 = vpop.f32.mrb[89].mxu0  ;;  %v8557_v58 = vld [vmem:[%s10335_s2] ss:$0 sm:$0xff] }
 0x19e   : > { %10425 = vst [vmem:[#allocation46_spill] sm:$0xff] %v8540_v27  ;;  %v8542_v60 = vpop.f32.mrb[90].mxu0 }
 0x19f   : > { %10426 = vst [vmem:[#allocation47_spill] sm:$0xff] %v8542_v60  ;;  %v8544_v26 = vpop.f32.mrb[91].mxu0 }
 0x1a0   : > { %10427 = vst [vmem:[#allocation48_spill] sm:$0xff] %v8544_v26  ;;  %v10432_v26 = vmax.f32 %v8090_v63, %v8356_v41 }
 0x1a4   : > { %v8546_v62 = vpop.f32.mrb[92].mxu0 }
 0x1a5   : > { %10428 = vst [vmem:[#allocation49_spill] sm:$0xff] %v8546_v62  ;;  %v8548_v24 = vpop.f32.mrb[93].mxu0 }
 0x1a6   : > { %10429 = vst [vmem:[#allocation50_spill] sm:$0xff] %v8548_v24  ;;  %v8550_v30 = vpop.f32.mrb[94].mxu0 }
 0x1a7   : > { %10430 = vst [vmem:[#allocation51_spill] sm:$0xff] %v8550_v30  ;;  %v8552_v54 = vpop.f32.mrb[95].mxu0  ;;  %v10433_v30 = vmax.f32 %v8092_v0, %v8360_v43 }
 0x1a8   : > { %10431 = vst [vmem:[#allocation52_spill] sm:$0xff] %v8552_v54 }
 0x1ac   : > { %v6940_v29 = vpop.f32.mrb[96].mxu0 }
 0x1ad   : > { %v1786_v56 = vmax.f32 %v6908_v21, %v6940_v29  ;;  %v1625_v52 = vpop.f32.mrb[97].mxu0  ;;  %v10434_v21 = vmax.f32 %v8095_v2, %v8364_v45 }
 0x1ae   : > { %v1784_v27 = vmax.f32 %v1497_v9, %v1625_v52  ;;  %v6941_v60 = vpop.f32.mrb[98].mxu0  ;;  %v10435_v9 = vmax.f32 %v8098_v4, %v8368_v47  ;;  %v10436_v4 = vmax.f32 %v8102_v5, %v8372_v49  ;;  %v10439_v49 = vmax.f32 %v8110_v10, %v8384_v55 }
 0x1af   : > { %v1818_v62 = vmax.f32 %v10432_v26, %v1786_v56  ;;  %v1787_v28 = vmax.f32 %v6909_v37, %v6941_v60  ;;  %v1628_v24 = vpop.f32.mrb[99].mxu0  ;;  %v10440_v55 = vmax.f32 %v8114_v11, %v8388_v57 }
 0x1b0   : > { %v1816_v54 = vmax.f32 %v10433_v30, %v1784_v27  ;;  %v1785_v3 = vmax.f32 %v1500_v48, %v1628_v24 }
 0x1b1   : > { %v1857_v29 = vadd.f32 %v8557_v58, %v1818_v62  ;;  %v1819_v23 = vmax.f32 %v10434_v21, %v1787_v28  ;;  %v10438_v62 = vmax.f32 %v8107_v8, %v8380_v53 }
 0x1b2   : > { %v1855_v52 = vadd.f32 %v8557_v58, %v1816_v54  ;;  %v1817_v63 = vmax.f32 %v10435_v9, %v1785_v3 }
 0x1b3   : > { %v1889_v26 = vmax.f32 %v1857_v29, 0.0  ;;  %v1858_v37 = vadd.f32 %v8557_v58, %v1819_v23 }
 0x1b4   : > { %v1887_v41 = vmax.f32 %v1855_v52, 0.0  ;;  %v1856_v0 = vadd.f32 %v8557_v58, %v1817_v63  ;;  %v6944_v27 = vpop.f32.mrb[100].mxu0 }
 0x1b5   : > { %1922 = vst.msk [vmem:[#allocation2 + $0x31] sm:$0xff] %vm442_vm3, %v1889_v26  ;;  %v1890_v24 = vmax.f32 %v1858_v37, 0.0  ;;  %v1790_v30 = vmax.f32 %v6912_v44, %v6944_v27  ;;  %v1641_v43 = vpop.f32.mrb[101].mxu0  ;;  %v10437_v44 = vmax.f32 %v8104_v6, %v8376_v51 }
 0x1b6   : > { %1920 = vst.msk [vmem:[#allocation2 + $0x11] sm:$0xff] %vm442_vm3, %v1887_v41  ;;  %v1888_v2 = vmax.f32 %v1856_v0, 0.0  ;;  %v1788_v28 = vmax.f32 %v1513_v39, %v1641_v43  ;;  %v6945_v45 = vpop.f32.mrb[102].mxu0 }
 0x1b7   : > { %1923 = vst.msk [vmem:[#allocation2 + $0x41] sm:$0xff] %vm442_vm3, %v1890_v24  ;;  %v1822_v23 = vmax.f32 %v10436_v4, %v1790_v30  ;;  %v1791_v47 = vmax.f32 %v8502_v50, %v6945_v45  ;;  %v1644_v54 = vpop.f32.mrb[103].mxu0 }
 0x1b8   : > { %1921 = vst.msk [vmem:[#allocation2 + $0x21] sm:$0xff] %vm442_vm3, %v1888_v2  ;;  %v1820_v56 = vmax.f32 %v10437_v44, %v1788_v28  ;;  %v1789_v60 = vmax.f32 %v8504_v46, %v1644_v54 }
 0x1b9   : > { %v1861_v39 = vadd.f32 %v8557_v58, %v1822_v23  ;;  %v1823_v3 = vmax.f32 %v10438_v62, %v1791_v47 }
 0x1ba   : > { %v1859_v5 = vadd.f32 %v8557_v58, %v1820_v56  ;;  %v1821_v48 = vmax.f32 %v10439_v49, %v1789_v60 }
 0x1bb   : > { %v1893_v50 = vmax.f32 %v1861_v39, 0.0  ;;  %v1862_v29 = vadd.f32 %v8557_v58, %v1823_v3 }
 0x1bc   : > { %v1891_v21 = vmax.f32 %v1859_v5, 0.0  ;;  %v1860_v6 = vadd.f32 %v8557_v58, %v1821_v48  ;;  %v6948_v51 = vpop.f32.mrb[104].mxu0  ;;  %v8615_v24 = vld [vmem:[#allocation2 + $0x31] sm:$0xff]  ;;  %v10445_v5 = vmax.f32 %v8126_v17, %v8404_v7 }
 0x1bd   : > { %1926 = vst.msk [vmem:[#allocation2 + $0x71] sm:$0xff] %vm442_vm3, %v1893_v50  ;;  %v1894_v46 = vmax.f32 %v1862_v29, 0.0  ;;  %v1794_v52 = vmax.f32 %v8506_v38, %v6948_v51  ;;  %v1657_v8 = vpop.f32.mrb[105].mxu0  ;;  %v10441_v38 = vmax.f32 %v8116_v12, %v8392_v59  ;;  %v8617_v30 = vld [vmem:[#allocation2 + $0x32] sm:$0xff] }
 0x1be   : > { %1924 = vst.msk [vmem:[#allocation2 + $0x51] sm:$0xff] %vm442_vm3, %v1891_v21  ;;  %v1892_v53 = vmax.f32 %v1860_v6, 0.0  ;;  %v1792_v9 = vmax.f32 %v8508_v31, %v1657_v8  ;;  %v6949_v10 = vpop.f32.mrb[106].mxu0  ;;  %v8635_v23 = vld [vmem:[#allocation2 + $0x41] sm:$0xff]  ;;  %v10446_v21 = vmax.f32 %v8128_v18, %v8408_v13  ;;  %v10449_v18 = vmax.f32 %v8134_v22, %v8416_v25 }
 0x1bf   : > { %1927 = vst.msk [vmem:[#allocation2 + $0x81] sm:$0xff] %vm442_vm3, %v1894_v46  ;;  %v1826_v63 = vmax.f32 %v10440_v55, %v1794_v52  ;;  %v1795_v26 = vmax.f32 %v8510_v36, %v6949_v10  ;;  %v1660_v37 = vpop.f32.mrb[107].mxu0  ;;  %v8606_v41 = vld [vmem:[#allocation2 + $0x21] sm:$0xff]  ;;  %v10442_v36 = vmax.f32 %v8119_v14, %v8396_v61 }
 0x1c0   : > { %v8608_v0 = vld [vmem:[#allocation2 + $0x22] sm:$0xff]  ;;  %1925 = vst.msk [vmem:[#allocation2 + $0x61] sm:$0xff] %vm442_vm3, %v1892_v53  ;;  %v1824_v31 = vmax.f32 %v10441_v38, %v1792_v9  ;;  %v1793_v27 = vmax.f32 %v8512_v40, %v1660_v37  ;;  %v8625_v43 = vpack.c.bf16 %v8615_v24, %v8606_v41  ;;  %v10443_v40 = vmax.f32 %v8122_v16, %v8400_v1 }
 0x1c1   : > { %v1865_v11 = vadd.f32 %v8557_v58, %v1826_v63  ;;  %v1827_v57 = vmax.f32 %v10442_v36, %v1795_v26  ;;  %v8641_v60 = vld [vmem:[#allocation2 + $0x42] sm:$0xff] }
 0x1c2   : > { %v1863_v59 = vadd.f32 %v8557_v58, %v1824_v31  ;;  %v1825_v2 = vmax.f32 %v10443_v40, %v1793_v27  ;;  %v10450_v31 = vld [vmem:[#allocation6_spill] sm:$0xff] }
 0x1c3   : > { %v1897_v28 = vmax.f32 %v1865_v11, 0.0  ;;  %v1866_v45 = vadd.f32 %v8557_v58, %v1827_v57  ;;  %v10451_v27 = vld [vmem:[#allocation22_spill] sm:$0xff]  ;;  %v10453_v57 = vld [vmem:[#allocation39_spill] sm:$0xff] }
 0x1c4   : > { %v1895_v4 = vmax.f32 %v1863_v59, 0.0  ;;  %v1864_v14 = vadd.f32 %v8557_v58, %v1825_v2  ;;  %v6952_v61 = vpop.f32.mrb[108].mxu0  ;;  %v8667_v46 = vld [vmem:[#allocation2 + $0x71] sm:$0xff]  ;;  %v10452_v11 = vmax.f32 %v10450_v31, %v10451_v27 }
 0x1c5   : > { %1931 = vst.msk [vmem:[#allocation2 + $0xd1] sm:$0xff] %vm442_vm3, %v1897_v28  ;;  %v1898_v47 = vmax.f32 %v1866_v45, 0.0  ;;  %v1798_v54 = vmax.f32 %v8514_v42, %v6952_v61  ;;  %v1673_v44 = vpop.f32.mrb[109].mxu0  ;;  %v8639_v56 = vld [vmem:[#allocation2 + $0x51] sm:$0xff] }
 0x1c6   : > { %v8643_v16 = vld [vmem:[#allocation2 + $0x52] sm:$0xff]  ;;  %1929 = vst.msk [vmem:[#allocation2 + $0xb1] sm:$0xff] %vm442_vm3, %v1895_v4  ;;  %v1896_v1 = vmax.f32 %v1864_v14, 0.0  ;;  %v1796_v39 = vmax.f32 %v8516_v35, %v1673_v44  ;;  %v6953_v62 = vpop.f32.mrb[110].mxu0  ;;  %v8649_v3 = vpack.c.bf16 %v8639_v56, %v8635_v23  ;;  %v10455_v45 = vld [vmem:[#allocation23_spill] sm:$0xff] }
 0x1c7   : > { %1932 = vst.msk [vmem:[#allocation2 + $0xe1] sm:$0xff] %vm442_vm3, %v1898_v47  ;;  %v1830_v49 = vmax.f32 %v10445_v5, %v1798_v54  ;;  %v1799_v48 = vmax.f32 %v8518_v34, %v6953_v62  ;;  %v1676_v50 = vpop.f32.mrb[111].mxu0  ;;  %v8658_v29 = vld [vmem:[#allocation2 + $0x61] sm:$0xff]  ;;  %v10447_v34 = vmax.f32 %v8131_v20, %v8412_v19  ;;  %v8673_v52 = vld [vmem:[#allocation2 + $0x72] sm:$0xff] }
 0x1c8   : > { %10444 = vst [vmem:[#allocation53_spill] sm:$0xff] %v8649_v3  ;;  %v8660_v35 = vld [vmem:[#allocation2 + $0x62] sm:$0xff]  ;;  %1930 = vst.msk [vmem:[#allocation2 + $0xc1] sm:$0xff] %vm442_vm3, %v1896_v1  ;;  %v1828_v6 = vmax.f32 %v10446_v21, %v1796_v39  ;;  %v1797_v51 = vmax.f32 %v8520_v15, %v1676_v50  ;;  %v8677_v8 = vpack.c.bf16 %v8667_v46, %v8658_v29  ;;  %v10457_v14 = vld [vmem:[#allocation40_spill] sm:$0xff] }
 0x1c9   : > { %v1869_v17 = vadd.f32 %v8557_v58, %v1830_v49  ;;  %v1831_v7 = vmax.f32 %v10447_v34, %v1799_v48  ;;  %v10458_v1 = vld [vmem:[#allocation8_spill] sm:$0xff]  ;;  %v10462_v21 = vld [vmem:[#allocation9_spill] sm:$0xff] }
 0x1ca   : > { %10448 = vst [vmem:[#allocation54_spill] sm:$0xff] %v8677_v8  ;;  %v1867_v53 = vadd.f32 %v8557_v58, %v1828_v6  ;;  %v1829_v13 = vmax.f32 %v10449_v18, %v1797_v51  ;;  %v10459_v39 = vld [vmem:[#allocation24_spill] sm:$0xff]  ;;  %v10463_v6 = vld [vmem:[#allocation25_spill] sm:$0xff] }
 0x1cb   : > { %v1901_v9 = vmax.f32 %v1869_v17, 0.0  ;;  %v1870_v10 = vadd.f32 %v8557_v58, %v1831_v7  ;;  %v10460_v62 = vmax.f32 %v10458_v1, %v10459_v39  ;;  %v10464_v51 = vmax.f32 %v10462_v21, %v10463_v6  ;;  %v10476_v6 = vld [vmem:[#allocation12_spill] sm:$0xff] }
 0x1cc   : > { %v1899_v20 = vmax.f32 %v1867_v53, 0.0  ;;  %v1868_v19 = vadd.f32 %v8557_v58, %v1829_v13  ;;  %v6956_v55 = vpop.f32.mrb[112].mxu0  ;;  %v8705_v47 = vld [vmem:[#allocation2 + $0xd1] sm:$0xff] }
 0x1cd   : > { %1935 = vst.msk [vmem:[#allocation2 + $0x111] sm:$0xff] %vm442_vm3, %v1901_v9  ;;  %v1902_v63 = vmax.f32 %v1870_v10, 0.0  ;;  %v1802_v26 = vmax.f32 %v8522_v33, %v6956_v55  ;;  %v1689_v37 = vpop.f32.mrb[113].mxu0  ;;  %v10454_v33 = vld [vmem:[#allocation7_spill] sm:$0xff] }
 0x1ce   : > { %1933 = vst.msk [vmem:[#allocation2 + $0xf1] sm:$0xff] %vm442_vm3, %v1899_v20  ;;  %v1900_v22 = vmax.f32 %v1868_v19, 0.0  ;;  %v1800_v25 = vmax.f32 %v8524_v32, %v1689_v37  ;;  %v6957_v38 = vpop.f32.mrb[114].mxu0  ;;  %v10456_v4 = vmax.f32 %v10454_v33, %v10455_v45  ;;  %v8707_v54 = vld [vmem:[#allocation2 + $0xd0] sm:$0xff]  ;;  %v8725_v9 = vld [vmem:[#allocation2 + $0xe1] sm:$0xff] }
 0x1cf   : > { %1936 = vst.msk [vmem:[#allocation2 + $0x121] sm:$0xff] %vm442_vm3, %v1902_v63  ;;  %v1834_v36 = vmax.f32 %v10452_v11, %v1802_v26  ;;  %v1803_v59 = vmax.f32 %v10453_v57, %v6957_v38  ;;  %v1692_v40 = vpop.f32.mrb[115].mxu0  ;;  %v8696_v2 = vld [vmem:[#allocation2 + $0xc1] sm:$0xff]  ;;  %v10471_v33 = vld [vmem:[#allocation43_spill] sm:$0xff] }
 0x1d0   : > { %v8698_v28 = vld [vmem:[#allocation2 + $0xc0] sm:$0xff]  ;;  %1934 = vst.msk [vmem:[#allocation2 + $0x101] sm:$0xff] %vm442_vm3, %v1900_v22  ;;  %v1832_v32 = vmax.f32 %v10456_v4, %v1800_v25  ;;  %v1801_v61 = vmax.f32 %v10457_v14, %v1692_v40  ;;  %v8717_v48 = vpack.c.bf16 %v8705_v47, %v8696_v2  ;;  %v1981_v8 = vld [vmem:[#allocation2 + $0x11] sm:$0xff] }
 0x1d1   : > { %v1873_v44 = vadd.f32 %v8557_v58, %v1834_v36  ;;  %v1835_v5 = vmax.f32 %v10460_v62, %v1803_v59  ;;  %v10465_v20 = vld [vmem:[#allocation41_spill] sm:$0xff]  ;;  %v10466_v25 = vld [vmem:[#allocation42_spill] sm:$0xff]  ;;  %v10475_v62 = vld [vmem:[#allocation44_spill] sm:$0xff] }
 0x1d2   : > { %10461 = vst [vmem:[#allocation6_spill] sm:$0xff] %v8717_v48  ;;  %v1871_v50 = vadd.f32 %v8557_v58, %v1832_v32  ;;  %v1833_v17 = vmax.f32 %v10464_v51, %v1801_v61  ;;  %v8729_v63 = vld [vmem:[#allocation2 + $0xe0] sm:$0xff]  ;;  %v10472_v61 = vld [vmem:[#allocation11_spill] sm:$0xff]  ;;  %v10477_v51 = vld [vmem:[#allocation28_spill] sm:$0xff] }
 0x1d3   : > { %v1905_v34 = vmax.f32 %v1873_v44, 0.0  ;;  %v1874_v7 = vadd.f32 %v8557_v58, %v1835_v5  ;;  %v10468_v36 = vld [vmem:[#allocation10_spill] sm:$0xff]  ;;  %v10473_v44 = vld [vmem:[#allocation27_spill] sm:$0xff] }
 0x1d4   : > { %v1903_v53 = vmax.f32 %v1871_v50, 0.0  ;;  %v1872_v18 = vadd.f32 %v8557_v58, %v1833_v17  ;;  %v6960_v13 = vpop.f32.mrb[116].mxu0  ;;  %v10469_v57 = vld [vmem:[#allocation26_spill] sm:$0xff]  ;;  %v10474_v1 = vmax.f32 %v10472_v61, %v10473_v44  ;;  %v8757_v50 = vld [vmem:[#allocation2 + $0x110] sm:$0xff]  ;;  %v10478_v17 = vmax.f32 %v10476_v6, %v10477_v51 }
 0x1d5   : > { %1940 = vst.msk [vmem:[#allocation2 + $0x171] sm:$0xff] %vm442_vm3, %v1905_v34  ;;  %v1906_v10 = vmax.f32 %v1874_v7, 0.0  ;;  %v1806_v19 = vmax.f32 %v10465_v20, %v6960_v13  ;;  %v1705_v55 = vpop.f32.mrb[117].mxu0  ;;  %v8731_v26 = vld [vmem:[#allocation2 + $0xf1] sm:$0xff]  ;;  %v10470_v59 = vmax.f32 %v10468_v36, %v10469_v57  ;;  %v10479_v13 = vld [vmem:[#allocation13_spill] sm:$0xff] }
 0x1d6   : > { %v8733_v37 = vld [vmem:[#allocation2 + $0xf0] sm:$0xff]  ;;  %1938 = vst.msk [vmem:[#allocation2 + $0x151] sm:$0xff] %vm442_vm3, %v1903_v53  ;;  %v1904_v22 = vmax.f32 %v1872_v18, 0.0  ;;  %v1804_v38 = vmax.f32 %v10466_v25, %v1705_v55  ;;  %v6961_v31 = vpop.f32.mrb[118].mxu0  ;;  %v8741_v11 = vpack.c.bf16 %v8731_v26, %v8725_v9 }
 0x1d7   : > { %1941 = vst.msk [vmem:[#allocation2 + $0x181] sm:$0xff] %vm442_vm3, %v1906_v10  ;;  %v1838_v40 = vmax.f32 %v10470_v59, %v1806_v19  ;;  %v1807_v45 = vmax.f32 %v10471_v33, %v6961_v31  ;;  %v1708_v4 = vpop.f32.mrb[119].mxu0  ;;  %v8748_v32 = vld [vmem:[#allocation2 + $0x101] sm:$0xff]  ;;  %v8763_v7 = vld [vmem:[#allocation2 + $0x111] sm:$0xff] }
 0x1d8   : > { %10467 = vst [vmem:[#allocation22_spill] sm:$0xff] %v8741_v11  ;;  %v8750_v14 = vld [vmem:[#allocation2 + $0x100] sm:$0xff]  ;;  %1939 = vst.msk [vmem:[#allocation2 + $0x161] sm:$0xff] %vm442_vm3, %v1904_v22  ;;  %v1836_v39 = vmax.f32 %v10474_v1, %v1804_v38  ;;  %v1805_v5 = vmax.f32 %v10475_v62, %v1708_v4  ;;  %v8773_v55 = vpack.c.bf16 %v8763_v7, %v8748_v32 }
 0x1d9   : > { %v1877_v21 = vadd.f32 %v8557_v58, %v1838_v40  ;;  %v1839_v34 = vmax.f32 %v10478_v17, %v1807_v45  ;;  %v10480_v10 = vld [vmem:[#allocation29_spill] sm:$0xff]  ;;  %v10484_v1 = vld [vmem:[#allocation46_spill] sm:$0xff] }
 0x1da   : > { %v1875_v18 = vadd.f32 %v8557_v58, %v1836_v39  ;;  %v10481_v20 = vmax.f32 %v10479_v13, %v10480_v10  ;;  %10482 = vst [vmem:[#allocation39_spill] sm:$0xff] %v8773_v55  ;;  %v1965_v38 = vld [vmem:[#allocation2 + $0x141] sm:$0xff]  ;;  %v10488_v10 = vld [vmem:[#allocation47_spill] sm:$0xff] }
 0x1db   : > { %v1909_v22 = vmax.f32 %v1877_v21, 0.0  ;;  %v1878_v25 = vadd.f32 %v8557_v58, %v1839_v34  ;;  %v10483_v40 = vld [vmem:[#allocation45_spill] sm:$0xff]  ;;  %v10485_v17 = vld [vmem:[#allocation14_spill] sm:$0xff] }
 0x1dc   : > { %v1837_v19 = vmax.f32 %v10481_v20, %v1805_v5  ;;  %v1907_v31 = vmax.f32 %v1875_v18, 0.0  ;;  %v6964_v57 = vpop.f32.mrb[120].mxu0  ;;  %v1968_v61 = vld [vmem:[#allocation2 + $0x171] sm:$0xff]  ;;  %v10486_v34 = vld [vmem:[#allocation30_spill] sm:$0xff] }
 0x1dd   : > { %1944 = vst.msk [vmem:[#allocation2 + $0x1b1] sm:$0xff] %vm442_vm3, %v1909_v22  ;;  %v1910_v59 = vmax.f32 %v1878_v25, 0.0  ;;  %v1810_v33 = vmax.f32 %v10483_v40, %v6964_v57  ;;  %v1721_v45 = vpop.f32.mrb[121].mxu0  ;;  %v1966_v4 = vld [vmem:[#allocation2 + $0x151] sm:$0xff]  ;;  %v10487_v18 = vmax.f32 %v10485_v17, %v10486_v34 }
 0x1de   : > { %v1876_v36 = vadd.f32 %v8557_v58, %v1837_v19  ;;  %1942 = vst.msk [vmem:[#allocation2 + $0x191] sm:$0xff] %vm442_vm3, %v1907_v31  ;;  %v1808_v39 = vmax.f32 %v10484_v1, %v1721_v45  ;;  %v6965_v62 = vpop.f32.mrb[122].mxu0  ;;  %v8781_v5 = vpack.c.bf16 %v1966_v4, %v1965_v38  ;;  %v1969_v21 = vld [vmem:[#allocation2 + $0x181] sm:$0xff]  ;;  %v8783_v6 = vld [vmem:[#allocation2 + $0x172] sm:$0xff]  ;;  %v10490_v57 = vld [vmem:[#allocation31_spill] sm:$0xff] }
 0x1df   : > { %v8785_v51 = vld [vmem:[#allocation2 + $0x182] sm:$0xff]  ;;  %1945 = vst.msk [vmem:[#allocation2 + $0x1c1] sm:$0xff] %vm442_vm3, %v1910_v59  ;;  %v1842_v13 = vmax.f32 %v10487_v18, %v1810_v33  ;;  %v1811_v20 = vmax.f32 %v10488_v10, %v6965_v62  ;;  %v1724_v19 = vpop.f32.mrb[123].mxu0  ;;  %v8794_v31 = vpack.c.bf16 %v1969_v21, %v1968_v61  ;;  %v10492_v45 = vld [vmem:[#allocation48_spill] sm:$0xff] }
 0x1e0   : > { %v1908_v44 = vmax.f32 %v1876_v36, 0.0  ;;  %v1967_v22 = vld [vmem:[#allocation2 + $0x161] sm:$0xff]  ;;  %v8798_v38 = vpack.c.bf16 %v8785_v51, %v8783_v6  ;;  %v10489_v36 = vld [vmem:[#allocation15_spill] sm:$0xff]  ;;  %v1809_v33 = vmax.f32 %v10492_v45, %v1724_v19  ;;  %6974 = vmatprep.mubr.msk.bf16.mxu0 %vm442_vm3, %v8781_v5  ;;  %v8809_v62 = vld [vmem:[#allocation2 + $0x152] sm:$0xff] }
 0x1e1   : > { %v8792_v25 = vld [vmem:[#allocation2 + $0x162] sm:$0xff]  ;;  %v10491_v59 = vmax.f32 %v10489_v36, %v10490_v57  ;;  %v8807_v1 = vpack.c.bf16 %v1968_v61, %v1967_v22  ;;  %v1881_v17 = vadd.f32 %v8557_v58, %v1842_v13  ;;  %v10493_v34 = vld [vmem:[#allocation16_spill] sm:$0xff]  ;;  %v10496_v36 = vld [vmem:[#allocation17_spill] sm:$0xff] }
 0x1e2   : > { %1943 = vst.msk [vmem:[#allocation2 + $0x1a1] sm:$0xff] %vm442_vm3, %v1908_v44  ;;  %v10494_v18 = vld [vmem:[#allocation32_spill] sm:$0xff]  ;;  %v8815_v44 = vpack.c.bf16 %v1967_v22, %v1966_v4  ;;  %v10497_v57 = vld [vmem:[#allocation33_spill] sm:$0xff] }
 0x1e3   : > { %v1840_v40 = vmax.f32 %v10491_v59, %v1808_v39  ;;  %v10495_v10 = vmax.f32 %v10493_v34, %v10494_v18  ;;  %v8819_v39 = vpack.c.bf16 %v8792_v25, %v8809_v62  ;;  %v10498_v61 = vmax.f32 %v10496_v36, %v10497_v57  ;;  %6975 = vmatmul.mubr.msk.bf16.vlgmr.msra.gmra.mrb[128].mxu0 %vm442_vm3, %v8807_v1  ;;  %v10499_v18 = vld [vmem:[#allocation49_spill] sm:$0xff]  ;;  %v10500_v36 = vld [vmem:[#allocation50_spill] sm:$0xff] }
 0x1e4   : > { %v1913_v13 = vmax.f32 %v1881_v17, 0.0 }
 0x1e5   : > { %v1843_v15 = vmax.f32 %v10495_v10, %v1811_v20  ;;  %v1879_v19 = vadd.f32 %v8557_v58, %v1840_v40  ;;  %v1841_v59 = vmax.f32 %v10498_v61, %v1809_v33  ;;  %v6968_v20 = vpop.f32.mrb[124].mxu0  ;;  %v1970_v42 = vld [vmem:[#allocation2 + $0x191] sm:$0xff] }
 0x1e6   : > { %1949 = vst.msk [vmem:[#allocation2 + $0x211] sm:$0xff] %vm442_vm3, %v1913_v13  ;;  %v1814_v10 = vmax.f32 %v10499_v18, %v6968_v20  ;;  %v1737_v40 = vpop.f32.mrb[125].mxu0  ;;  %v8833_v17 = vpack.c.bf16 %v1970_v42, %v1969_v21  ;;  %v10504_v13 = vld [vmem:[#allocation51_spill] sm:$0xff] }
 0x1e7   : > { %v1882_v45 = vadd.f32 %v8557_v58, %v1843_v15  ;;  %v1911_v34 = vmax.f32 %v1879_v19, 0.0  ;;  %v1880_v4 = vadd.f32 %v8557_v58, %v1841_v59  ;;  %v1812_v57 = vmax.f32 %v10500_v36, %v1737_v40  ;;  %v6969_v61 = vpop.f32.mrb[126].mxu0  ;;  %v10501_v15 = vld [vmem:[#allocation18_spill] sm:$0xff]  ;;  %v8840_v18 = vld [vmem:[#allocation2 + $0x1b1] sm:$0xff] }
 0x1e8   : > { %v10502_v19 = vld [vmem:[#allocation34_spill] sm:$0xff]  ;;  %v1740_v53 = vpop.f32.mrb[127].mxu0  ;;  %v10508_v36 = vld [vmem:[#allocation52_spill] sm:$0xff]  ;;  %6978 = vmatprep.mubr.msk.bf16.mxu0 %vm442_vm3, %v8833_v17 }
 0x1e9   : > { %v1914_v22 = vmax.f32 %v1882_v45, 0.0  ;;  %1947 = vst.msk [vmem:[#allocation2 + $0x1f1] sm:$0xff] %vm442_vm3, %v1911_v34  ;;  %v1912_v33 = vmax.f32 %v1880_v4, 0.0  ;;  %v10503_v59 = vmax.f32 %v10501_v15, %v10502_v19  ;;  %v1815_v45 = vmax.f32 %v10504_v13, %v6969_v61  ;;  %v1971_v20 = vld [vmem:[#allocation2 + $0x1a1] sm:$0xff]  ;;  %v10505_v34 = vld [vmem:[#allocation19_spill] sm:$0xff]  ;;  %v8854_v61 = vld [vmem:[#allocation2 + $0x192] sm:$0xff] }
 0x1ea   : > { %v8842_v27 = vld [vmem:[#allocation2 + $0x1a2] sm:$0xff]  ;;  %v10506_v4 = vld [vmem:[#allocation35_spill] sm:$0xff]  ;;  %v10509_v19 = vld [vmem:[#allocation20_spill] sm:$0xff]  ;;  %v8860_v49 = vpack.c.bf16 %v1971_v20, %v1970_v42 }
 0x1eb   : > { %1950 = vst.msk [vmem:[#allocation2 + $0x221] sm:$0xff] %vm442_vm3, %v1914_v22  ;;  %v1846_v12 = vmax.f32 %v10503_v59, %v1814_v10  ;;  %1948 = vst.msk [vmem:[#allocation2 + $0x201] sm:$0xff] %vm442_vm3, %v1912_v33  ;;  %v10507_v21 = vmax.f32 %v10505_v34, %v10506_v4  ;;  %v1813_v22 = vmax.f32 %v10508_v36, %v1740_v53  ;;  %v10510_v59 = vld [vmem:[#allocation36_spill] sm:$0xff]  ;;  %v10512_v34 = vld [vmem:[#allocation21_spill] sm:$0xff] }
 0x1ec   : > { %v8852_v10 = vpack.c.bf16 %v8840_v18, %v1971_v20  ;;  %v10511_v13 = vmax.f32 %v10509_v19, %v10510_v59  ;;  %v10513_v4 = vld [vmem:[#allocation37_spill] sm:$0xff] }
 0x1ed   : > { %v1844_v40 = vmax.f32 %v10507_v21, %v1812_v57  ;;  %v1885_v15 = vadd.f32 %v8557_v58, %v1846_v12  ;;  %v8864_v57 = vpack.c.bf16 %v8842_v27, %v8854_v61  ;;  %v10514_v21 = vmax.f32 %v10512_v34, %v10513_v4  ;;  %v2009_v19 = vld [vmem:[#allocation2 + $0x1e1] sm:$0xff]  ;;  %v2012_v11 = vld [vmem:[#allocation2 + $0x211] sm:$0xff] }
 0x1ee   : > { %v1847_v33 = vmax.f32 %v10511_v13, %v1815_v45  ;;  %6979 = vmatmul.mubr.msk.bf16.gmra.mrb[132].mxu0 %vm442_vm3, %v8852_v10  ;;  %v1956_v45 = vld [vmem:[#allocation2 + $0x1e0] sm:$0xff] }
 0x1ef   : > { %v1883_v53 = vadd.f32 %v8557_v58, %v1844_v40  ;;  %v1845_v36 = vmax.f32 %v10514_v21, %v1813_v22  ;;  %v1917_v12 = vmax.f32 %v1885_v15, 0.0  ;;  %v1959_v15 = vld [vmem:[#allocation2 + $0x210] sm:$0xff] }
 0x1f0   : > { %v1886_v55 = vadd.f32 %v8557_v58, %v1847_v33  ;;  %v2010_v13 = vld [vmem:[#allocation2 + $0x1f1] sm:$0xff] }
 0x1f1   : > { %v1915_v42 = vmax.f32 %v1883_v53, 0.0  ;;  %v1884_v20 = vadd.f32 %v8557_v58, %v1845_v36  ;;  %1953 = vst.msk [vmem:[#allocation2 + $0x251] sm:$0xff] %vm442_vm3, %v1917_v12  ;;  %v1957_v40 = vld [vmem:[#allocation2 + $0x1f0] sm:$0xff]  ;;  %v8876_v34 = vpack.c.bf16 %v2010_v13, %v2009_v19  ;;  %v7646_v19 = vld [vmem:[%s10336_s3 + $0x28] sm:$0xff]  }
 0x1f2   : > { %v1918_v59 = vmax.f32 %v1886_v55, 0.0  ;;  %v1989_v4 = vpack.c.bf16 %v1957_v40, %v1956_v45  ;;  %v2013_v21 = vld [vmem:[#allocation2 + $0x221] sm:$0xff] }
 0x1f3   : > { %1951 = vst.msk [vmem:[#allocation2 + $0x231] sm:$0xff] %vm442_vm3, %v1915_v42  ;;  %v1916_v22 = vmax.f32 %v1884_v20, 0.0  ;;  %v1960_v33 = vld [vmem:[#allocation2 + $0x220] sm:$0xff]  ;;  %v8881_v36 = vpack.c.bf16 %v2013_v21, %v2012_v11  ;;  %6982 = vmatprep.mubr.msk.bf16.mxu0 %vm442_vm3, %v8876_v34 }
 0x1f4   : > { %1954 = vst.msk [vmem:[#allocation2 + $0x261] sm:$0xff] %vm442_vm3, %v1918_v59  ;;  %v2011_v53 = vld [vmem:[#allocation2 + $0x201] sm:$0xff]  ;;  %v8879_v58 = vpack.c.bf16 %v1960_v33, %v1959_v15  ;;  %7010 = vmatprep.mubr.msk.bf16.mxu1 %vm442_vm3, %v1989_v4 }
 0x1f5   : > { %v1958_v48 = vld [vmem:[#allocation2 + $0x200] sm:$0xff]  ;;  %1952 = vst.msk [vmem:[#allocation2 + $0x241] sm:$0xff] %vm442_vm3, %v1916_v22  ;;  %v8887_v55 = vpack.c.bf16 %v2012_v11, %v2011_v53  ;;  %v8894_v42 = vpack.c.bf16 %v2011_v53, %v2010_v13  ;;  %v7647_v22 = vld [vmem:[%s10336_s3 + $0x30] sm:$0xff]  }
 0x1f6   : > { %v1990_v12 = vpack.c.bf16 %v1959_v15, %v1958_v48  ;;  %v8892_v45 = vpack.c.bf16 %v1958_v48, %v1957_v40  ;;  %v10515_v20 = vld [vmem:[#allocation38_spill] sm:$0xff] }
 0x1f7   : > { %6983 = vmatmul.mubr.msk.bf16.gmra.mrb[136].mxu0 %vm442_vm3, %v8887_v55 }
 0x1f8   : > { %7011 = vmatmul.mubr.msk.bf16.vlgmr.msra.gmra.mrb[0].mxu1 %vm442_vm3, %v1990_v12  ;;  %v8903_v48 = vld [vmem:[#allocation2 + $0x251] sm:$0xff] }
 0x1f9   : > { %7043 = vmatpush3.bf16.msra.mxu1 %v10515_v20  ;;  %v8905_v53 = vld [vmem:[#allocation2 + $0x250] sm:$0xff] }
 0x1fa   : > { %7044 = vmatprep.subr.bf16.mxu1 %v7646_v19  ;;  %v2014_v59 = vld [vmem:[#allocation2 + $0x231] sm:$0xff] }
 0x1fb   : > { %v1961_v11 = vld [vmem:[#allocation2 + $0x230] sm:$0xff]  ;;  %v2027_v4 = vpack.c.bf16 %v2014_v59, %v2013_v21  ;;  %v8914_v21 = vpack.c.bf16 %v8606_v41, %v1981_v8  ;;  %v8930_v41 = vpack.c.bf16 %v8658_v29, %v8639_v56  ;;  %v8940_v8 = vld [vmem:[#allocation2 + $0x81] sm:$0xff] }
 0x1fc   : > { %v1991_v15 = vpack.c.bf16 %v1961_v11, %v1960_v33  ;;  %v2015_v13 = vld [vmem:[#allocation2 + $0x241] sm:$0xff]  ;;  %v1973_v56 = vld [vmem:[#allocation2 + $0xb0] sm:$0xff] }
 0x1fd   : > { %v1962_v40 = vld [vmem:[#allocation2 + $0x240] sm:$0xff]  ;;  %7045 = vmatpush3.bf16.msra.mxu1 %v7646_v19  ;;  %6986 = vmatprep.mubr.msk.bf16.mxu0 %vm442_vm3, %v2027_v4  ;;  %v2028_v12 = vpack.c.bf16 %v8903_v48, %v2015_v13  ;;  %v8916_v33 = vpack.c.bf16 %v2015_v13, %v2014_v59  ;;  %v8926_v19 = vpack.c.bf16 %v8635_v23, %v8615_v24  ;;  %v2017_v23 = vld [vmem:[#allocation2 + $0xb1] sm:$0xff] }
 0x1fe   : > { %7014 = vmatprep.mubr.msk.bf16.mxu1 %vm442_vm3, %v1991_v15  ;;  %v1992_v20 = vpack.c.bf16 %v8905_v53, %v1962_v40  ;;  %v8911_v3 = vpack.c.bf16 %v1962_v40, %v1961_v11  ;;  %7078 = vmatprep.subr.bf16.mxu1 %v7647_v22  ;;  %v8944_v24 = vpack.c.bf16 %v8940_v8, %v8667_v46  ;;  %v2456_v59 = vld [vmem:[#allocation2 + $0x142] sm:$0xff]  ;;  %v7651_v13 = vld [vmem:[%s10336_s3 + $0x50] sm:$0xff]  }
 0x1ff   : > { %6987 = vmatmul.mubr.msk.bf16.gmra.mrb[140].mxu0 %vm442_vm3, %v2028_v12  ;;  %v8947_v29 = vpack.c.bf16 %v8696_v2, %v2017_v23  ;;  %v8959_v46 = vpack.c.bf16 %v8725_v9, %v8705_v47  ;;  %v1998_v2 = vpack.c.bf16 %v8729_v63, %v8707_v54  ;;  %v8975_v47 = vld [vmem:[#allocation2 + $0x121] sm:$0xff]  ;;  %v2474_v11 = vpack.c.bf16 %v8854_v61, %v8785_v51 }
 0x200   : > { %7015 = vmatmul.mubr.msk.bf16.gmra.mrb[4].mxu1 %vm442_vm3, %v1992_v20  ;;  %6990 = vmatprep.mubr.msk.bf16.mxu0 %vm442_vm3, %v8914_v21  ;;  %v8977_v9 = vld [vmem:[#allocation2 + $0x120] sm:$0xff]  ;;  %v7650_v15 = vld [vmem:[%s10336_s3 + $0x48] sm:$0xff]  }
 0x201   : > { %7018 = vmatprep.mubr.msk.bf16.mxu1 %vm442_vm3, %v8781_v5  ;;  %v1997_v5 = vpack.c.bf16 %v8698_v28, %v1973_v56  ;;  %v2721_v40 = vld [vmem:[#allocation2 + $0x260] sm:$0xff] }
 0x202   : > { %v2729_v20 = vld [vmem:[#allocation2 + $0x1c1] sm:$0xff] }
 0x203   : > { %v9090_v23 = vpack.c.bf16 %v2729_v20, %v8840_v18  ;;  %v7653_v18 = vld [vmem:[%s10336_s3 + $0x60] sm:$0xff]  }
 0x207   : > { %6991 = vmatmul.mubr.msk.bf16.gmra.mrb[144].mxu0 %vm442_vm3, %v8926_v19 }
 0x208   : > { %7019 = vmatmul.mubr.msk.bf16.gmra.mrb[8].mxu1 %vm442_vm3, %v8807_v1  ;;  %6994 = vmatprep.mubr.msk.bf16.mxu0 %vm442_vm3, %v8930_v41  ;;  %v8965_v1 = vpack.c.bf16 %v8748_v32, %v8731_v26  ;;  %v8981_v26 = vpack.c.bf16 %v8975_v47, %v8763_v7  ;;  %v2000_v32 = vpack.c.bf16 %v8977_v9, %v8757_v50  ;;  %v7648_v7 = vld [vmem:[%s10336_s3 + $0x38] sm:$0xff]  }
 0x209   : > { %7022 = vmatprep.mubr.msk.bf16.mxu1 %vm442_vm3, %v8833_v17  ;;  %v1999_v17 = vpack.c.bf16 %v8750_v14, %v8733_v37 }
 0x20f   : > { %6995 = vmatmul.mubr.msk.bf16.gmra.mrb[148].mxu0 %vm442_vm3, %v8944_v24 }
 0x210   : > { %7023 = vmatmul.mubr.msk.bf16.gmra.mrb[12].mxu1 %vm442_vm3, %v8852_v10  ;;  %6998 = vmatprep.mubr.msk.bf16.mxu0 %vm442_vm3, %v8947_v29  ;;  %v7649_v10 = vld [vmem:[%s10336_s3 + $0x40] sm:$0xff]  }
 0x211   : > { %7026 = vmatprep.mubr.msk.bf16.mxu1 %vm442_vm3, %v1997_v5 }
 0x217   : > { %6999 = vmatmul.mubr.msk.bf16.gmra.mrb[152].mxu0 %vm442_vm3, %v8959_v46 }
 0x218   : > { %7027 = vmatmul.mubr.msk.bf16.gmra.mrb[16].mxu1 %vm442_vm3, %v1998_v2  ;;  %7002 = vmatprep.mubr.msk.bf16.mxu0 %vm442_vm3, %v8965_v1 }
 0x219   : > { %7030 = vmatprep.mubr.msk.bf16.mxu1 %vm442_vm3, %v1999_v17 }
 0x21f   : > { %7003 = vmatmul.mubr.msk.bf16.gmra.mrb[156].mxu0 %vm442_vm3, %v8981_v26 }
 0x220   : > { %7031 = vmatmul.mubr.msk.bf16.gmra.mrb[20].mxu1 %vm442_vm3, %v2000_v32 }
 0x221   : > { %7034 = vmatprep.mubr.msk.bf16.mxu1 %vm442_vm3, %v8914_v21 }
 0x228   : > { %7035 = vmatmul.mubr.msk.bf16.gmra.mrb[24].mxu1 %vm442_vm3, %v8926_v19 }
 0x229   : > { %7038 = vmatprep.mubr.msk.bf16.mxu1 %vm442_vm3, %v8930_v41 }
 0x230   : > { %7039 = vmatmul.mubr.msk.bf16.gmra.mrb[28].mxu1 %vm442_vm3, %v8944_v24 }
 0x231   : > { %7046 = vmatprep.mubr.msk.bf16.mxu1 %vm442_vm3, %v8876_v34  ;;  %v2472_v34 = vpack.c.bf16 %v8809_v62, %v2456_v59  ;;  %v9046_v62 = vld [vmem:[#allocation2 + $0x82] sm:$0xff] }
 0x232   : > { %v9050_v61 = vpack.c.bf16 %v9046_v62, %v8673_v52 }
 0x238   : > { %7047 = vmatmul.mubr.msk.bf16.vlgmr.msra.gmra.mrb[0].mxu1 %vm442_vm3, %v8887_v55  ;;  %v2473_v55 = vpack.c.bf16 %v8783_v6, %v8792_v25  ;;  %v2464_v6 = vld [vmem:[#allocation2 + $0x12] sm:$0xff]  ;;  %v9040_v25 = vpack.c.bf16 %v8660_v35, %v8643_v16 }
 0x239   : > { %7079 = vmatpush3.bf16.msra.mxu1 %v7647_v22  ;;  %7050 = vmatprep.mubr.msk.bf16.mxu1 %vm442_vm3, %v2027_v4  ;;  %v9016_v22 = vld [vmem:[#allocation2 + $0x1b2] sm:$0xff]  ;;  %v9028_v51 = vpack.c.bf16 %v8608_v0, %v2464_v6 }
 0x23a   : > { %7080 = vmatprep.subr.bf16.mxu1 %v7648_v7  ;;  %v2475_v4 = vpack.c.bf16 %v9016_v22, %v8842_v27  ;;  %v9036_v27 = vpack.c.bf16 %v8641_v60, %v8617_v30 }
 0x23d   : > { %7081 = vmatpush3.bf16.msra.mxu1 %v7648_v7 }
 0x23e   : > { %7114 = vmatprep.subr.bf16.mxu1 %v7649_v10 }
 0x240   : > { %7051 = vmatmul.mubr.msk.bf16.gmra.mrb[4].mxu1 %vm442_vm3, %v2028_v12  ;;  %v9079_v12 = vpack.c.bf16 %v2721_v40, %v8905_v53  ;;  %v7652_v53 = vld [vmem:[%s10336_s3 + $0x58] sm:$0xff]  }
 0x241   : > { %7054 = vmatprep.mubr.msk.bf16.mxu1 %vm442_vm3, %v2472_v34 }
 0x248   : > { %7055 = vmatmul.mubr.msk.bf16.gmra.mrb[8].mxu1 %vm442_vm3, %v2473_v55 }
 0x249   : > { %7058 = vmatprep.mubr.msk.bf16.mxu1 %vm442_vm3, %v2474_v11 }
 0x250   : > { %7059 = vmatmul.mubr.msk.bf16.gmra.mrb[12].mxu1 %vm442_vm3, %v2475_v4 }
 0x251   : > { %7062 = vmatprep.mubr.msk.bf16.mxu1 %vm442_vm3, %v8947_v29 }
 0x258   : > { %7063 = vmatmul.mubr.msk.bf16.gmra.mrb[16].mxu1 %vm442_vm3, %v8959_v46 }
 0x259   : > { %7066 = vmatprep.mubr.msk.bf16.mxu1 %vm442_vm3, %v8965_v1 }
 0x260   : > { %7067 = vmatmul.mubr.msk.bf16.gmra.mrb[20].mxu1 %vm442_vm3, %v8981_v26 }
 0x261   : > { %7070 = vmatprep.mubr.msk.bf16.mxu1 %vm442_vm3, %v9028_v51 }
 0x268   : > { %7071 = vmatmul.mubr.msk.bf16.gmra.mrb[24].mxu1 %vm442_vm3, %v9036_v27 }
 0x269   : > { %7074 = vmatprep.mubr.msk.bf16.mxu1 %vm442_vm3, %v9040_v25 }
 0x270   : > { %7075 = vmatmul.mubr.msk.bf16.gmra.mrb[28].mxu1 %vm442_vm3, %v9050_v61 }
 0x271   : > { %7082 = vmatprep.mubr.msk.bf16.mxu1 %vm442_vm3, %v1997_v5 }
 0x278   : > { %7083 = vmatmul.mubr.msk.bf16.vlgmr.msra.gmra.mrb[0].mxu1 %vm442_vm3, %v1998_v2 }
 0x279   : > { %7115 = vmatpush3.bf16.msra.mxu1 %v7649_v10  ;;  %7086 = vmatprep.mubr.msk.bf16.mxu1 %vm442_vm3, %v1999_v17 }
 0x27a   : > { %7116 = vmatprep.subr.bf16.mxu1 %v7650_v15 }
 0x27d   : > { %7117 = vmatpush3.bf16.msra.mxu1 %v7650_v15 }
 0x27e   : > { %7150 = vmatprep.subr.bf16.mxu1 %v7651_v13 }
 0x280   : > { %7087 = vmatmul.mubr.msk.bf16.gmra.mrb[4].mxu1 %vm442_vm3, %v2000_v32 }
 0x281   : > { %7090 = vmatprep.mubr.msk.bf16.mxu1 %vm442_vm3, %v8914_v21 }
 0x288   : > { %7091 = vmatmul.mubr.msk.bf16.gmra.mrb[8].mxu1 %vm442_vm3, %v8926_v19 }
 0x289   : > { %7094 = vmatprep.mubr.msk.bf16.mxu1 %vm442_vm3, %v8930_v41 }
 0x290   : > { %7095 = vmatmul.mubr.msk.bf16.gmra.mrb[12].mxu1 %vm442_vm3, %v8944_v24 }
 0x291   : > { %7098 = vmatprep.mubr.msk.bf16.mxu1 %vm442_vm3, %v8892_v45 }
 0x298   : > { %7099 = vmatmul.mubr.msk.bf16.gmra.mrb[16].mxu1 %vm442_vm3, %v8879_v58 }
 0x299   : > { %7102 = vmatprep.mubr.msk.bf16.mxu1 %vm442_vm3, %v8911_v3 }
 0x2a0   : > { %7103 = vmatmul.mubr.msk.bf16.gmra.mrb[20].mxu1 %vm442_vm3, %v9079_v12 }
 0x2a1   : > { %7106 = vmatprep.mubr.msk.bf16.mxu1 %vm442_vm3, %v8815_v44 }
 0x2a8   : > { %7107 = vmatmul.mubr.msk.bf16.gmra.mrb[24].mxu1 %vm442_vm3, %v8794_v31 }
 0x2a9   : > { %7110 = vmatprep.mubr.msk.bf16.mxu1 %vm442_vm3, %v8860_v49 }
 0x2b0   : > { %7111 = vmatmul.mubr.msk.bf16.gmra.mrb[28].mxu1 %vm442_vm3, %v9090_v23 }
 0x2b1   : > { %7118 = vmatprep.mubr.msk.bf16.mxu1 %vm442_vm3, %v8914_v21 }
 0x2b6   : > { %v9106_v56 = vpop.f32.mrb[128].mxu0 }
 0x2b7   : > { %v9108_v5 = vpop.f32.mrb[129].mxu0 }
 0x2b8   : > { %7119 = vmatmul.mubr.msk.bf16.vlgmr.msra.gmra.mrb[0].mxu1 %vm442_vm3, %v8926_v19  ;;  %v9110_v21 = vpop.f32.mrb[130].mxu0 }
 0x2b9   : > { %7151 = vmatpush3.bf16.msra.mxu1 %v7651_v13  ;;  %7122 = vmatprep.mubr.msk.bf16.mxu1 %vm442_vm3, %v8930_v41  ;;  %v9112_v2 = vpop.f32.mrb[131].mxu0 }
 0x2ba   : > { %7152 = vmatprep.subr.bf16.mxu1 %v7652_v53 }
 0x2bd   : > { %7153 = vmatpush3.bf16.msra.mxu1 %v7652_v53 }
 0x2be   : > { %7186 = vmatprep.subr.bf16.mxu1 %v7653_v18 }
 0x2c0   : > { %7123 = vmatmul.mubr.msk.bf16.gmra.mrb[4].mxu1 %vm442_vm3, %v8944_v24 }
 0x2c1   : > { %7126 = vmatprep.mubr.msk.bf16.mxu1 %vm442_vm3, %v8947_v29  ;;  %v9118_v19 = vpop.f32.mrb[132].mxu0 }
 0x2c2   : > { %v9120_v41 = vpop.f32.mrb[133].mxu0 }
 0x2c3   : > { %v9122_v17 = vpop.f32.mrb[134].mxu0 }
 0x2c4   : > { %v9124_v32 = vpop.f32.mrb[135].mxu0 }
 0x2c8   : > { %7127 = vmatmul.mubr.msk.bf16.gmra.mrb[8].mxu1 %vm442_vm3, %v8959_v46 }
 0x2c9   : > { %7130 = vmatprep.mubr.msk.bf16.mxu1 %vm442_vm3, %v8965_v1 }
 0x2ca   : > { %v9130_v7 = vpop.f32.mrb[136].mxu0 }
 0x2cb   : > { %v9132_v24 = vpop.f32.mrb[137].mxu0 }
 0x2cc   : > { %v9134_v10 = vpop.f32.mrb[138].mxu0 }
 0x2cd   : > { %v9136_v59 = vpop.f32.mrb[139].mxu0 }
 0x2d0   : > { %7131 = vmatmul.mubr.msk.bf16.gmra.mrb[12].mxu1 %vm442_vm3, %v8981_v26 }
 0x2d1   : > { %7134 = vmatprep.mubr.msk.bf16.mxu1 %vm442_vm3, %v8815_v44 }
 0x2d2   : > { %v9142_v34 = vpop.f32.mrb[140].mxu0 }
 0x2d3   : > { %v9144_v55 = vpop.f32.mrb[141].mxu0 }
 0x2d4   : > { %v9146_v11 = vpop.f32.mrb[142].mxu0 }
 0x2d5   : > { %10516 = vst [vmem:[#allocation7_spill] sm:$0xff] %v9146_v11  ;;  %v9148_v4 = vpop.f32.mrb[143].mxu0 }
 0x2d6   : > { %10517 = vst [vmem:[#allocation23_spill] sm:$0xff] %v9148_v4 }
 0x2d8   : > { %7135 = vmatmul.mubr.msk.bf16.gmra.mrb[16].mxu1 %vm442_vm3, %v8794_v31 }
 0x2d9   : > { %7138 = vmatprep.mubr.msk.bf16.mxu1 %vm442_vm3, %v8860_v49 }
 0x2da   : > { %v9154_v6 = vpop.f32.mrb[144].mxu0 }
 0x2db   : > { %10518 = vst [vmem:[#allocation40_spill] sm:$0xff] %v9154_v6  ;;  %v9156_v15 = vpop.f32.mrb[145].mxu0 }
 0x2dc   : > { %10519 = vst [vmem:[#allocation8_spill] sm:$0xff] %v9156_v15  ;;  %v9158_v13 = vpop.f32.mrb[146].mxu0 }
 0x2dd   : > { %10520 = vst [vmem:[#allocation24_spill] sm:$0xff] %v9158_v13  ;;  %v9160_v40 = vpop.f32.mrb[147].mxu0  ;;  %v2979_v13 = vld [vmem:[#allocation2 + $0x261] sm:$0xff] }
 0x2de   : > { %10521 = vst [vmem:[#allocation9_spill] sm:$0xff] %v9160_v40 }
 0x2e0   : > { %7139 = vmatmul.mubr.msk.bf16.gmra.mrb[20].mxu1 %vm442_vm3, %v9090_v23 }
 0x2e1   : > { %7142 = vmatprep.mubr.msk.bf16.mxu1 %vm442_vm3, %v8894_v42 }
 0x2e2   : > { %v9166_v20 = vpop.f32.mrb[148].mxu0 }
 0x2e3   : > { %10522 = vst [vmem:[#allocation25_spill] sm:$0xff] %v9166_v20  ;;  %v9168_v53 = vpop.f32.mrb[149].mxu0 }
 0x2e4   : > { %10523 = vst [vmem:[#allocation41_spill] sm:$0xff] %v9168_v53  ;;  %v9170_v4 = vpop.f32.mrb[150].mxu0  ;;  %v9187_v53 = vpack.c.bf16 %v2979_v13, %v8903_v48  ;;  %v7655_v48 = vld [vmem:[%s10336_s3 + $0x70] sm:$0xff]  }
 0x2e5   : > { %10524 = vst [vmem:[#allocation42_spill] sm:$0xff] %v9170_v4  ;;  %v9172_v11 = vpop.f32.mrb[151].mxu0 }
 0x2e6   : > { %10525 = vst [vmem:[#allocation10_spill] sm:$0xff] %v9172_v11 }
 0x2e8   : > { %7143 = vmatmul.mubr.msk.bf16.gmra.mrb[24].mxu1 %vm442_vm3, %v8881_v36 }
 0x2e9   : > { %7146 = vmatprep.mubr.msk.bf16.mxu1 %vm442_vm3, %v8916_v33 }
 0x2ea   : > { %v9178_v40 = vpop.f32.mrb[152].mxu0 }
 0x2eb   : > { %10526 = vst [vmem:[#allocation26_spill] sm:$0xff] %v9178_v40  ;;  %v9180_v15 = vpop.f32.mrb[153].mxu0 }
 0x2ec   : > { %10527 = vst [vmem:[#allocation43_spill] sm:$0xff] %v9180_v15  ;;  %v9182_v6 = vpop.f32.mrb[154].mxu0 }
 0x2ed   : > { %v9184_v20 = vpop.f32.mrb[155].mxu0 }
 0x2ee   : > { %10528 = vst [vmem:[#allocation11_spill] sm:$0xff] %v9184_v20  ;;  %v7654_v20 = vld [vmem:[%s10336_s3 + $0x68] sm:$0xff]  }
 0x2f0   : > { %7147 = vmatmul.mubr.msk.bf16.gmra.mrb[28].mxu1 %vm442_vm3, %v9187_v53 }
 0x2f1   : > { %7154 = vmatprep.mubr.msk.bf16.mxu1 %vm442_vm3, %v8947_v29  ;;  %v3213_v29 = vld [vmem:[#allocation2 + $0x1c2] sm:$0xff] }
 0x2f2   : > { %v9193_v11 = vpop.f32.mrb[156].mxu0 }
 0x2f3   : > { %v9195_v4 = vpop.f32.mrb[157].mxu0 }
 0x2f4   : > { %v9197_v40 = vpop.f32.mrb[158].mxu0 }
 0x2f5   : > { %v9199_v15 = vpop.f32.mrb[159].mxu0 }
 0x2f8   : > { %7155 = vmatmul.mubr.msk.bf16.vlgmr.msra.gmra.mrb[0].mxu1 %vm442_vm3, %v8959_v46  ;;  %v3217_v46 = vpack.c.bf16 %v3213_v29, %v9016_v22  ;;  %v3448_v22 = vld [vmem:[#allocation2 + $0x130] sm:$0xff] }
 0x2f9   : > { %7187 = vmatpush3.bf16.msra.mxu1 %v7653_v18  ;;  %7158 = vmatprep.mubr.msk.bf16.mxu1 %vm442_vm3, %v8965_v1  ;;  %v7656_v1 = vld [vmem:[%s10336_s3 + $0x78] sm:$0xff]  }
 0x2fa   : > { %7188 = vmatprep.subr.bf16.mxu1 %v7654_v20 }
 0x2fd   : > { %7189 = vmatpush3.bf16.msra.mxu1 %v7654_v20 }
 0x2fe   : > { %7222 = vmatprep.subr.bf16.mxu1 %v7655_v48 }
 0x300   : > { %7159 = vmatmul.mubr.msk.bf16.gmra.mrb[4].mxu1 %vm442_vm3, %v8981_v26  ;;  %v7657_v26 = vld [vmem:[%s10336_s3 + $0x80] sm:$0xff]  }
 0x301   : > { %7162 = vmatprep.mubr.msk.bf16.mxu1 %vm442_vm3, %v9028_v51  ;;  %v3461_v51 = vpack.c.bf16 %v3448_v22, %v8977_v9 }
 0x308   : > { %7163 = vmatmul.mubr.msk.bf16.gmra.mrb[8].mxu1 %vm442_vm3, %v9036_v27 }
 0x309   : > { %7166 = vmatprep.mubr.msk.bf16.mxu1 %vm442_vm3, %v9040_v25 }
 0x310   : > { %7167 = vmatmul.mubr.msk.bf16.gmra.mrb[12].mxu1 %vm442_vm3, %v9050_v61 }
 0x311   : > { %7170 = vmatprep.mubr.msk.bf16.mxu1 %vm442_vm3, %v8894_v42 }
 0x318   : > { %7171 = vmatmul.mubr.msk.bf16.gmra.mrb[16].mxu1 %vm442_vm3, %v8881_v36 }
 0x319   : > { %7174 = vmatprep.mubr.msk.bf16.mxu1 %vm442_vm3, %v8916_v33 }
 0x320   : > { %7175 = vmatmul.mubr.msk.bf16.gmra.mrb[20].mxu1 %vm442_vm3, %v9187_v53 }
 0x321   : > { %7178 = vmatprep.mubr.msk.bf16.mxu1 %vm442_vm3, %v8819_v39 }
 0x328   : > { %7179 = vmatmul.mubr.msk.bf16.gmra.mrb[24].mxu1 %vm442_vm3, %v8798_v38 }
 0x329   : > { %7182 = vmatprep.mubr.msk.bf16.mxu1 %vm442_vm3, %v8864_v57 }
 0x330   : > { %7183 = vmatmul.mubr.msk.bf16.gmra.mrb[28].mxu1 %vm442_vm3, %v3217_v46 }
 0x331   : > { %7190 = vmatprep.mubr.msk.bf16.mxu1 %vm442_vm3, %v8892_v45  ;;  %v10531_v45 = vpack.c.bf16 %v8757_v50, %v8750_v14  ;;  %v7658_v14 = vld [vmem:[%s10336_s3 + $0x88] sm:$0xff]  }
 0x332   : > { %v10535_v50 = vld [vmem:[#allocation22_spill] sm:$0xff] }
 0x338   : > { %7191 = vmatmul.mubr.msk.bf16.vlgmr.msra.gmra.mrb[0].mxu1 %vm442_vm3, %v8879_v58  ;;  %v10530_v58 = vpack.c.bf16 %v8733_v37, %v8729_v63  ;;  %v3457_v63 = vld [vmem:[#allocation2 + $0x91] sm:$0xff] }
 0x339   : > { %7223 = vmatpush3.bf16.msra.mxu1 %v7655_v48  ;;  %7194 = vmatprep.mubr.msk.bf16.mxu1 %vm442_vm3, %v8911_v3  ;;  %v10529_v3 = vpack.c.bf16 %v8707_v54, %v8698_v28  ;;  %v10532_v28 = vld [vmem:[#allocation53_spill] sm:$0xff]  ;;  %v10533_v54 = vld [vmem:[#allocation54_spill] sm:$0xff]  ;;  %v3465_v37 = vpack.c.bf16 %v3457_v63, %v8940_v8  ;;  %v10543_v63 = vld [vmem:[#allocation8_spill] sm:$0xff] }
 0x33a   : > { %7224 = vmatprep.subr.bf16.mxu1 %v7656_v1 }
 0x33d   : > { %7225 = vmatpush3.bf16.msra.mxu1 %v7656_v1  ;;  %v10540_v1 = vld [vmem:[#allocation7_spill] sm:$0xff] }
 0x33e   : > { %7258 = vmatprep.subr.bf16.mxu1 %v7657_v26 }
 0x340   : > { %7195 = vmatmul.mubr.msk.bf16.gmra.mrb[4].mxu1 %vm442_vm3, %v9079_v12 }
 0x341   : > { %7198 = vmatprep.mubr.msk.bf16.mxu1 %vm442_vm3, %v8815_v44 }
 0x348   : > { %7199 = vmatmul.mubr.msk.bf16.gmra.mrb[8].mxu1 %vm442_vm3, %v8794_v31 }
 0x349   : > { %7202 = vmatprep.mubr.msk.bf16.mxu1 %vm442_vm3, %v8860_v49 }
 0x350   : > { %7203 = vmatmul.mubr.msk.bf16.gmra.mrb[12].mxu1 %vm442_vm3, %v9090_v23 }
 0x351   : > { %7206 = vmatprep.mubr.msk.bf16.mxu1 %vm442_vm3, %v10529_v3 }
 0x358   : > { %7207 = vmatmul.mubr.msk.bf16.gmra.mrb[16].mxu1 %vm442_vm3, %v10530_v58  ;;  %v10541_v58 = vld [vmem:[#allocation23_spill] sm:$0xff] }
 0x359   : > { %7210 = vmatprep.mubr.msk.bf16.mxu1 %vm442_vm3, %v10531_v45 }
 0x360   : > { %7211 = vmatmul.mubr.msk.bf16.gmra.mrb[20].mxu1 %vm442_vm3, %v3461_v51  ;;  %v10542_v51 = vld [vmem:[#allocation40_spill] sm:$0xff] }
 0x361   : > { %7214 = vmatprep.mubr.msk.bf16.mxu1 %vm442_vm3, %v8625_v43 }
 0x368   : > { %7215 = vmatmul.mubr.msk.bf16.gmra.mrb[24].mxu1 %vm442_vm3, %v10532_v28 }
 0x369   : > { %7218 = vmatprep.mubr.msk.bf16.mxu1 %vm442_vm3, %v10533_v54 }
 0x370   : > { %7219 = vmatmul.mubr.msk.bf16.gmra.mrb[28].mxu1 %vm442_vm3, %v3465_v37 }
 0x371   : > { %7226 = vmatprep.mubr.msk.bf16.mxu1 %vm442_vm3, %v8815_v44  ;;  %v3707_v44 = vld [vmem:[#allocation2 + $0x131] sm:$0xff] }
 0x378   : > { %7227 = vmatmul.mubr.msk.bf16.vlgmr.msra.gmra.mrb[0].mxu1 %vm442_vm3, %v8794_v31  ;;  %v10536_v31 = vld [vmem:[#allocation39_spill] sm:$0xff] }
 0x379   : > { %7259 = vmatpush3.bf16.msra.mxu1 %v7657_v26  ;;  %7230 = vmatprep.mubr.msk.bf16.mxu1 %vm442_vm3, %v8860_v49  ;;  %v10534_v49 = vld [vmem:[#allocation6_spill] sm:$0xff] }
 0x37a   : > { %7260 = vmatprep.subr.bf16.mxu1 %v7658_v14 }
 0x37d   : > { %7261 = vmatpush3.bf16.msra.mxu1 %v7658_v14 }
 0x380   : > { %7231 = vmatmul.mubr.msk.bf16.gmra.mrb[4].mxu1 %vm442_vm3, %v9090_v23 }
 0x381   : > { %7234 = vmatprep.mubr.msk.bf16.mxu1 %vm442_vm3, %v8894_v42 }
 0x388   : > { %7235 = vmatmul.mubr.msk.bf16.gmra.mrb[8].mxu1 %vm442_vm3, %v8881_v36 }
 0x389   : > { %7238 = vmatprep.mubr.msk.bf16.mxu1 %vm442_vm3, %v8916_v33 }
 0x390   : > { %7239 = vmatmul.mubr.msk.bf16.gmra.mrb[12].mxu1 %vm442_vm3, %v9187_v53 }
 0x391   : > { %7242 = vmatprep.mubr.msk.bf16.mxu1 %vm442_vm3, %v8625_v43  ;;  %v3711_v43 = vpack.c.bf16 %v3707_v44, %v8975_v47  ;;  %v10545_v44 = vld [vmem:[#allocation9_spill] sm:$0xff] }
 0x398   : > { %7243 = vmatmul.mubr.msk.bf16.gmra.mrb[16].mxu1 %vm442_vm3, %v10532_v28 }
 0x399   : > { %7246 = vmatprep.mubr.msk.bf16.mxu1 %vm442_vm3, %v10533_v54 }
 0x3a0   : > { %7247 = vmatmul.mubr.msk.bf16.gmra.mrb[20].mxu1 %vm442_vm3, %v3465_v37 }
 0x3a1   : > { %7250 = vmatprep.mubr.msk.bf16.mxu1 %vm442_vm3, %v10534_v49 }
 0x3a8   : > { %7251 = vmatmul.mubr.msk.bf16.gmra.mrb[24].mxu1 %vm442_vm3, %v10535_v50 }
 0x3a9   : > { %7254 = vmatprep.mubr.msk.bf16.mxu1 %vm442_vm3, %v10536_v31 }
 0x3b0   : > { %7255 = vmatmul.mubr.msk.bf16.gmra.mrb[28].mxu1 %vm442_vm3, %v3711_v43 }
 0x3b1   : > { %7262 = vmatprep.mubr.msk.bf16.mxu1 %vm442_vm3, %v8894_v42 }
 0x3b8   : > { %7263 = vmatmul.mubr.msk.bf16.vlgmr.msra.gmra.mrb[0].mxu1 %vm442_vm3, %v8881_v36  ;;  %v3941_v36 = vld [vmem:[#allocation2 + $0x92] sm:$0xff] }
 0x3b9   : > { %7266 = vmatprep.mubr.msk.bf16.mxu1 %vm442_vm3, %v8916_v33  ;;  %v3945_v42 = vpack.c.bf16 %v3941_v36, %v9046_v62 }
 0x3c0   : > { %7267 = vmatmul.mubr.msk.bf16.gmra.mrb[4].mxu1 %vm442_vm3, %v9187_v53 }
 0x3c1   : > { %7270 = vmatprep.mubr.msk.bf16.mxu1 %vm442_vm3, %v8819_v39  ;;  %v10537_v39 = vpack.c.bf16 %v8617_v30, %v8608_v0 }
 0x3c8   : > { %7271 = vmatmul.mubr.msk.bf16.gmra.mrb[8].mxu1 %vm442_vm3, %v8798_v38  ;;  %v10538_v38 = vpack.c.bf16 %v8643_v16, %v8641_v60 }
 0x3c9   : > { %7274 = vmatprep.mubr.msk.bf16.mxu1 %vm442_vm3, %v8864_v57  ;;  %v10539_v57 = vpack.c.bf16 %v8673_v52, %v8660_v35 }
 0x3d0   : > { %7275 = vmatmul.mubr.msk.bf16.gmra.mrb[12].mxu1 %vm442_vm3, %v3217_v46 }
 0x3d1   : > { %7278 = vmatprep.mubr.msk.bf16.mxu1 %vm442_vm3, %v10534_v49  ;;  %v10544_v49 = vld [vmem:[#allocation24_spill] sm:$0xff] }
 0x3d8   : > { %7279 = vmatmul.mubr.msk.bf16.gmra.mrb[16].mxu1 %vm442_vm3, %v10535_v50 }
 0x3d9   : > { %7282 = vmatprep.mubr.msk.bf16.mxu1 %vm442_vm3, %v10536_v31 }
 0x3e0   : > { %7283 = vmatmul.mubr.msk.bf16.gmra.mrb[20].mxu1 %vm442_vm3, %v3711_v43 }
 0x3e1   : > { %7286 = vmatprep.mubr.msk.bf16.mxu1 %vm442_vm3, %v10537_v39 }
 0x3e8   : > { %7287 = vmatmul.mubr.msk.bf16.gmra.mrb[24].mxu1 %vm442_vm3, %v10538_v38  ;;  %v10546_v38 = vld [vmem:[#allocation25_spill] sm:$0xff] }
 0x3e9   : > { %7290 = vmatprep.mubr.msk.bf16.mxu1 %vm442_vm3, %v10539_v57 }
 0x3f0   : > { %7291 = vmatmul.mubr.msk.bf16.gmra.mrb[28].mxu1 %vm442_vm3, %v3945_v42  ;;  %v10547_v42 = vld [vmem:[#allocation41_spill] sm:$0xff] }
 0x48b   : > { %v7264_v33 = vpop.f32.mrb[0].mxu1 }
 0x48c   : > { %v9352_v0 = vadd.f32 %v7264_v33, %v9106_v56  ;;  %v4009_v30 = vpop.f32.mrb[1].mxu1 }
 0x48d   : > { %v9355_v8 = vadd.f32 %v4009_v30, %v9108_v5  ;;  %v7265_v60 = vpop.f32.mrb[2].mxu1  ;;  %v10548_v30 = vld [vmem:[#allocation42_spill] sm:$0xff] }
 0x48e   : > { %v9358_v16 = vadd.f32 %v7265_v60, %v9110_v21  ;;  %v4012_v35 = vpop.f32.mrb[3].mxu1 }
 0x48f   : > { %v9361_v52 = vadd.f32 %v4012_v35, %v9112_v2 }
 0x493   : > { %v7268_v47 = vpop.f32.mrb[4].mxu1 }
 0x494   : > { %v9364_v9 = vadd.f32 %v7268_v47, %v9118_v19  ;;  %v4025_v27 = vpop.f32.mrb[5].mxu1  ;;  %v10550_v47 = vld [vmem:[#allocation26_spill] sm:$0xff] }
 0x495   : > { %v9367_v25 = vadd.f32 %v4025_v27, %v9120_v41  ;;  %v7269_v62 = vpop.f32.mrb[6].mxu1 }
 0x496   : > { %v9370_v61 = vadd.f32 %v7269_v62, %v9122_v17  ;;  %v4028_v12 = vpop.f32.mrb[7].mxu1 }
 0x497   : > { %v9373_v23 = vadd.f32 %v4028_v12, %v9124_v32  ;;  %v10551_v12 = vld [vmem:[#allocation43_spill] sm:$0xff] }
 0x49b   : > { %v7272_v18 = vpop.f32.mrb[8].mxu1 }
 0x49c   : > { %v7302_v56 = vadd.f32 %v7272_v18, %v9130_v7  ;;  %v4041_v5 = vpop.f32.mrb[9].mxu1 }
 0x49d   : > { %v7303_v21 = vadd.f32 %v4041_v5, %v9132_v24  ;;  %v7273_v2 = vpop.f32.mrb[10].mxu1 }
 0x49e   : > { %v4170_v19 = vmax.f32 %v9352_v0, %v7302_v56  ;;  %v7304_v41 = vadd.f32 %v7273_v2, %v9134_v10  ;;  %v4044_v13 = vpop.f32.mrb[11].mxu1 }
 0x49f   : > { %v4168_v20 = vmax.f32 %v9355_v8, %v7303_v21  ;;  %v7305_v17 = vadd.f32 %v4044_v13, %v9136_v59 }
 0x4a0   : > { %v4171_v53 = vmax.f32 %v9358_v16, %v7304_v41  ;;  %v10549_v16 = vld [vmem:[#allocation10_spill] sm:$0xff]  ;;  %v6422_v41 = vld [vmem:[%s10337_s4] ss:$0 sm:$0xff] }
 0x4a1   : > { %v4169_v32 = vmax.f32 %v9361_v52, %v7305_v17  ;;  %v10552_v17 = vld [vmem:[#allocation11_spill] sm:$0xff] }
 0x4a3   : > { %v7276_v48 = vpop.f32.mrb[12].mxu1 }
 0x4a4   : > { %v9384_v7 = vadd.f32 %v7276_v48, %v9142_v34  ;;  %v4057_v29 = vpop.f32.mrb[13].mxu1 }
 0x4a5   : > { %v9387_v24 = vadd.f32 %v4057_v29, %v9144_v55  ;;  %v7277_v46 = vpop.f32.mrb[14].mxu1 }
 0x4a6   : > { %v4174_v10 = vmax.f32 %v9364_v9, %v9384_v7  ;;  %v9392_v26 = vadd.f32 %v7277_v46, %v10540_v1  ;;  %v4060_v59 = vpop.f32.mrb[15].mxu1  ;;  %v9459_v7 = vld [vmem:[%s10338_s5 + $0x3] ss:$0 sm:$0xff] }
 0x4a7   : > { %v4172_v3 = vmax.f32 %v9367_v25, %v9387_v24  ;;  %v9397_v45 = vadd.f32 %v4060_v59, %v10541_v58  ;;  %v4224_v58 = vld [vmem:[#allocation3] sm:$0xff] }
 0x4a8   : > { %v4175_v34 = vmax.f32 %v9370_v61, %v9392_v26  ;;  %v9469_v61 = vld [vmem:[%s10338_s5 + $0x6] ss:$0 sm:$0xff] }
 0x4a9   : > { %v4173_v55 = vmax.f32 %v9373_v23, %v9397_v45  ;;  %v9474_v23 = vld [vmem:[%s10338_s5 + $0x7] ss:$0 sm:$0xff] }
 0x4ab   : > { %v7280_v22 = vpop.f32.mrb[16].mxu1 }
 0x4ac   : > { %v7310_v28 = vadd.f32 %v7280_v22, %v10542_v51  ;;  %v4073_v54 = vpop.f32.mrb[17].mxu1  ;;  %v9421_v22 = vld [vmem:[%s10338_s5] ss:$0 sm:$0xff] }
 0x4ad   : > { %v7311_v37 = vadd.f32 %v4073_v54, %v10543_v63  ;;  %v7281_v14 = vpop.f32.mrb[18].mxu1  ;;  %v9426_v54 = vld [vmem:[%s10338_s5 + $0x1] ss:$0 sm:$0xff] }
 0x4ae   : > { %v7312_v50 = vadd.f32 %v7281_v14, %v10544_v49  ;;  %v4076_v31 = vpop.f32.mrb[19].mxu1 }
 0x4af   : > { %v7313_v43 = vadd.f32 %v4076_v31, %v10545_v44  ;;  %v4239_v31 = vmul.f32 %v9421_v22, %v4224_v58 }
 0x4b3   : > { %v7284_v39 = vpop.f32.mrb[20].mxu1 }
 0x4b4   : > { %v7314_v57 = vadd.f32 %v7284_v39, %v10546_v38  ;;  %v4089_v36 = vpop.f32.mrb[21].mxu1 }
 0x4b5   : > { %v7315_v33 = vadd.f32 %v4089_v36, %v10547_v42  ;;  %v7285_v0 = vpop.f32.mrb[22].mxu1 }
 0x4b6   : > { %v7316_v8 = vadd.f32 %v7285_v0, %v10548_v30  ;;  %v4092_v60 = vpop.f32.mrb[23].mxu1  ;;  %v4287_v30 = vld [vmem:[#allocation3 + $0x2] sm:$0xff] }
 0x4b7   : > { %v7317_v35 = vadd.f32 %v4092_v60, %v10549_v16 }
 0x4bb   : > { %v7288_v52 = vpop.f32.mrb[24].mxu1 }
 0x4bc   : > { %v7318_v27 = vadd.f32 %v7288_v52, %v10550_v47  ;;  %v4105_v62 = vpop.f32.mrb[25].mxu1 }
 0x4bd   : > { %v7319_v18 = vadd.f32 %v4105_v62, %v10551_v12  ;;  %v7289_v56 = vpop.f32.mrb[26].mxu1 }
 0x4be   : > { %v4178_v5 = vmax.f32 %v7310_v28, %v7318_v27  ;;  %v7320_v21 = vadd.f32 %v7289_v56, %v9182_v6  ;;  %v4108_v2 = vpop.f32.mrb[27].mxu1  ;;  %v4255_v28 = vld [vmem:[#allocation3 + $0x1] sm:$0xff] }
 0x4bf   : > { %v4176_v13 = vmax.f32 %v7311_v37, %v7319_v18  ;;  %v7321_v48 = vadd.f32 %v4108_v2, %v10552_v17  ;;  %v4271_v38 = vmul.f32 %v9426_v54, %v4255_v28 }
 0x4c0   : > { %v4186_v29 = vmax.f32 %v4170_v19, %v4178_v5  ;;  %v4179_v46 = vmax.f32 %v7312_v50, %v7320_v21 }
 0x4c1   : > { %v4184_v1 = vmax.f32 %v4168_v20, %v4176_v13  ;;  %v4177_v59 = vmax.f32 %v7313_v43, %v7321_v48  ;;  %v4279_v27 = vadd.f32 %v4271_v38, %v4239_v31  ;;  %v9491_v13 = vld [vmem:[%s10338_s5 + $0x5] ss:$0 sm:$0xff] }
 0x4c2   : > { %v4201_v51 = vadd.f32 %v6422_v41, %v4186_v29  ;;  %v4187_v6 = vmax.f32 %v4171_v53, %v4179_v46 }
 0x4c3   : > { %v4199_v63 = vadd.f32 %v6422_v41, %v4184_v1  ;;  %v4185_v37 = vmax.f32 %v4169_v32, %v4177_v59  ;;  %v7292_v19 = vpop.f32.mrb[28].mxu1 }
 0x4c4   : > { %v4209_v14 = vmax.f32 %v4201_v51, 0.0  ;;  %v4202_v20 = vadd.f32 %v6422_v41, %v4187_v6  ;;  %v7322_v49 = vadd.f32 %v7292_v19, %v9193_v11  ;;  %v4121_v50 = vpop.f32.mrb[29].mxu1  ;;  %v9437_v11 = vld [vmem:[%s10338_s5 + $0x2] ss:$0 sm:$0xff] }
 0x4c5   : > { %v4207_v44 = vmax.f32 %v4199_v63, 0.0  ;;  %v4200_v43 = vadd.f32 %v6422_v41, %v4185_v37  ;;  %v7323_v53 = vadd.f32 %v4121_v50, %v9195_v4  ;;  %v7293_v39 = vpop.f32.mrb[30].mxu1  ;;  %v4303_v62 = vmul.f32 %v9437_v11, %v4287_v30 }
 0x4c6   : > { %4218 = vst.msk [vmem:[#allocation3 + $0x31] sm:$0xff] %vm442_vm3, %v4209_v14  ;;  %v4210_v36 = vmax.f32 %v4202_v20, 0.0  ;;  %v4182_v42 = vmax.f32 %v7314_v57, %v7322_v49  ;;  %v7324_v32 = vadd.f32 %v7293_v39, %v9197_v40  ;;  %v4124_v0 = vpop.f32.mrb[31].mxu1 }
 0x4c7   : > { %4216 = vst.msk [vmem:[#allocation3 + $0x11] sm:$0xff] %vm442_vm3, %v4207_v44  ;;  %v4208_v60 = vmax.f32 %v4200_v43, 0.0  ;;  %v4180_v4 = vmax.f32 %v7315_v33, %v7323_v53  ;;  %v7325_v16 = vadd.f32 %v4124_v0, %v9199_v15  ;;  %v4311_v45 = vadd.f32 %v4303_v62, %v4279_v27 }
 0x4c8   : > { %4219 = vst.msk [vmem:[#allocation3 + $0x41] sm:$0xff] %vm442_vm3, %v4210_v36  ;;  %v4190_v57 = vmax.f32 %v4174_v10, %v4182_v42  ;;  %v4183_v40 = vmax.f32 %v7316_v8, %v7324_v32  ;;  %v9464_v10 = vld [vmem:[%s10338_s5 + $0x4] ss:$0 sm:$0xff] }
 0x4c9   : > { %4217 = vst.msk [vmem:[#allocation3 + $0x21] sm:$0xff] %vm442_vm3, %v4208_v60  ;;  %v4188_v52 = vmax.f32 %v4172_v3, %v4180_v4  ;;  %v4181_v47 = vmax.f32 %v7317_v35, %v7325_v16 }
 0x4ca   : > { %v4205_v33 = vadd.f32 %v6422_v41, %v4190_v57  ;;  %v4191_v15 = vmax.f32 %v4175_v34, %v4183_v40  ;;  %v9479_v34 = vld [vmem:[%s10338_s5 + $0x8] ss:$0 sm:$0xff] }
 0x4cb   : > { %v4203_v12 = vadd.f32 %v6422_v41, %v4188_v52  ;;  %v4189_v9 = vmax.f32 %v4173_v55, %v4181_v47 }
 0x4cc   : > { %v4213_v25 = vmax.f32 %v4205_v33, 0.0  ;;  %v4206_v24 = vadd.f32 %v6422_v41, %v4191_v15 }
 0x4cd   : > { %v4211_v26 = vmax.f32 %v4203_v12, 0.0  ;;  %v4204_v3 = vadd.f32 %v6422_v41, %v4189_v9  ;;  %v4417_v55 = vld [vmem:[#allocation3 + $0x30] sm:$0xff] }
 0x4ce   : > { %v9481_v8 = vld [vmem:[#allocation3 + $0x31] sm:$0xff]  ;;  %4222 = vst.msk [vmem:[#allocation3 + $0x71] sm:$0xff] %vm442_vm3, %v4213_v25  ;;  %v4214_v35 = vmax.f32 %v4206_v24, 0.0  ;;  %v4433_v1 = vmul.f32 %v9469_v61, %v4417_v55  ;;  %v4337_v14 = vmul.f32 %v9459_v7, %v4417_v55  ;;  %v4242_v24 = vmul.f32 %v9421_v22, %v4417_v55 }
 0x4cf   : > { %v4319_v18 = vld [vmem:[#allocation3 + $0x10] sm:$0xff]  ;;  %4220 = vst.msk [vmem:[#allocation3 + $0x51] sm:$0xff] %vm442_vm3, %v4211_v26  ;;  %v4212_v21 = vmax.f32 %v4204_v3, 0.0  ;;  %v4465_v6 = vmul.f32 %v9474_v23, %v9481_v8  ;;  %v4418_v44 = vld [vmem:[#allocation3 + $0x40] sm:$0xff]  ;;  %v4369_v62 = vmul.f32 %v9464_v10, %v9481_v8 }
 0x4d0   : > { %v4351_v56 = vld [vmem:[#allocation3 + $0x11] sm:$0xff]  ;;  %v4335_v2 = vmul.f32 %v9459_v7, %v4319_v18  ;;  %4223 = vst.msk [vmem:[#allocation3 + $0x81] sm:$0xff] %vm442_vm3, %v4214_v35  ;;  %v4416_v17 = vld [vmem:[#allocation3 + $0x20] sm:$0xff]  ;;  %v4240_v29 = vmul.f32 %v9421_v22, %v4319_v18  ;;  %v4243_v57 = vmul.f32 %v9421_v22, %v4418_v44  ;;  %v4434_v35 = vmul.f32 %v9469_v61, %v4418_v44 }
 0x4d1   : > { %v9484_v5 = vld [vmem:[#allocation3 + $0x32] sm:$0xff]  ;;  %v4448_v48 = vld [vmem:[#allocation3 + $0x21] sm:$0xff]  ;;  %v4272_v46 = vmul.f32 %v9426_v54, %v4351_v56  ;;  %4221 = vst.msk [vmem:[#allocation3 + $0x61] sm:$0xff] %vm442_vm3, %v4212_v21  ;;  %v4367_v58 = vmul.f32 %v9464_v10, %v4351_v56  ;;  %v4432_v49 = vmul.f32 %v9469_v61, %v4416_v17  ;;  %v4241_v50 = vmul.f32 %v9421_v22, %v4416_v17 }
 0x4d2   : > { %v4383_v41 = vld [vmem:[#allocation3 + $0x12] sm:$0xff]  ;;  %v4343_v59 = vadd.f32 %v4335_v2, %v4311_v45  ;;  %v4480_v51 = vld [vmem:[#allocation3 + $0x22] sm:$0xff]  ;;  %v9503_v28 = vmul.f32 %v9479_v34, %v9484_v5  ;;  %v4273_v31 = vmul.f32 %v9426_v54, %v4448_v48  ;;  %v4464_v53 = vmul.f32 %v9474_v23, %v4448_v48 }
 0x4d3   : > { %v4399_v63 = vmul.f32 %v9491_v13, %v4383_v41  ;;  %v4280_v37 = vadd.f32 %v4272_v46, %v4240_v29  ;;  %v4304_v19 = vmul.f32 %v9437_v11, %v4383_v41  ;;  %v4450_v43 = vld [vmem:[#allocation3 + $0x41] sm:$0xff]  ;;  %v4496_v39 = vmul.f32 %v9479_v34, %v4480_v51 }
 0x4d4   : > { %v4375_v20 = vadd.f32 %v4367_v58, %v4343_v59  ;;  %v4336_v36 = vmul.f32 %v9459_v7, %v4416_v17  ;;  %v4482_v42 = vld [vmem:[#allocation3 + $0x42] sm:$0xff]  ;;  %v4368_v0 = vmul.f32 %v9464_v10, %v4448_v48  ;;  %v4281_v30 = vadd.f32 %v4273_v31, %v4241_v50 }
 0x4d5   : > { %v4312_v38 = vadd.f32 %v4304_v19, %v4280_v37  ;;  %v4305_v60 = vmul.f32 %v9437_v11, %v4480_v51  ;;  %v4400_v16 = vmul.f32 %v9491_v13, %v4480_v51  ;;  %v4275_v40 = vmul.f32 %v9426_v54, %v4450_v43 }
 0x4d6   : > { %v4407_v32 = vadd.f32 %v4399_v63, %v4375_v20  ;;  %v4323_v52 = vld [vmem:[#allocation3 + $0x50] sm:$0xff]  ;;  %v4307_v33 = vmul.f32 %v9437_v11, %v4482_v42  ;;  %v4401_v45 = vmul.f32 %v9491_v13, %v9484_v5  ;;  %v4466_v56 = vmul.f32 %v9474_v23, %v4450_v43 }
 0x4d7   : > { %v4344_v4 = vadd.f32 %v4336_v36, %v4312_v38  ;;  %v4313_v27 = vadd.f32 %v4305_v60, %v4281_v30  ;;  %v4283_v12 = vadd.f32 %v4275_v40, %v4243_v57  ;;  %v4339_v9 = vmul.f32 %v9459_v7, %v4323_v52  ;;  %v9523_v25 = vld [vmem:[#allocation3 + $0x51] sm:$0xff] }
 0x4d8   : > { %v4440_v47 = vadd.f32 %v4432_v49, %v4407_v32  ;;  %v4387_v2 = vld [vmem:[#allocation3 + $0x52] sm:$0xff]  ;;  %v4420_v41 = vld [vmem:[#allocation3 + $0x60] sm:$0xff]  ;;  %v4274_v17 = vmul.f32 %v9426_v54, %v9481_v8  ;;  %v4498_v55 = vmul.f32 %v9479_v34, %v4482_v42  ;;  %v4371_v46 = vmul.f32 %v9464_v10, %v9523_v25 }
 0x4d9   : > { %v4376_v15 = vadd.f32 %v4368_v0, %v4344_v4  ;;  %v4345_v3 = vadd.f32 %v4337_v14, %v4313_v27  ;;  %v4315_v21 = vadd.f32 %v4307_v33, %v4283_v12  ;;  %v4452_v51 = vld [vmem:[#allocation3 + $0x61] sm:$0xff]  ;;  %v4306_v37 = vmul.f32 %v9437_v11, %v9484_v5 }
 0x4da   : > { %v4472_v26 = vadd.f32 %v4464_v53, %v4440_v47  ;;  %v4282_v63 = vadd.f32 %v4274_v17, %v4242_v24  ;;  %v4403_v20 = vmul.f32 %v9491_v13, %v4387_v2  ;;  %v4436_v8 = vmul.f32 %v9469_v61, %v4420_v41 }
 0x4db   : > { %v4408_v18 = vadd.f32 %v4400_v16, %v4376_v15  ;;  %v4377_v29 = vadd.f32 %v4369_v62, %v4345_v3  ;;  %v4347_v58 = vadd.f32 %v4339_v9, %v4315_v21  ;;  %v4338_v53 = vmul.f32 %v9459_v7, %v4418_v44  ;;  %v4421_v3 = vld [vmem:[#allocation3 + $0x70] sm:$0xff] }
 0x4dc   : > { %v4504_v48 = vadd.f32 %v4496_v39, %v4472_v26  ;;  %v4314_v31 = vadd.f32 %v4306_v37, %v4282_v63  ;;  %v4468_v39 = vmul.f32 %v9474_v23, %v4452_v51  ;;  %v4244_v38 = vmul.f32 %v9421_v22, %v4323_v52  ;;  %v4453_v21 = vld [vmem:[#allocation3 + $0x71] sm:$0xff] }
 0x4dd   : > { %v4441_v59 = vadd.f32 %v4433_v1, %v4408_v18  ;;  %v4409_v14 = vadd.f32 %v4401_v45, %v4377_v29  ;;  %v4379_v50 = vadd.f32 %v4371_v46, %v4347_v58  ;;  %v4276_v5 = vmul.f32 %v9426_v54, %v9523_v25  ;;  %v4485_v58 = vld [vmem:[#allocation3 + $0x72] sm:$0xff] }
 0x4de   : > { %v4512_v19 = vsel %vm442_vm3, %v4504_v48, 0.0  ;;  %v4346_v0 = vadd.f32 %v4338_v53, %v4314_v31  ;;  %v4370_v30 = vmul.f32 %v9464_v10, %v4450_v43  ;;  %v4402_v4 = vmul.f32 %v9491_v13, %v4482_v42  ;;  %v4454_v31 = vld [vmem:[#allocation3 + $0x81] sm:$0xff] }
 0x4df   : > { %4513 = vadd.xlane.f32.xlu0 %v4512_v19  ;;  %v4473_v49 = vadd.f32 %v4465_v6, %v4441_v59  ;;  %v4442_v1 = vadd.f32 %v4434_v35, %v4409_v14  ;;  %v4411_v32 = vadd.f32 %v4403_v20, %v4379_v50  ;;  %v4484_v6 = vld [vmem:[#allocation3 + $0x62] sm:$0xff]  ;;  %v4284_v16 = vadd.f32 %v4276_v5, %v4244_v38 }
 0x4e0   : > { %v4308_v44 = vmul.f32 %v9437_v11, %v4387_v2  ;;  %v4378_v47 = vadd.f32 %v4370_v30, %v4346_v0  ;;  %v4435_v27 = vmul.f32 %v9469_v61, %v4323_v52  ;;  %v4340_v33 = vmul.f32 %v9459_v7, %v4420_v41  ;;  %v4423_v0 = vld [vmem:[#allocation3 + $0x90] sm:$0xff] }
 0x4e1   : > { %v4505_v36 = vadd.f32 %v9503_v28, %v4473_v49  ;;  %v4474_v60 = vadd.f32 %v4466_v56, %v4442_v1  ;;  %v4444_v40 = vadd.f32 %v4436_v8, %v4411_v32  ;;  %v4500_v43 = vmul.f32 %v9479_v34, %v4484_v6  ;;  %v4422_v8 = vld [vmem:[#allocation3 + $0x80] sm:$0xff] }
 0x4e2   : > { %v4316_v28 = vadd.f32 %v4308_v44, %v4284_v16  ;;  %v4410_v12 = vadd.f32 %v4402_v4, %v4378_v47  ;;  %v4245_v42 = vmul.f32 %v9421_v22, %v4420_v41  ;;  %v4372_v26 = vmul.f32 %v9464_v10, %v4452_v51  ;;  %v4455_v47 = vld [vmem:[#allocation3 + $0x91] sm:$0xff] }
 0x4e3   : > { %v4515_v57 = vsel %vm442_vm3, %v4505_v36, 0.0  ;;  %v4506_v62 = vadd.f32 %v4498_v55, %v4474_v60  ;;  %v4476_v15 = vadd.f32 %v4468_v39, %v4444_v40  ;;  %v4277_v45 = vmul.f32 %v9426_v54, %v4452_v51  ;;  %v4486_v60 = vld [vmem:[#allocation3 + $0x82] sm:$0xff] }
 0x4e4   : > { %4516 = vadd.xlane.f32.xlu0 %v4515_v57  ;;  %v4348_v24 = vadd.f32 %v4340_v33, %v4316_v28  ;;  %v4443_v35 = vadd.f32 %v4435_v27, %v4410_v12  ;;  %v4467_v18 = vmul.f32 %v9474_v23, %v9523_v25  ;;  %v4499_v56 = vmul.f32 %v9479_v34, %v4387_v2  ;;  %v4487_v33 = vld [vmem:[#allocation3 + $0x92] sm:$0xff] }
 0x4e5   : > { %v4518_v9 = vsel %vm442_vm3, %v4506_v62, 0.0  ;;  %v4508_v52 = vadd.f32 %v4500_v43, %v4476_v15  ;;  %v4404_v41 = vmul.f32 %v9491_v13, %v4484_v6  ;;  %v4285_v48 = vadd.f32 %v4277_v45, %v4245_v42 }
 0x4e6   : > { %4519 = vadd.xlane.f32.xlu1 %v4518_v9  ;;  %v4380_v17 = vadd.f32 %v4372_v26, %v4348_v24  ;;  %v4309_v29 = vmul.f32 %v9437_v11, %v4484_v6  ;;  %v4475_v46 = vadd.f32 %v4467_v18, %v4443_v35  ;;  %v4437_v59 = vmul.f32 %v9469_v61, %v4421_v3  ;;  %v7667_v35 = vld [vmem:[%s10342_s9 + $0x114] ss:$8 sps:$4 sm:$0xff]  }
 0x4e7   : > { %v4524_v55 = vsel %vm442_vm3, %v4508_v52, 0.0  ;;  %v4341_v51 = vmul.f32 %v9459_v7, %v4421_v3  ;;  %v4246_v2 = vmul.f32 %v9421_v22, %v4421_v3  ;;  %v4278_v37 = vmul.f32 %v9426_v54, %v4453_v21  ;;  %v7664_v52 = vld [vmem:[%s10342_s9 + $0x4] ss:$8 sps:$4 sm:$0xff]   ;;  %v7670_v18 = vld [vmem:[%s10342_s9 + $0x14] ss:$8 sps:$4 sm:$0xff]  }
 0x4e8   : > { %4525 = vadd.xlane.f32.xlu0 %v4524_v55  ;;  %v4412_v63 = vadd.f32 %v4404_v41, %v4380_v17  ;;  %v4317_v25 = vadd.f32 %v4309_v29, %v4285_v48  ;;  %v4507_v19 = vadd.f32 %v4499_v56, %v4475_v46  ;;  %v4469_v14 = vmul.f32 %v9474_v23, %v4453_v21  ;;  %v7665_v56 = vld [vmem:[%s10342_s9 + $0x110] ss:$8 sps:$4 sm:$0xff]   ;;  %v9609_v17 = vld [vmem:[#allocation4] ss:$0 sm:$0xff]  ;;  %v7673_v46 = vld [vmem:[%s10342_s9 + $0x124] ss:$8 sps:$4 sm:$0xff]  }
 0x4e9   : > { %v4373_v20 = vmul.f32 %v9464_v10, %v4453_v21  ;;  %v4286_v53 = vadd.f32 %v4278_v37, %v4246_v2  ;;  %v4310_v1 = vmul.f32 %v9437_v11, %v4485_v58  ;;  %v4501_v38 = vmul.f32 %v9479_v34, %v4485_v58  ;;  %5698 = vmatprep.subr.bf16.mxu1 %v7664_v52  ;;  %v7668_v21 = vld [vmem:[%s10342_s9 + $0x10] ss:$8 sps:$4 sm:$0xff]   ;;  %v7671_v55 = vld [vmem:[%s10342_s9 + $0x120] ss:$8 sps:$4 sm:$0xff]  }
 0x4ea   : > { %v4445_v49 = vadd.f32 %v4437_v59, %v4412_v63  ;;  %v4349_v50 = vadd.f32 %v4341_v51, %v4317_v25  ;;  %v4521_v39 = vsel %vm442_vm3, %v4507_v19, 0.0  ;;  %v4405_v22 = vmul.f32 %v9491_v13, %v4485_v58  ;;  %v7674_v59 = vld [vmem:[%s10342_s9 + $0x20] ss:$8 sps:$4 sm:$0xff]   ;;  %v7676_v58 = vld [vmem:[%s10342_s9 + $0x24] ss:$8 sps:$4 sm:$0xff]  }
 0x4eb   : > { %4522 = vadd.xlane.f32.xlu1 %v4521_v39  ;;  %v4318_v36 = vadd.f32 %v4310_v1, %v4286_v53  ;;  %v4342_v32 = vmul.f32 %v9459_v7, %v4422_v8  ;;  %v4438_v30 = vmul.f32 %v9469_v61, %v4422_v8  ;;  %v4374_v6 = vmul.f32 %v9464_v10, %v4454_v31  ;;  %v7679_v51 = vld [vmem:[%s10342_s9 + $0x134] ss:$8 sps:$4 sm:$0xff]   ;;  %v7677_v2 = vld [vmem:[%s10342_s9 + $0x130] ss:$8 sps:$4 sm:$0xff]   ;;  %v7685_v19 = vld [vmem:[%s10342_s9 + $0x144] ss:$8 sps:$4 sm:$0xff]  }
 0x4ec   : > { %v4477_v54 = vadd.f32 %v4469_v14, %v4445_v49  ;;  %v4381_v5 = vadd.f32 %v4373_v20, %v4349_v50  ;;  %v7881_v44 = vmov 0   ;;  %v4470_v57 = vmul.f32 %v9474_v23, %v4454_v31  ;;  %v7682_v63 = vld [vmem:[%s10342_s9 + $0x34] ss:$8 sps:$4 sm:$0xff]   ;;  %v7680_v37 = vld [vmem:[%s10342_s9 + $0x30] ss:$8 sps:$4 sm:$0xff]  }
 0x4ed   : > { %v4350_v16 = vadd.f32 %v4342_v32, %v4318_v36  ;;  %7573 = vset.pattern.permute.xlu0 %v7881_v44  ;;  %7574 = vset.pattern.permute.xlu1 %v7881_v44  ;;  %v4439_v40 = vmul.f32 %v9469_v61, %v4423_v0  ;;  %v4406_v28 = vmul.f32 %v9491_v13, %v4486_v60  ;;  %v7659_v13 = vld [vmem:[%s10342_s9 + $0x100] ss:$8 sps:$4 sm:$0xff]   ;;  %v7688_v1 = vld [vmem:[%s10342_s9 + $0x44] ss:$8 sps:$4 sm:$0xff]  }
 0x4ee   : > { %v4509_v4 = vadd.f32 %v4501_v38, %v4477_v54  ;;  %v4413_v11 = vadd.f32 %v4405_v22, %v4381_v5  ;;  %v4502_v15 = vmul.f32 %v9479_v34, %v4486_v60  ;;  %v4471_v12 = vmul.f32 %v9474_v23, %v4455_v47  ;;  %v7661_v23 = vld [vmem:[%s10342_s9 + $0x104] ss:$8 sps:$4 sm:$0xff]   ;;  %v7683_v14 = vld [vmem:[%s10342_s9 + $0x140] ss:$8 sps:$4 sm:$0xff]   ;;  %v7689_v22 = vld [vmem:[%s10342_s9 + $0x150] ss:$8 sps:$4 sm:$0xff]  }
 0x4ef   : > { %v4382_v62 = vadd.f32 %v4374_v6, %v4350_v16  ;;  %v4503_v24 = vmul.f32 %v9479_v34, %v4487_v33  ;;  %v7662_v34 = vld [vmem:[%s10342_s9] ss:$8 sps:$4 sm:$0xff]   ;;  %5739 = vmatprep.subr.bf16.mxu0 %v7661_v23  ;;  %v7691_v54 = vld [vmem:[%s10342_s9 + $0x154] ss:$8 sps:$4 sm:$0xff]   ;;  %v7701_v47 = vld [vmem:[%s10342_s9 + $0x170] ss:$8 sps:$4 sm:$0xff]  }
 0x4f0   : > { %v4527_v27 = vsel %vm442_vm3, %v4509_v4, 0.0  ;;  %v4446_v7 = vadd.f32 %v4438_v30, %v4413_v11  ;;  %5740 = vmatpush1.bf16.msra.mxu0 %v7659_v13  ;;  %5699 = vmatpush1.bf16.msra.mxu1 %v7662_v34  ;;  %v7686_v53 = vld [vmem:[%s10342_s9 + $0x40] ss:$8 sps:$4 sm:$0xff]   ;;  %v7692_v30 = vld [vmem:[%s10342_s9 + $0x50] ss:$8 sps:$4 sm:$0xff]  }
 0x4f1   : > { %4528 = vadd.xlane.f32.xlu1 %v4527_v27  ;;  %v4414_v43 = vadd.f32 %v4406_v28, %v4382_v62  ;;  %5741 = vmatprep.subr.bf16.mxu0 %v7667_v35  ;;  %v7694_v60 = vld [vmem:[%s10342_s9 + $0x54] ss:$8 sps:$4 sm:$0xff]   ;;  %v7695_v6 = vld [vmem:[%s10342_s9 + $0x160] ss:$8 sps:$4 sm:$0xff]   ;;  %v7697_v4 = vld [vmem:[%s10342_s9 + $0x164] ss:$8 sps:$4 sm:$0xff]  }
 0x4f2   : > { %v4478_v10 = vadd.f32 %v4470_v57, %v4446_v7  ;;  %5700 = vmatprep.subr.bf16.mxu1 %v7670_v18  ;;  %v7698_v57 = vld [vmem:[%s10342_s9 + $0x60] ss:$8 sps:$4 sm:$0xff]   ;;  %v7703_v27 = vld [vmem:[%s10342_s9 + $0x174] ss:$8 sps:$4 sm:$0xff]   ;;  %v7704_v33 = vld [vmem:[%s10342_s9 + $0x70] ss:$8 sps:$4 sm:$0xff]  }
 0x4f3   : > { %v4447_v9 = vadd.f32 %v4439_v40, %v4414_v43  ;;  %v7700_v40 = vld [vmem:[%s10342_s9 + $0x64] ss:$8 sps:$4 sm:$0xff]   ;;  %v7718_v13 = vld [vmem:[%s10342_s9 + $0x94] ss:$8 sps:$4 sm:$0xff]   ;;  %v7719_v34 = vld [vmem:[%s10342_s9 + $0x1a0] ss:$8 sps:$4 sm:$0xff]  }
 0x4f4   : > { %v4510_v42 = vadd.f32 %v4502_v15, %v4478_v10  ;;  %5742 = vmatpush1.bf16.msra.mxu0 %v7665_v56  ;;  %5701 = vmatpush1.bf16.msra.mxu1 %v7668_v21  ;;  %v7706_v10 = vld [vmem:[%s10342_s9 + $0x74] ss:$8 sps:$4 sm:$0xff]   ;;  %v7707_v15 = vld [vmem:[%s10342_s9 + $0x180] ss:$8 sps:$4 sm:$0xff]   ;;  %v7709_v43 = vld [vmem:[%s10342_s9 + $0x184] ss:$8 sps:$4 sm:$0xff]  }
 0x4f5   : > { %v4479_v26 = vadd.f32 %v4471_v12, %v4447_v9  ;;  %5743 = vmatprep.subr.bf16.mxu0 %v7673_v46  ;;  %5702 = vmatprep.subr.bf16.mxu1 %v7676_v58  ;;  %v7710_v9 = vld [vmem:[%s10342_s9 + $0x80] ss:$8 sps:$4 sm:$0xff]   ;;  %v7721_v23 = vld [vmem:[%s10342_s9 + $0x1a4] ss:$8 sps:$4 sm:$0xff]   ;;  %v7725_v18 = vld [vmem:[%s10342_s9 + $0x1b0] ss:$8 sps:$4 sm:$0xff]  }
 0x4f6   : > { %v4530_v61 = vsel %vm442_vm3, %v4510_v42, 0.0  ;;  %v7722_v52 = vld [vmem:[%s10342_s9 + $0xa0] ss:$8 sps:$4 sm:$0xff]   ;;  %v7724_v35 = vld [vmem:[%s10342_s9 + $0xa4] ss:$8 sps:$4 sm:$0xff]  }
 0x4f7   : > { %4531 = vadd.xlane.f32.xlu0 %v4530_v61  ;;  %v4511_v3 = vadd.f32 %v4503_v24, %v4479_v26  ;;  %v7712_v24 = vld [vmem:[%s10342_s9 + $0x84] ss:$8 sps:$4 sm:$0xff]   ;;  %v7713_v61 = vld [vmem:[%s10342_s9 + $0x190] ss:$8 sps:$4 sm:$0xff]   ;;  %v7715_v26 = vld [vmem:[%s10342_s9 + $0x194] ss:$8 sps:$4 sm:$0xff]  }
 0x4f8   : > { %5744 = vmatpush1.bf16.msra.mxu0 %v7671_v55  ;;  %5703 = vmatpush1.bf16.msra.mxu1 %v7674_v59  ;;  %v7727_v56 = vld [vmem:[%s10342_s9 + $0x1b4] ss:$8 sps:$4 sm:$0xff]   ;;  %v7734_v46 = vld [vmem:[%s10342_s9 + $0xc0] ss:$8 sps:$4 sm:$0xff]   ;;  %v7737_v59 = vld [vmem:[%s10342_s9 + $0x1d0] ss:$8 sps:$4 sm:$0xff]  }
 0x4f9   : > { %v4533_v45 = vsel %vm442_vm3, %v4511_v3, 0.0  ;;  %5745 = vmatprep.subr.bf16.mxu0 %v7679_v51  ;;  %5704 = vmatprep.subr.bf16.mxu1 %v7682_v63  ;;  %v7730_v21 = vld [vmem:[%s10342_s9 + $0xb4] ss:$8 sps:$4 sm:$0xff]   ;;  %v7745_v51 = vld [vmem:[%s10342_s9 + $0x1e4] ss:$8 sps:$4 sm:$0xff]  }
 0x4fa   : > { %4534 = vadd.xlane.f32.xlu1 %v4533_v45  ;;  %v7716_v45 = vld [vmem:[%s10342_s9 + $0x90] ss:$8 sps:$4 sm:$0xff]   ;;  %v7739_v55 = vld [vmem:[%s10342_s9 + $0x1d4] ss:$8 sps:$4 sm:$0xff]  }
 0x4fb   : > { %v7742_v58 = vld [vmem:[%s10342_s9 + $0xd4] ss:$8 sps:$4 sm:$0xff]   ;;  %v7740_v63 = vld [vmem:[%s10342_s9 + $0xd0] ss:$8 sps:$4 sm:$0xff]  }
 0x4fc   : > { %5746 = vmatpush1.bf16.msra.mxu0 %v7677_v2  ;;  %5705 = vmatpush1.bf16.msra.mxu1 %v7680_v37  ;;  %v7748_v2 = vld [vmem:[%s10342_s9 + $0xe4] ss:$8 sps:$4 sm:$0xff]   ;;  %v7751_v37 = vld [vmem:[%s10342_s9 + $0x1f4] ss:$8 sps:$4 sm:$0xff]  }
 0x4fd   : > { %5747 = vmatprep.subr.bf16.mxu0 %v7685_v19  ;;  %5706 = vmatprep.subr.bf16.mxu1 %v7688_v1  ;;  %v4559_v19 = vlaneseq }
 0x500   : > { %5748 = vmatpush1.bf16.msra.mxu0 %v7683_v14  ;;  %5707 = vmatpush1.bf16.msra.mxu1 %v7686_v53  ;;  %v7746_v14 = vld [vmem:[%s10342_s9 + $0xe0] ss:$8 sps:$4 sm:$0xff]  }
 0x501   : > { %5749 = vmatprep.subr.bf16.mxu0 %v7691_v54  ;;  %5708 = vmatprep.subr.bf16.mxu1 %v7694_v60  ;;  %v4852_v53 = vld [vmem:[%s10341_s8] sm:$0xff] }
 0x504   : > { %5750 = vmatpush1.bf16.msra.mxu0 %v7689_v22  ;;  %5709 = vmatpush1.bf16.msra.mxu1 %v7692_v30  ;;  %v4563_v30 = vld [vmem:[%s10340_s7 + $0x10] sm:$0xff] }
 0x505   : > { %5751 = vmatprep.subr.bf16.mxu0 %v7697_v4  ;;  %5710 = vmatprep.subr.bf16.mxu1 %v7700_v40  ;;  %v4567_v40 = vld [vmem:[%s10340_s7 + $0x30] sm:$0xff] }
 0x508   : > { %5752 = vmatpush1.bf16.msra.mxu0 %v7695_v6  ;;  %5711 = vmatpush1.bf16.msra.mxu1 %v7698_v57  ;;  %v4566_v57 = vld [vmem:[%s10340_s7 + $0x28] sm:$0xff] }
 0x509   : > { %5753 = vmatprep.subr.bf16.mxu0 %v7703_v27  ;;  %5712 = vmatprep.subr.bf16.mxu1 %v7706_v10 }
 0x50c   : > { %5754 = vmatpush1.bf16.msra.mxu0 %v7701_v47  ;;  %5713 = vmatpush1.bf16.msra.mxu1 %v7704_v33  ;;  %v4568_v47 = vld [vmem:[%s10340_s7 + $0x38] sm:$0xff] }
 0x50d   : > { %5755 = vmatprep.subr.bf16.mxu0 %v7709_v43  ;;  %5714 = vmatprep.subr.bf16.mxu1 %v7712_v24  ;;  %v4588_v33 = vld [vmem:[%s10340_s7 + $0xd8] sm:$0xff]  ;;  %v4590_v43 = vld [vmem:[%s10340_s7 + $0xe8] sm:$0xff] }
 0x510   : > { %5756 = vmatpush1.bf16.msra.mxu0 %v7707_v15  ;;  %5715 = vmatpush1.bf16.msra.mxu1 %v7710_v9  ;;  %v4589_v15 = vld [vmem:[%s10340_s7 + $0xe0] sm:$0xff] }
 0x511   : > { %5757 = vmatprep.subr.bf16.mxu0 %v7715_v26  ;;  %5716 = vmatprep.subr.bf16.mxu1 %v7718_v13 }
 0x514   : > { %5758 = vmatpush1.bf16.msra.mxu0 %v7713_v61  ;;  %5717 = vmatpush1.bf16.msra.mxu1 %v7716_v45 }
 0x515   : > { %5759 = vmatprep.subr.bf16.mxu0 %v7721_v23  ;;  %5718 = vmatprep.subr.bf16.mxu1 %v7724_v35  ;;  %v4570_v35 = vld [vmem:[%s10340_s7 + $0x48] sm:$0xff] }
 0x518   : > { %5760 = vmatpush1.bf16.msra.mxu0 %v7719_v34  ;;  %5719 = vmatpush1.bf16.msra.mxu1 %v7722_v52  ;;  %v4592_v34 = vld [vmem:[%s10340_s7 + $0xf8] sm:$0xff]  ;;  %v4569_v52 = vld [vmem:[%s10340_s7 + $0x40] sm:$0xff] }
 0x519   : > { %5761 = vmatprep.subr.bf16.mxu0 %v7727_v56  ;;  %5720 = vmatprep.subr.bf16.mxu1 %v7730_v21 }
 0x51c   : > { %5762 = vmatpush1.bf16.msra.mxu0 %v7725_v18 }
 0x56c   : > { %v4514_v41 = vpop.xlane.xlu0 %4513 }
 0x56d   : > { %v4543_v48 = vadd.f32 %v9609_v17, %v4514_v41  ;;  %v7728_v41 = vld [vmem:[%s10342_s9 + $0xb0] ss:$8 sps:$4 sm:$0xff]  }
 0x56e   : > { %5721 = vmatpush1.bf16.msra.mxu1 %v7728_v41  ;;  %v4571_v41 = vld [vmem:[%s10340_s7 + $0x50] sm:$0xff] }
 0x56f   : > { %v4551_v29 = vmax.f32 %v4543_v48, 0.0  ;;  %v7731_v48 = vld [vmem:[%s10342_s9 + $0x1c0] ss:$8 sps:$4 sm:$0xff]  }
 0x571   : > { %4627 = vperm.xlu0 %7573, %v4551_v29   ;;  %v4517_v20 = vpop.xlane.xlu0 %4516  ;;  %v7736_v29 = vld [vmem:[%s10342_s9 + $0xc4] ss:$8 sps:$4 sm:$0xff]  }
 0x572   : > { %v4544_v50 = vadd.f32 %v9609_v17, %v4517_v20  ;;  %5722 = vmatprep.subr.bf16.mxu1 %v7736_v29  ;;  %v7749_v20 = vld [vmem:[%s10342_s9 + $0x1f0] ss:$8 sps:$4 sm:$0xff]   ;;  %v4573_v29 = vld [vmem:[%s10340_s7 + $0x60] sm:$0xff] }
 0x573   : > { %v4520_v25 = vpop.xlane.xlu1 %4519  ;;  %5723 = vmatpush1.bf16.msra.mxu1 %v7734_v46 }
 0x574   : > { %v4552_v39 = vmax.f32 %v4544_v50, 0.0  ;;  %v4545_v38 = vadd.f32 %v9609_v17, %v4520_v25  ;;  %5724 = vmatprep.subr.bf16.mxu1 %v7742_v58  ;;  %v7743_v25 = vld [vmem:[%s10342_s9 + $0x1e0] ss:$8 sps:$4 sm:$0xff]   ;;  %v9787_v50 = vshrl.u32 %v4559_v19, 7 }
 0x575   : > { %v4526_v5 = vpop.xlane.xlu0 %4525 }
 0x576   : > { %v4553_v36 = vmax.f32 %v4545_v38, 0.0  ;;  %v4547_v32 = vadd.f32 %v9609_v17, %v4526_v5  ;;  %v4872_v1 = vsub.s32 4, %v9787_v50  ;;  %v4880_v38 = vsub.s32 6, %v9787_v50 }
 0x577   : > { %5725 = vmatpush1.bf16.msra.mxu1 %v7740_v63  ;;  %v4868_v60 = vsub.s32 3, %v9787_v50  ;;  %v4856_v6 = vsub.s32 0, %v9787_v50  ;;  %v4864_v4 = vsub.s32 2, %v9787_v50  ;;  %v4575_v63 = vld [vmem:[%s10340_s7 + $0x70] sm:$0xff]  ;;  %vm4833_vm5 = vcmp.eq.s32.totalorder %v9787_v50, 0 }
 0x578   : > { %v4523_v8 = vpop.xlane.xlu1 %4522  ;;  %v4555_v11 = vmax.f32 %v4547_v32, 0.0  ;;  %5726 = vmatprep.subr.bf16.mxu1 %v7748_v2  ;;  %v9798_v22 = vrot.slane %v4852_v53, %v4872_v1  ;;  %v9802_v5 = vrot.slane %v4852_v53, %v4880_v38  ;;  %v4561_v32 = vld [vmem:[%s10340_s7] sm:$0xff] }
 0x579   : > { %v4546_v49 = vadd.f32 %v9609_v17, %v4523_v8  ;;  %v7754_v8 = vld [vmem:[%s10342_s9 + $0xf4] ss:$8 sps:$4 sm:$0xff]   ;;  %v9858_v9 = vrot.slane %v4852_v53, %v4868_v60  ;;  %v9862_v24 = vrot.slane %v4852_v53, %v4856_v6  ;;  %v9864_v61 = vrot.slane %v4852_v53, %v4864_v4  ;;  %v4577_v1 = vld [vmem:[%s10340_s7 + $0x80] sm:$0xff] }
 0x57a   : > { %v4579_v60 = vld [vmem:[%s10340_s7 + $0x90] sm:$0xff]  ;;  %v4580_v4 = vld [vmem:[%s10340_s7 + $0x98] sm:$0xff] }
 0x57b   : > { %v4554_v31 = vmax.f32 %v4546_v49, 0.0  ;;  %v7757_v49 = vld [vmem:[%s10342_s9 + $0x204] ss:$8 sps:$4 sm:$0xff]   ;;  %5727 = vmatpush1.bf16.msra.mxu1 %v7746_v14 }
 0x57c   : > { %5728 = vmatprep.subr.bf16.mxu1 %v7754_v8 }
 0x57d   : > { %4642 = vperm.xlu1 %7574, %v4554_v31   ;;  %v7752_v31 = vld [vmem:[%s10342_s9 + $0xf0] ss:$8 sps:$4 sm:$0xff]  }
 0x57e   : > { %v4529_v0 = vpop.xlane.xlu1 %4528 }
 0x57f   : > { %v4548_v16 = vadd.f32 %v9609_v17, %v4529_v0  ;;  %5729 = vmatpush1.bf16.msra.mxu1 %v7752_v31  ;;  %v4562_v0 = vld [vmem:[%s10340_s7 + $0x8] sm:$0xff] }
 0x581   : > { %4632 = vperm.xlu1 %7574, %v4552_v39   ;;  %v4556_v7 = vmax.f32 %v4548_v16, 0.0  ;;  %v4884_v39 = vsub.s32 7, %v9787_v50  ;;  %v4564_v16 = vld [vmem:[%s10340_s7 + $0x18] sm:$0xff] }
 0x583   : > { %v9800_v54 = vrot.slane %v4852_v53, %v4884_v39  ;;  %v4578_v39 = vld [vmem:[%s10340_s7 + $0x88] sm:$0xff] }
 0x584   : > { %v4532_v44 = vpop.xlane.xlu0 %4531 }
 0x585   : > { %4637 = vperm.xlu1 %7574, %v4553_v36   ;;  %v4549_v62 = vadd.f32 %v9609_v17, %v4532_v44  ;;  %v4860_v36 = vsub.s32 1, %v9787_v50  ;;  %v4565_v44 = vld [vmem:[%s10340_s7 + $0x20] sm:$0xff] }
 0x587   : > { %v4535_v28 = vpop.xlane.xlu1 %4534  ;;  %v4557_v12 = vmax.f32 %v4549_v62, 0.0  ;;  %v4586_v62 = vld [vmem:[%s10340_s7 + $0xc8] sm:$0xff]  ;;  %v9847_v10 = vrot.slane %v4852_v53, %v4860_v36 }
 0x588   : > { %v4550_v42 = vadd.f32 %v9609_v17, %v4535_v28  ;;  %v7733_v17 = vld [vmem:[%s10342_s9 + $0x1c4] ss:$8 sps:$4 sm:$0xff]   ;;  %v4587_v28 = vld [vmem:[%s10340_s7 + $0xd0] sm:$0xff] }
 0x589   : > { %4647 = vperm.xlu1 %7574, %v4555_v11   ;;  %5763 = vmatprep.subr.bf16.mxu0 %v7733_v17  ;;  %v4876_v11 = vsub.s32 5, %v9787_v50 }
 0x58a   : > { %v4558_v3 = vmax.f32 %v4550_v42, 0.0  ;;  %5764 = vmatpush1.bf16.msra.mxu0 %v7731_v48  ;;  %v4572_v48 = vld [vmem:[%s10340_s7 + $0x58] sm:$0xff] }
 0x58b   : > { %5765 = vmatprep.subr.bf16.mxu0 %v7739_v55  ;;  %v9866_v26 = vrot.slane %v4852_v53, %v4876_v11  ;;  %v4581_v11 = vld [vmem:[%s10340_s7 + $0xa0] sm:$0xff] }
 0x58d   : > { %4652 = vperm.xlu1 %7574, %v4556_v7   ;;  %v4585_v7 = vld [vmem:[%s10340_s7 + $0xc0] sm:$0xff] }
 0x58e   : > { %5766 = vmatpush1.bf16.msra.mxu0 %v7737_v59 }
 0x58f   : > { %5767 = vmatprep.subr.bf16.mxu0 %v7745_v51  ;;  %v4574_v51 = vld [vmem:[%s10340_s7 + $0x68] sm:$0xff] }
 0x591   : > { %4657 = vperm.xlu1 %7574, %v4557_v12   ;;  %v4591_v12 = vld [vmem:[%s10340_s7 + $0xf0] sm:$0xff] }
 0x592   : > { %5768 = vmatpush1.bf16.msra.mxu0 %v7743_v25  ;;  %v4576_v25 = vld [vmem:[%s10340_s7 + $0x78] sm:$0xff] }
 0x593   : > { %5769 = vmatprep.subr.bf16.mxu0 %v7751_v37 }
 0x595   : > { %4662 = vperm.xlu1 %7574, %v4558_v3  }
 0x596   : > { %5770 = vmatpush1.bf16.msra.mxu0 %v7749_v20 }
 0x597   : > { %5780 = vmatprep.subr.bf16.mxu0 %v7757_v49 }
 0x5f0   : > { %v4628_v27 = vpop.permute.xlu0 %4627 }
 0x5f1   : > { %v4665_v3 = vmul.f32 %v4628_v27, %v4561_v32  ;;  %v4666_v45 = vmul.f32 %v4628_v27, %v4562_v0  ;;  %v4667_v13 = vmul.f32 %v4628_v27, %v4563_v30  ;;  %v4668_v23 = vmul.f32 %v4628_v27, %v4564_v16 }
 0x5f2   : > { %v4669_v18 = vmul.f32 %v4628_v27, %v4565_v44  ;;  %v4670_v56 = vmul.f32 %v4628_v27, %v4566_v57  ;;  %v4671_v21 = vmul.f32 %v4628_v27, %v4567_v40  ;;  %v4672_v17 = vmul.f32 %v4628_v27, %v4568_v47  ;;  %v4582_v47 = vld [vmem:[%s10340_s7 + $0xa8] sm:$0xff]  ;;  %v4583_v27 = vld [vmem:[%s10340_s7 + $0xb0] sm:$0xff] }
 0x5fc   : > { %v4643_v42 = vpop.permute.xlu1 %4642 }
 0x5fd   : > { %v9886_v55 = vmul.f32 %v4643_v42, %v4585_v7  ;;  %v9888_v46 = vmul.f32 %v4643_v42, %v4586_v62  ;;  %v9890_v59 = vmul.f32 %v4643_v42, %v4587_v28  ;;  %v9892_v58 = vmul.f32 %v4643_v42, %v4588_v33  ;;  %v4584_v7 = vld [vmem:[%s10340_s7 + $0xb8] sm:$0xff] }
 0x5fe   : > { %v9903_v2 = vmul.f32 %v4643_v42, %v4589_v15  ;;  %v9905_v37 = vmul.f32 %v4643_v42, %v4590_v43  ;;  %v9907_v19 = vmul.f32 %v4643_v42, %v4591_v12  ;;  %v9909_v14 = vmul.f32 %v4643_v42, %v4592_v34 }
 0x600   : > { %v4633_v20 = vpop.permute.xlu1 %4632 }
 0x601   : > { %v4673_v8 = vmul.f32 %v4633_v20, %v4569_v52  ;;  %v4674_v49 = vmul.f32 %v4633_v20, %v4570_v35  ;;  %v4675_v31 = vmul.f32 %v4633_v20, %v4571_v41  ;;  %v4676_v53 = vmul.f32 %v4633_v20, %v4572_v48 }
 0x602   : > { %v4677_v38 = vmul.f32 %v4633_v20, %v4573_v29  ;;  %v4678_v32 = vmul.f32 %v4633_v20, %v4574_v51  ;;  %v4679_v0 = vmul.f32 %v4633_v20, %v4575_v63  ;;  %v4680_v30 = vmul.f32 %v4633_v20, %v4576_v25  ;;  %v4598_v63 = vld [vmem:[%s10340_s7 + $0x128] sm:$0xff]  ;;  %v4599_v25 = vld [vmem:[%s10340_s7 + $0x130] sm:$0xff]  ;;  %v4600_v20 = vld [vmem:[%s10340_s7 + $0x138] sm:$0xff] }
 0x603   : > { %v4729_v16 = vadd.f32 %v4673_v8, %v4665_v3  ;;  %v4742_v44 = vadd.f32 %v4674_v49, %v4666_v45  ;;  %v4755_v57 = vadd.f32 %v4675_v31, %v4667_v13  ;;  %v4768_v40 = vadd.f32 %v4676_v53, %v4668_v23  ;;  %v4593_v13 = vld [vmem:[%s10340_s7 + $0x100] sm:$0xff]  ;;  %v4594_v23 = vld [vmem:[%s10340_s7 + $0x108] sm:$0xff] }
 0x604   : > { %v4781_v62 = vadd.f32 %v4677_v38, %v4669_v18  ;;  %v4794_v28 = vadd.f32 %v4678_v32, %v4670_v56  ;;  %v4807_v33 = vadd.f32 %v4679_v0, %v4671_v21  ;;  %v4820_v15 = vadd.f32 %v4680_v30, %v4672_v17  ;;  %v4638_v43 = vpop.permute.xlu1 %4637  ;;  %v4595_v56 = vld [vmem:[%s10340_s7 + $0x110] sm:$0xff]  ;;  %v4596_v21 = vld [vmem:[%s10340_s7 + $0x118] sm:$0xff]  ;;  %v4597_v17 = vld [vmem:[%s10340_s7 + $0x120] sm:$0xff] }
 0x605   : > { %v4681_v12 = vmul.f32 %v4638_v43, %v4577_v1  ;;  %v4682_v42 = vmul.f32 %v4638_v43, %v4578_v39  ;;  %v4683_v3 = vmul.f32 %v4638_v43, %v4579_v60  ;;  %v4684_v45 = vmul.f32 %v4638_v43, %v4580_v4 }
 0x606   : > { %v4685_v34 = vmul.f32 %v4638_v43, %v4581_v11  ;;  %v4686_v52 = vmul.f32 %v4638_v43, %v4582_v47  ;;  %v4687_v35 = vmul.f32 %v4638_v43, %v4583_v27  ;;  %v4688_v18 = vmul.f32 %v4638_v43, %v4584_v7  ;;  %v4603_v7 = vld [vmem:[%s10340_s7 + $0x150] sm:$0xff] }
 0x607   : > { %v4730_v41 = vadd.f32 %v4729_v16, %v4681_v12  ;;  %v4743_v48 = vadd.f32 %v4742_v44, %v4682_v42  ;;  %v4756_v29 = vadd.f32 %v4755_v57, %v4683_v3  ;;  %v4769_v51 = vadd.f32 %v4768_v40, %v4684_v45  ;;  %v4601_v16 = vld [vmem:[%s10340_s7 + $0x140] sm:$0xff]  ;;  %v4602_v44 = vld [vmem:[%s10340_s7 + $0x148] sm:$0xff] }
 0x608   : > { %v4782_v8 = vadd.f32 %v4781_v62, %v4685_v34  ;;  %v4795_v49 = vadd.f32 %v4794_v28, %v4686_v52  ;;  %v4808_v31 = vadd.f32 %v4807_v33, %v4687_v35  ;;  %v4821_v53 = vadd.f32 %v4820_v15, %v4688_v18  ;;  %v4648_v1 = vpop.permute.xlu1 %4647  ;;  %v4604_v62 = vld [vmem:[%s10340_s7 + $0x158] sm:$0xff]  ;;  %v4605_v28 = vld [vmem:[%s10340_s7 + $0x160] sm:$0xff] }
 0x609   : > { %v4697_v39 = vmul.f32 %v4648_v1, %v4593_v13  ;;  %v4698_v38 = vmul.f32 %v4648_v1, %v4594_v23  ;;  %v4699_v32 = vmul.f32 %v4648_v1, %v4595_v56  ;;  %v4700_v0 = vmul.f32 %v4648_v1, %v4596_v21  ;;  %v4609_v23 = vld [vmem:[%s10340_s7 + $0x180] sm:$0xff] }
 0x60a   : > { %v4701_v30 = vmul.f32 %v4648_v1, %v4597_v17  ;;  %v9959_v60 = vmul.f32 %v4648_v1, %v4598_v63  ;;  %v4703_v4 = vmul.f32 %v4648_v1, %v4599_v25  ;;  %v9961_v11 = vmul.f32 %v4648_v1, %v4600_v20 }
 0x60b   : > { %v4731_v57 = vadd.f32 %v4730_v41, %v9886_v55  ;;  %v4757_v40 = vadd.f32 %v4756_v29, %v9890_v59  ;;  %v4783_v47 = vadd.f32 %v4782_v8, %v9903_v2  ;;  %v4809_v27 = vadd.f32 %v4808_v31, %v9907_v19  ;;  %v4606_v55 = vld [vmem:[%s10340_s7 + $0x168] sm:$0xff]  ;;  %v4607_v59 = vld [vmem:[%s10340_s7 + $0x170] sm:$0xff]  ;;  %v4608_v2 = vld [vmem:[%s10340_s7 + $0x178] sm:$0xff] }
 0x60c   : > { %v4653_v19 = vpop.permute.xlu1 %4652  ;;  %v4744_v33 = vadd.f32 %v4743_v48, %v9888_v46  ;;  %v4770_v15 = vadd.f32 %v4769_v51, %v9892_v58  ;;  %v4796_v43 = vadd.f32 %v4795_v49, %v9905_v37  ;;  %v9995_v12 = vadd.f32 %v4821_v53, %v9909_v14  ;;  %v4611_v46 = vld [vmem:[%s10340_s7 + $0x190] sm:$0xff]  ;;  %v4613_v58 = vld [vmem:[%s10340_s7 + $0x1a0] sm:$0xff]  ;;  %v4610_v41 = vld [vmem:[%s10340_s7 + $0x188] sm:$0xff] }
 0x60d   : > { %v4732_v42 = vadd.f32 %v4731_v57, %v4697_v39  ;;  %v4758_v3 = vadd.f32 %v4757_v40, %v4699_v32  ;;  %v4784_v45 = vadd.f32 %v4783_v47, %v4701_v30  ;;  %v4810_v13 = vadd.f32 %v4809_v27, %v4703_v4  ;;  %v4615_v37 = vld [vmem:[%s10340_s7 + $0x1b0] sm:$0xff]  ;;  %v4612_v48 = vld [vmem:[%s10340_s7 + $0x198] sm:$0xff]  ;;  %v4614_v8 = vld [vmem:[%s10340_s7 + $0x1a8] sm:$0xff] }
 0x60e   : > { %v4705_v34 = vmul.f32 %v4653_v19, %v4601_v16  ;;  %v4706_v52 = vmul.f32 %v4653_v19, %v4602_v44  ;;  %v4707_v35 = vmul.f32 %v4653_v19, %v4603_v7  ;;  %v4708_v18 = vmul.f32 %v4653_v19, %v4604_v62  ;;  %v4617_v39 = vld [vmem:[%s10340_s7 + $0x1c0] sm:$0xff]  ;;  %v4618_v32 = vld [vmem:[%s10340_s7 + $0x1c8] sm:$0xff]  ;;  %v4620_v30 = vld [vmem:[%s10340_s7 + $0x1d8] sm:$0xff] }
 0x60f   : > { %v4709_v14 = vmul.f32 %v4653_v19, %v4605_v28  ;;  %v4710_v56 = vmul.f32 %v4653_v19, %v4606_v55  ;;  %v4711_v21 = vmul.f32 %v4653_v19, %v4607_v59  ;;  %v4712_v17 = vmul.f32 %v4653_v19, %v4608_v2  ;;  %v4621_v4 = vld [vmem:[%s10340_s7 + $0x1e0] sm:$0xff]  ;;  %v4622_v47 = vld [vmem:[%s10340_s7 + $0x1e8] sm:$0xff]  ;;  %v4623_v27 = vld [vmem:[%s10340_s7 + $0x1f0] sm:$0xff] }
 0x610   : > { %v4658_v29 = vpop.permute.xlu1 %4657  ;;  %v4733_v51 = vadd.f32 %v4732_v42, %v4705_v34  ;;  %v4759_v63 = vadd.f32 %v4758_v3, %v4707_v35  ;;  %v4745_v25 = vadd.f32 %v4744_v33, %v4698_v38  ;;  %v4771_v20 = vadd.f32 %v4770_v15, %v4700_v0  ;;  %v4616_v38 = vld [vmem:[%s10340_s7 + $0x1b8] sm:$0xff]  ;;  %v4619_v0 = vld [vmem:[%s10340_s7 + $0x1d0] sm:$0xff] }
 0x611   : > { %v4713_v49 = vmul.f32 %v4658_v29, %v4609_v23  ;;  %v4715_v31 = vmul.f32 %v4658_v29, %v4611_v46  ;;  %v4717_v53 = vmul.f32 %v4658_v29, %v4613_v58  ;;  %v4719_v1 = vmul.f32 %v4658_v29, %v4615_v37  ;;  %v4624_v7 = vld [vmem:[%s10340_s7 + $0x1f8] sm:$0xff] }
 0x612   : > { %v4714_v16 = vmul.f32 %v4658_v29, %v4610_v41  ;;  %v4746_v44 = vadd.f32 %v4745_v25, %v4706_v52  ;;  %v4716_v57 = vmul.f32 %v4658_v29, %v4612_v48  ;;  %v4772_v40 = vadd.f32 %v4771_v20, %v4708_v18 }
 0x613   : > { %v4734_v62 = vadd.f32 %v4733_v51, %v4713_v49  ;;  %v4760_v28 = vadd.f32 %v4759_v63, %v4715_v31  ;;  %v4718_v55 = vmul.f32 %v4658_v29, %v4614_v8  ;;  %v4797_v59 = vadd.f32 %v4796_v43, %v9959_v60 }
 0x614   : > { %v4663_v2 = vpop.permute.xlu1 %4662  ;;  %v4747_v19 = vadd.f32 %v4746_v44, %v4714_v16  ;;  %v4773_v33 = vadd.f32 %v4772_v40, %v4716_v57  ;;  %v4785_v15 = vadd.f32 %v4784_v45, %v4709_v14  ;;  %v4720_v42 = vmul.f32 %v4658_v29, %v4616_v38 }
 0x615   : > { %v4721_v3 = vmul.f32 %v4663_v2, %v4617_v39  ;;  %v4722_v23 = vmul.f32 %v4663_v2, %v4618_v32  ;;  %v4723_v34 = vmul.f32 %v4663_v2, %v4619_v0  ;;  %v4724_v52 = vmul.f32 %v4663_v2, %v4620_v30 }
 0x616   : > { %v4725_v35 = vmul.f32 %v4663_v2, %v4621_v4  ;;  %v4726_v18 = vmul.f32 %v4663_v2, %v4622_v47  ;;  %v4727_v46 = vmul.f32 %v4663_v2, %v4623_v27  ;;  %v4728_v58 = vmul.f32 %v4663_v2, %v4624_v7 }
 0x617   : > { %v4735_v37 = vadd.f32 %v4734_v62, %v4721_v3  ;;  %v4761_v41 = vadd.f32 %v4760_v28, %v4723_v34  ;;  %v4748_v48 = vadd.f32 %v4747_v19, %v4722_v23  ;;  %v4774_v51 = vadd.f32 %v4773_v33, %v4724_v52 }
 0x618   : > { %v4798_v63 = vadd.f32 %v4797_v59, %v4710_v56  ;;  %v4786_v25 = vadd.f32 %v4785_v15, %v4717_v53  ;;  %v4823_v60 = vadd.f32 %v9995_v12, %v9961_v11  ;;  %v4811_v43 = vadd.f32 %v4810_v13, %v4711_v21 }
 0x619   : > { %v4736_v45 = vrot.slane %v4735_v37, 4  ;;  %v4762_v14 = vrot.slane %v4761_v41, 4  ;;  %v4749_v29 = vrot.slane %v4748_v48, 4  ;;  %v4775_v20 = vrot.slane %v4774_v51, 4 }
 0x61a   : > { %v4799_v8 = vadd.f32 %v4798_v63, %v4718_v55  ;;  %v4787_v49 = vadd.f32 %v4786_v25, %v4725_v35  ;;  %v4824_v31 = vadd.f32 %v4823_v60, %v4712_v17  ;;  %v4812_v39 = vadd.f32 %v4811_v43, %v4719_v1 }
 0x61b   : > { %v4737_v32 = vadd.f32 %v4736_v45, %v4735_v37  ;;  %v4763_v38 = vadd.f32 %v4762_v14, %v4761_v41  ;;  %v4750_v0 = vadd.f32 %v4749_v29, %v4748_v48  ;;  %v4776_v30 = vadd.f32 %v4775_v20, %v4774_v51 }
 0x61c   : > { %v4800_v56 = vadd.f32 %v4799_v8, %v4726_v18  ;;  %v4788_v53 = vrot.slane %v4787_v49, 4  ;;  %v4825_v4 = vadd.f32 %v4824_v31, %v4720_v42  ;;  %v4813_v16 = vadd.f32 %v4812_v39, %v4727_v46 }
 0x61d   : > { %v4751_v11 = vrot.slane %v4750_v0, 2  ;;  %v4777_v12 = vrot.slane %v4776_v30, 2  ;;  %v4738_v13 = vrot.slane %v4737_v32, 2  ;;  %v4764_v21 = vrot.slane %v4763_v38, 2 }
 0x61e   : > { %v4801_v44 = vrot.slane %v4800_v56, 4  ;;  %v4789_v57 = vadd.f32 %v4788_v53, %v4787_v49  ;;  %v4826_v40 = vadd.f32 %v4825_v4, %v4728_v58  ;;  %v4814_v47 = vrot.slane %v4813_v16, 4 }
 0x61f   : > { %v4752_v27 = vadd.f32 %v4751_v11, %v4750_v0  ;;  %v4778_v7 = vadd.f32 %v4777_v12, %v4776_v30  ;;  %v4739_v17 = vadd.f32 %v4738_v13, %v4737_v32  ;;  %v4765_v1 = vadd.f32 %v4764_v21, %v4763_v38  ;;  %v7760_v12 = vld [vmem:[%s10342_s9 + $0x214] ss:$8 sps:$4 sm:$0xff]  }
 0x620   : > { %v4802_v62 = vadd.f32 %v4801_v44, %v4800_v56  ;;  %v4790_v28 = vrot.slane %v4789_v57, 2  ;;  %v4827_v55 = vrot.slane %v4826_v40, 4  ;;  %v4815_v59 = vadd.f32 %v4814_v47, %v4813_v16 }
 0x621   : > { %v4753_v2 = vrot.slane %v4752_v27, 1  ;;  %v4779_v19 = vrot.slane %v4778_v7, 1  ;;  %v4740_v33 = vrot.slane %v4739_v17, 1  ;;  %v4766_v15 = vrot.slane %v4765_v1, 1 }
 0x622   : > { %v4803_v42 = vrot.slane %v4802_v62, 2  ;;  %v4791_v3 = vadd.f32 %v4790_v28, %v4789_v57  ;;  %v4828_v23 = vadd.f32 %v4827_v55, %v4826_v40  ;;  %v4816_v34 = vrot.slane %v4815_v59, 2  ;;  %v7767_v28 = vld [vmem:[%s10342_s9 + $0x240] ss:$8 sps:$4 sm:$0xff]   ;;  %v7772_v55 = vld [vmem:[%s10342_s9 + $0x254] ss:$8 sps:$4 sm:$0xff]  }
 0x623   : > { %v4754_v52 = vadd.f32 %v4753_v2, %v4752_v27  ;;  %v4780_v35 = vadd.f32 %v4779_v19, %v4778_v7  ;;  %v4741_v18 = vadd.f32 %v4740_v33, %v4739_v17  ;;  %v4767_v46 = vadd.f32 %v4766_v15, %v4765_v1  ;;  %v7761_v17 = vld [vmem:[%s10342_s9 + $0x220] ss:$8 sps:$4 sm:$0xff]   ;;  %v7766_v1 = vld [vmem:[%s10342_s9 + $0x234] ss:$8 sps:$4 sm:$0xff]   ;;  %v7775_v2 = vld [vmem:[%s10342_s9 + $0x264] ss:$8 sps:$4 sm:$0xff]  }
 0x624   : > { %v4804_v58 = vadd.f32 %v4803_v42, %v4802_v62  ;;  %v4792_v37 = vrot.slane %v4791_v3, 1  ;;  %v4829_v41 = vrot.slane %v4828_v23, 2  ;;  %v4817_v48 = vadd.f32 %v4816_v34, %v4815_v59  ;;  %v7769_v62 = vld [vmem:[%s10342_s9 + $0x244] ss:$8 sps:$4 sm:$0xff]   ;;  %v7770_v59 = vld [vmem:[%s10342_s9 + $0x250] ss:$8 sps:$4 sm:$0xff]  }
 0x625   : > { %v4837_v51 = vsel %vm4833_vm5, %v4754_v52, 0.0  ;;  %v4839_v63 = vsel %vm4833_vm5, %v4780_v35, 0.0  ;;  %v4836_v25 = vsel %vm4833_vm5, %v4741_v18, 0.0  ;;  %v4838_v60 = vsel %vm4833_vm5, %v4767_v46, 0.0  ;;  %v7773_v19 = vld [vmem:[%s10342_s9 + $0x260] ss:$8 sps:$4 sm:$0xff]  }
 0x626   : > { %v4895_v43 = vadd.f32 %v9847_v10, %v4837_v51  ;;  %v4897_v45 = vadd.f32 %v9858_v9, %v4839_v63  ;;  %v4894_v14 = vadd.f32 %v9862_v24, %v4836_v25  ;;  %v4896_v29 = vadd.f32 %v9864_v61, %v4838_v60  ;;  %v7755_v24 = vld [vmem:[%s10342_s9 + $0x200] ss:$8 sps:$4 sm:$0xff]   ;;  %v7778_v33 = vld [vmem:[%s10342_s9 + $0x274] ss:$8 sps:$4 sm:$0xff]   ;;  %v7776_v15 = vld [vmem:[%s10342_s9 + $0x270] ss:$8 sps:$4 sm:$0xff]  }
 0x627   : > { %v4805_v20 = vrot.slane %v4804_v58, 1  ;;  %v4793_v8 = vadd.f32 %v4792_v37, %v4791_v3  ;;  %v4830_v49 = vadd.f32 %v4829_v41, %v4828_v23  ;;  %v4818_v31 = vrot.slane %v4817_v48, 1  ;;  %v7781_v42 = vld [vmem:[%s10342_s9 + $0x284] ss:$8 sps:$4 sm:$0xff]   ;;  %v7779_v3 = vld [vmem:[%s10342_s9 + $0x280] ss:$8 sps:$4 sm:$0xff]  }
 0x628   : > { %v4903_v39 = vmax.f32 %v4895_v43, 0.0  ;;  %v4905_v32 = vmax.f32 %v4897_v45, 0.0  ;;  %v4902_v38 = vmax.f32 %v4894_v14, 0.0  ;;  %v4904_v0 = vmax.f32 %v4896_v29, 0.0  ;;  %v7784_v23 = vld [vmem:[%s10342_s9 + $0x294] ss:$8 sps:$4 sm:$0xff]  }
 0x629   : > { %v4806_v30 = vadd.f32 %v4805_v20, %v4804_v58  ;;  %v4840_v56 = vsel %vm4833_vm5, %v4793_v8, 0.0  ;;  %v4831_v53 = vrot.slane %v4830_v49, 1  ;;  %v4819_v10 = vadd.f32 %v4818_v31, %v4817_v48  ;;  %v7782_v34 = vld [vmem:[%s10342_s9 + $0x290] ss:$8 sps:$4 sm:$0xff]   ;;  %v7787_v52 = vld [vmem:[%s10342_s9 + $0x2a4] ss:$8 sps:$4 sm:$0xff]  }
 0x62a   : > { %v4911_v4 = vpack.c.bf16 %v4903_v39, %v4903_v39  ;;  %v4913_v9 = vpack.c.bf16 %v4905_v32, %v4905_v32  ;;  %v4910_v61 = vpack.c.bf16 %v4902_v38, %v4902_v38  ;;  %v4912_v16 = vpack.c.bf16 %v4904_v0, %v4904_v0  ;;  %v7785_v35 = vld [vmem:[%s10342_s9 + $0x2a0] ss:$8 sps:$4 sm:$0xff]   ;;  %v7790_v18 = vld [vmem:[%s10342_s9 + $0x2b4] ss:$8 sps:$4 sm:$0xff]   ;;  %v7788_v46 = vld [vmem:[%s10342_s9 + $0x2b0] ss:$8 sps:$4 sm:$0xff]  }
 0x62b   : > { %v4841_v11 = vsel %vm4833_vm5, %v4806_v30, 0.0  ;;  %v10072_v13 = vadd.f32 %v9798_v22, %v4840_v56  ;;  %v4832_v21 = vadd.f32 %v4831_v53, %v4830_v49  ;;  %v4842_v44 = vsel %vm4833_vm5, %v4819_v10, 0.0  ;;  %v7758_v22 = vld [vmem:[%s10342_s9 + $0x210] ss:$8 sps:$4 sm:$0xff]   ;;  %v7793_v58 = vld [vmem:[%s10342_s9 + $0x2c4] ss:$8 sps:$4 sm:$0xff]  }
 0x62c   : > { %5730 = vmatprep.mubr.bf16.mxu1 %v4911_v4  ;;  %5771 = vmatprep.mubr.bf16.mxu0 %v4913_v9  ;;  %v4899_v57 = vadd.f32 %v9866_v26, %v4841_v11  ;;  %v10078_v40 = vadd.f32 %v9802_v5, %v4842_v44  ;;  %v7763_v5 = vld [vmem:[%s10342_s9 + $0x224] ss:$8 sps:$4 sm:$0xff]   ;;  %v7791_v37 = vld [vmem:[%s10342_s9 + $0x2c0] ss:$8 sps:$4 sm:$0xff]   ;;  %v7796_v41 = vld [vmem:[%s10342_s9 + $0x2d4] ss:$8 sps:$4 sm:$0xff]  }
 0x62d   : > { %5731 = vmatmul.mubr.bf16.vlgmr.msra.gmra.mrb[32].mxu1 %v4910_v61  ;;  %5772 = vmatmul.mubr.bf16.vlgmr.msra.gmra.mrb[160].mxu0 %v4912_v16  ;;  %v4843_v47 = vsel %vm4833_vm5, %v4832_v21, 0.0  ;;  %v7794_v48 = vld [vmem:[%s10342_s9 + $0x2d0] ss:$8 sps:$4 sm:$0xff]   ;;  %v7799_v51 = vld [vmem:[%s10342_s9 + $0x2e4] ss:$8 sps:$4 sm:$0xff]   ;;  %v4906_v43 = vmax.f32 %v10072_v13, 0.0 }
 0x62e   : > { %5781 = vmatpush1.bf16.msra.mxu0 %v7755_v24  ;;  %v4907_v27 = vmax.f32 %v4899_v57, 0.0  ;;  %v10086_v7 = vadd.f32 %v9800_v54, %v4843_v47  ;;  %v7764_v54 = vld [vmem:[%s10342_s9 + $0x230] ss:$8 sps:$4 sm:$0xff]   ;;  %v7797_v63 = vld [vmem:[%s10342_s9 + $0x2e0] ss:$8 sps:$4 sm:$0xff]  }
 0x62f   : > { %5782 = vmatprep.subr.bf16.mxu0 %v7760_v12  ;;  %v7802_v25 = vld [vmem:[%s10342_s9 + $0x2f4] ss:$8 sps:$4 sm:$0xff]   ;;  %v7800_v60 = vld [vmem:[%s10342_s9 + $0x2f0] ss:$8 sps:$4 sm:$0xff]   ;;  %v7805_v45 = vld [vmem:[%s10342_s9 + $0x304] ss:$8 sps:$4 sm:$0xff]   ;;  %v4914_v20 = vpack.c.bf16 %v4906_v43, %v4906_v43 }
 0x630   : > { %v4915_v26 = vpack.c.bf16 %v4907_v27, %v4907_v27  ;;  %v4909_v14 = vmax.f32 %v10086_v7, 0.0  ;;  %v7803_v29 = vld [vmem:[%s10342_s9 + $0x300] ss:$8 sps:$4 sm:$0xff]   ;;  %v7808_v8 = vld [vmem:[%s10342_s9 + $0x314] ss:$8 sps:$4 sm:$0xff]  }
 0x631   : > { %v7806_v31 = vld [vmem:[%s10342_s9 + $0x310] ss:$8 sps:$4 sm:$0xff]   ;;  %v7811_v39 = vld [vmem:[%s10342_s9 + $0x324] ss:$8 sps:$4 sm:$0xff]   ;;  %v7809_v32 = vld [vmem:[%s10342_s9 + $0x320] ss:$8 sps:$4 sm:$0xff]  }
 0x632   : > { %5812 = vmatprep.mubr.bf16.mxu0 %v4915_v26  ;;  %5783 = vmatpush1.bf16.msra.mxu0 %v7758_v22  ;;  %v4917_v49 = vpack.c.bf16 %v4909_v14, %v4909_v14  ;;  %v7814_v38 = vld [vmem:[%s10342_s9 + $0x334] ss:$8 sps:$4 sm:$0xff]   ;;  %v7812_v0 = vld [vmem:[%s10342_s9 + $0x330] ss:$8 sps:$4 sm:$0xff]   ;;  %v7817_v30 = vld [vmem:[%s10342_s9 + $0x344] ss:$8 sps:$4 sm:$0xff]  }
 0x633   : > { %5784 = vmatprep.subr.bf16.mxu0 %v7763_v5  ;;  %v7815_v56 = vld [vmem:[%s10342_s9 + $0x340] ss:$8 sps:$4 sm:$0xff]   ;;  %v7820_v53 = vld [vmem:[%s10342_s9 + $0x354] ss:$8 sps:$4 sm:$0xff]   ;;  %v7818_v10 = vld [vmem:[%s10342_s9 + $0x350] ss:$8 sps:$4 sm:$0xff]  }
 0x634   : > { %v7823_v4 = vld [vmem:[%s10342_s9 + $0x364] ss:$8 sps:$4 sm:$0xff]   ;;  %v7821_v9 = vld [vmem:[%s10342_s9 + $0x360] ss:$8 sps:$4 sm:$0xff]   ;;  %v7826_v24 = vld [vmem:[%s10342_s9 + $0x374] ss:$8 sps:$4 sm:$0xff]  }
 0x635   : > { %v7824_v61 = vld [vmem:[%s10342_s9 + $0x370] ss:$8 sps:$4 sm:$0xff]   ;;  %v7829_v16 = vld [vmem:[%s10342_s9 + $0x384] ss:$8 sps:$4 sm:$0xff]   ;;  %v7827_v11 = vld [vmem:[%s10342_s9 + $0x380] ss:$8 sps:$4 sm:$0xff]  }
 0x636   : > { %5785 = vmatpush1.bf16.msra.mxu0 %v7761_v17  ;;  %v7832_v12 = vld [vmem:[%s10342_s9 + $0x394] ss:$8 sps:$4 sm:$0xff]   ;;  %v7830_v13 = vld [vmem:[%s10342_s9 + $0x390] ss:$8 sps:$4 sm:$0xff]   ;;  %v7835_v21 = vld [vmem:[%s10342_s9 + $0x3a4] ss:$8 sps:$4 sm:$0xff]  }
 0x637   : > { %5786 = vmatprep.subr.bf16.mxu0 %v7766_v1  ;;  %v7833_v44 = vld [vmem:[%s10342_s9 + $0x3a0] ss:$8 sps:$4 sm:$0xff]   ;;  %v7838_v57 = vld [vmem:[%s10342_s9 + $0x3b4] ss:$8 sps:$4 sm:$0xff]   ;;  %v7836_v47 = vld [vmem:[%s10342_s9 + $0x3b0] ss:$8 sps:$4 sm:$0xff]  }
 0x638   : > { %v7841_v27 = vld [vmem:[%s10342_s9 + $0x3c4] ss:$8 sps:$4 sm:$0xff]   ;;  %v7839_v22 = vld [vmem:[%s10342_s9 + $0x3c0] ss:$8 sps:$4 sm:$0xff]   ;;  %v7844_v7 = vld [vmem:[%s10342_s9 + $0x3d4] ss:$8 sps:$4 sm:$0xff]  }
 0x639   : > { %v7842_v5 = vld [vmem:[%s10342_s9 + $0x3d0] ss:$8 sps:$4 sm:$0xff]   ;;  %v7847_v26 = vld [vmem:[%s10342_s9 + $0x3e4] ss:$8 sps:$4 sm:$0xff]   ;;  %v7845_v17 = vld [vmem:[%s10342_s9 + $0x3e0] ss:$8 sps:$4 sm:$0xff]  }
 0x63a   : > { %5787 = vmatpush1.bf16.msra.mxu0 %v7764_v54  ;;  %v7850_v1 = vld [vmem:[%s10342_s9 + $0x3f4] ss:$8 sps:$4 sm:$0xff]   ;;  %v7848_v54 = vld [vmem:[%s10342_s9 + $0x3f0] ss:$8 sps:$4 sm:$0xff]  }
 0x63b   : > { %5788 = vmatprep.subr.bf16.mxu0 %v7769_v62  ;;  %v4908_v62 = vmax.f32 %v10078_v40, 0.0  ;;  %v7854_v40 = vld [vmem:[%s10344_s11 + $0x8] sm:$0xff]  }
 0x63e   : > { %5789 = vmatpush1.bf16.msra.mxu0 %v7767_v28  ;;  %v7851_v28 = vld [vmem:[%s10344_s11 + $0x40] sm:$0xff]  }
 0x63f   : > { %5790 = vmatprep.subr.bf16.mxu0 %v7772_v55  ;;  %v7852_v55 = vld [vmem:[%s10344_s11] sm:$0xff]  }
 0x642   : > { %5791 = vmatpush1.bf16.msra.mxu0 %v7770_v59  ;;  %v4916_v59 = vpack.c.bf16 %v4908_v62, %v4908_v62 }
 0x643   : > { %5792 = vmatprep.subr.bf16.mxu0 %v7775_v2  ;;  %v7853_v2 = vld [vmem:[%s10344_s11 + $0x48] sm:$0xff]  }
 0x646   : > { %5793 = vmatpush1.bf16.msra.mxu0 %v7773_v19  ;;  %v7855_v19 = vld [vmem:[%s10344_s11 + $0x50] sm:$0xff]  }
 0x647   : > { %5794 = vmatprep.subr.bf16.mxu0 %v7778_v33  ;;  %v7856_v33 = vld [vmem:[%s10344_s11 + $0x10] sm:$0xff]  }
 0x64a   : > { %5795 = vmatpush1.bf16.msra.mxu0 %v7776_v15  ;;  %v7857_v15 = vld [vmem:[%s10344_s11 + $0x58] sm:$0xff]  }
 0x64b   : > { %5796 = vmatprep.subr.bf16.mxu0 %v7781_v42  ;;  %v7858_v42 = vld [vmem:[%s10344_s11 + $0x18] sm:$0xff]  }
 0x64e   : > { %5797 = vmatpush1.bf16.msra.mxu0 %v7779_v3  ;;  %v7859_v3 = vld [vmem:[%s10344_s11 + $0x60] sm:$0xff]  }
 0x64f   : > { %5798 = vmatprep.subr.bf16.mxu0 %v7784_v23  ;;  %v7860_v23 = vld [vmem:[%s10344_s11 + $0x20] sm:$0xff]  }
 0x652   : > { %5799 = vmatpush1.bf16.msra.mxu0 %v7782_v34  ;;  %v7861_v34 = vld [vmem:[%s10344_s11 + $0x68] sm:$0xff]  }
 0x653   : > { %5800 = vmatprep.subr.bf16.mxu0 %v7787_v52  ;;  %v7862_v52 = vld [vmem:[%s10344_s11 + $0x28] sm:$0xff]  }
 0x656   : > { %5801 = vmatpush1.bf16.msra.mxu0 %v7785_v35 }
 0x657   : > { %5802 = vmatprep.subr.bf16.mxu0 %v7790_v18 }
 0x65a   : > { %5803 = vmatpush1.bf16.msra.mxu0 %v7788_v46 }
 0x65b   : > { %5804 = vmatprep.subr.bf16.mxu0 %v7793_v58 }
 0x65e   : > { %5805 = vmatpush1.bf16.msra.mxu0 %v7791_v37  ;;  %v7863_v37 = vld [vmem:[%s10344_s11 + $0x70] sm:$0xff]  }
 0x65f   : > { %5806 = vmatprep.subr.bf16.mxu0 %v7796_v41  ;;  %v7864_v41 = vld [vmem:[%s10344_s11 + $0x30] sm:$0xff]  }
 0x662   : > { %5807 = vmatpush1.bf16.msra.mxu0 %v7794_v48  ;;  %v7865_v48 = vld [vmem:[%s10344_s11 + $0x78] sm:$0xff]  }
 0x663   : > { %5808 = vmatprep.subr.bf16.mxu0 %v7799_v51  ;;  %v7866_v51 = vld [vmem:[%s10344_s11 + $0x38] sm:$0xff]  }
 0x666   : > { %5809 = vmatpush1.bf16.msra.mxu0 %v7797_v63  ;;  %v5046_v63 = vld [vmem:[%s10343_s10] sm:$0x3] }
 0x667   : > { %5810 = vmatprep.subr.bf16.mxu0 %v7802_v25  ;;  %v5691_v25 = vrot.slane %v5046_v63, %v4856_v6  ;;  %v5898_v6 = vld [vmem:[#allocation5] sm:$0x1] }
 0x66a   : > { %5811 = vmatpush1.bf16.msra.mxu0 %v7800_v60  ;;  %v5695_v60 = vrot.slane %v5046_v63, %v4860_v36 }
 0x66b   : > { %5821 = vmatprep.subr.bf16.mxu0 %v7805_v45 }
 0x66d   : > { %5813 = vmatmul.mubr.bf16.vlgmr.msra.gmra.mrb[160].mxu0 %v4914_v20 }
 0x66e   : > { %5822 = vmatpush1.bf16.msra.mxu0 %v7803_v29  ;;  %5853 = vmatprep.mubr.bf16.mxu0 %v4917_v49 }
 0x66f   : > { %5823 = vmatprep.subr.bf16.mxu0 %v7808_v8 }
 0x672   : > { %5824 = vmatpush1.bf16.msra.mxu0 %v7806_v31 }
 0x673   : > { %5825 = vmatprep.subr.bf16.mxu0 %v7811_v39 }
 0x676   : > { %5826 = vmatpush1.bf16.msra.mxu0 %v7809_v32 }
 0x677   : > { %5827 = vmatprep.subr.bf16.mxu0 %v7814_v38 }
 0x67a   : > { %5828 = vmatpush1.bf16.msra.mxu0 %v7812_v0 }
 0x67b   : > { %5829 = vmatprep.subr.bf16.mxu0 %v7817_v30 }
 0x67e   : > { %5830 = vmatpush1.bf16.msra.mxu0 %v7815_v56 }
 0x67f   : > { %5831 = vmatprep.subr.bf16.mxu0 %v7820_v53 }
 0x682   : > { %5832 = vmatpush1.bf16.msra.mxu0 %v7818_v10 }
 0x683   : > { %5833 = vmatprep.subr.bf16.mxu0 %v7823_v4 }
 0x686   : > { %5834 = vmatpush1.bf16.msra.mxu0 %v7821_v9 }
 0x687   : > { %5835 = vmatprep.subr.bf16.mxu0 %v7826_v24 }
 0x68a   : > { %5836 = vmatpush1.bf16.msra.mxu0 %v7824_v61 }
 0x68b   : > { %5837 = vmatprep.subr.bf16.mxu0 %v7829_v16 }
 0x68e   : > { %5838 = vmatpush1.bf16.msra.mxu0 %v7827_v11 }
 0x68f   : > { %5839 = vmatprep.subr.bf16.mxu0 %v7832_v12 }
 0x692   : > { %5840 = vmatpush1.bf16.msra.mxu0 %v7830_v13 }
 0x693   : > { %5841 = vmatprep.subr.bf16.mxu0 %v7835_v21 }
 0x696   : > { %5842 = vmatpush1.bf16.msra.mxu0 %v7833_v44 }
 0x697   : > { %5843 = vmatprep.subr.bf16.mxu0 %v7838_v57 }
 0x69a   : > { %5844 = vmatpush1.bf16.msra.mxu0 %v7836_v47 }
 0x69b   : > { %5845 = vmatprep.subr.bf16.mxu0 %v7841_v27 }
 0x69e   : > { %5846 = vmatpush1.bf16.msra.mxu0 %v7839_v22 }
 0x69f   : > { %5847 = vmatprep.subr.bf16.mxu0 %v7844_v7 }
 0x6a2   : > { %5848 = vmatpush1.bf16.msra.mxu0 %v7842_v5 }
 0x6a3   : > { %5849 = vmatprep.subr.bf16.mxu0 %v7847_v26 }
 0x6a6   : > { %5850 = vmatpush1.bf16.msra.mxu0 %v7845_v17 }
 0x6a7   : > { %5851 = vmatprep.subr.bf16.mxu0 %v7850_v1 }
 0x6aa   : > { %5852 = vmatpush1.bf16.msra.mxu0 %v7848_v54 }
 0x6ab   : > { %6816 = vmatprep.subr.bf16.mxu0 %v7851_v28 }
 0x6ad   : > { %5854 = vmatmul.mubr.bf16.vlgmr.msra.gmra.mrb[160].mxu0 %v4916_v59 }
 0x6ae   : > { %6817 = vmatpush3.bf16.msra.mxu0 %v7852_v55 }
 0x6af   : > { %6818 = vmatprep.subr.bf16.mxu0 %v7853_v2 }
 0x6b2   : > { %6819 = vmatpush3.bf16.msra.mxu0 %v7854_v40 }
 0x6b3   : > { %6820 = vmatprep.subr.bf16.mxu0 %v7855_v19 }
 0x6b6   : > { %6821 = vmatpush3.bf16.msra.mxu0 %v7856_v33 }
 0x6b7   : > { %6822 = vmatprep.subr.bf16.mxu0 %v7857_v15 }
 0x6ba   : > { %6823 = vmatpush3.bf16.msra.mxu0 %v7858_v42 }
 0x6bb   : > { %6824 = vmatprep.subr.bf16.mxu0 %v7859_v3 }
 0x6be   : > { %6825 = vmatpush3.bf16.msra.mxu0 %v7860_v23 }
 0x6bf   : > { %6826 = vmatprep.subr.bf16.mxu0 %v7861_v34 }
 0x6c2   : > { %6827 = vmatpush3.bf16.msra.mxu0 %v7862_v52 }
 0x6c3   : > { %6828 = vmatprep.subr.bf16.mxu0 %v7863_v37 }
 0x6c6   : > { %6829 = vmatpush3.bf16.msra.mxu0 %v7864_v41 }
 0x6c7   : > { %6830 = vmatprep.subr.bf16.mxu0 %v7865_v48 }
 0x6ca   : > { %6831 = vmatpush3.bf16.msra.mxu0 %v7866_v51 }
 0x700   : > { %v5732_v35 = vpop.f32.mrb[32].mxu1 }
 0x701   : > { %v5734_v18 = vpop.f32.mrb[33].mxu1  ;;  %v5733_v43 = vadd.f32 %v5732_v35, %v5691_v25 }
 0x702   : > { %v5736_v46 = vpop.f32.mrb[34].mxu1  ;;  %v5735_v45 = vadd.f32 %v5734_v18, %v5695_v60 }
 0x703   : > { %v5737_v58 = vpop.f32.mrb[35].mxu1 }
 0x780   : > { %v5855_v14 = vpop.f32.mrb[160].mxu0 }
 0x781   : > { %v7327_v29 = vadd.f32 %v5855_v14, %v5733_v43  ;;  %v5857_v20 = vpop.f32.mrb[161].mxu0 }
 0x782   : > { %v7329_v8 = vadd.f32 %v5857_v20, %v5735_v45  ;;  %v5859_v49 = vpop.f32.mrb[162].mxu0 }
 0x783   : > { %v5862_v31 = vmax.f32 %v7327_v29, 0.0  ;;  %v5860_v39 = vpop.f32.mrb[163].mxu0 }
 0x784   : > { %v5863_v32 = vmax.f32 %v7329_v8, 0.0 }
 0x785   : > { %v5864_v0 = vpack.c.bf16 %v5862_v31, %v5862_v31 }
 0x786   : > { %v5865_v38 = vpack.c.bf16 %v5863_v32, %v5863_v32 }
 0x788   : > { %6027 = vmatprep.mubr.bf16.mxu0 %v5865_v38 }
 0x789   : > { %6028 = vmatmul.mubr.bf16.vlgmr.msra.gmra.mrb[164].mxu0 %v5864_v0 }
 0x85c   : > { %v6832_v30 = vpop.f32.mrb[164].mxu0 }
 0x85d   : > { %v6833_v56 = vpop.f32.mrb[165].mxu0 }
 0x85e   : > { %v6834_v50 = vadd.f32 %v6833_v56, %v6832_v30  ;;  %v6835_v36 = vpop.f32.mrb[166].mxu0 }
 0x85f   : > { %v6836_v53 = vpop.f32.mrb[167].mxu0 }
 0x860   : > { %v6030_v10 = vadd.f32 %v6834_v50, %v5898_v6 }
 0x862   : > { %v6035_v4 = vsub.f32 0.0, %v6030_v10 }
 0x864   : > { %v6036_v9 = vmul.f32 1.442695, %v6035_v4 }
 0x866   : > { %7867 = vpow2.f32 %v6036_v9 }
 0x870   : > { %v7868_v24 = vpop.eup %7867 }
 0x871   : > { %v6038_v61 = vadd.f32 1.0, %v7868_v24 }
 0x873   : > { %7869 = vrcp.f32 %v6038_v61 }
 0x87d   : > { %v7870_v16 = vpop.eup %7869 }
 0x87e   : > { %6042 = vst.msk [vmem:[%s440_s24] sm:$0x1] %vm6041_vm6, %v7870_v16 }
 0x87f PF: > { %s27_s29 = sadd.s32 1, %s7877_s29  }
 0x880   : > { %p24_p4 = scmp.ge.s32.totalorder %s27_s29, 4  }
 0x882   :  { %26 = sbr.rel (!%p24_p4) target bundleno = 3 (0x3), region = 128 }

</bundles_post_ra>
